<compile_context>
chip_gen: v5e
topology: v5e:2x2
jax: 0.10.0
libtpu: 0.0.40
codegen_flags: <defaults>
</compile_context>

<pallas_src>
import functools
import math

import jax
import jax.numpy as jnp
from jax.experimental import pallas as pl
from jax.experimental.pallas import tpu as pltpu

S = 8           # sequence length (unbatched input rows)
D = 256         # d_model
H = 8           # nhead (nn.TransformerDecoderLayer has no default -> chosen 8)
HD = D // H     # head dim = 32
FF = 2048       # dim_feedforward (PyTorch default)
TFF = 512       # FFN chunk streamed per grid step (double-buffered ~1 MiB bf16)
LN_EPS = 1e-5
BN_EPS = 1e-5
SLAB_ROWS = 16  # packed small-parameter slab (16, 256)

# slab row layout
_R_BQ, _R_BK, _R_BV, _R_BO = 0, 1, 2, 3
_R_LN1G, _R_LN1B, _R_LN2G, _R_LN2B, _R_LN3G, _R_LN3B = 4, 5, 6, 7, 8, 9
_R_B2, _R_BNG, _R_BNB = 10, 11, 12
_R_WHEAD = 13          # rows 13..14 : folded head weight, transposed (2, 256)
_R_BHEAD = 15          # row 15, lanes 0..1 : folded head bias


def _layernorm(x, gamma, beta):
    mean = jnp.mean(x, axis=-1, keepdims=True)
    var = jnp.mean((x - mean) ** 2, axis=-1, keepdims=True)
    return (x - mean) * jax.lax.rsqrt(var + LN_EPS) * gamma + beta


def transformer_kernel(
    x_ref, wqkv_ref, wo_ref, slab_ref, w1_ref, b1_ref, w2_ref,
    o_ref,
    xs_ref, acc_ref,
):
    k = pl.program_id(0)

    # ------------- step 0: self-attention + LN1 + LN2 (once) ----------------
    @pl.when(k == 0)
    def _():
        x = x_ref[...].astype(jnp.float32)

        # Fused Q/K/V projection: one MXU pass with N=768 (bf16 weights, f32 acc).
        qkv = jnp.dot(x.astype(jnp.bfloat16), wqkv_ref[...],
                      preferred_element_type=jnp.float32)
        q = qkv[:, 0:D] + slab_ref[_R_BQ:_R_BQ + 1, :]
        kk = qkv[:, D:2 * D] + slab_ref[_R_BK:_R_BK + 1, :]
        v = qkv[:, 2 * D:3 * D] + slab_ref[_R_BV:_R_BV + 1, :]

        scale = 1.0 / math.sqrt(HD)
        ctxs = []
        for h in range(H):                      # static unroll over 8 heads
            sl = slice(h * HD, (h + 1) * HD)
            qh, kh, vh = q[:, sl], kk[:, sl], v[:, sl]
            # q @ k^T without materializing a transpose (contract last dims).
            s = jax.lax.dot_general(qh, kh, (((1,), (1,)), ((), ())),
                                    preferred_element_type=jnp.float32) * scale
            s = s - jnp.max(s, axis=-1, keepdims=True)
            p = jnp.exp(s)
            p = p * pl.reciprocal(jnp.sum(p, axis=-1, keepdims=True), approx=True)
            ctxs.append(jnp.dot(p, vh, preferred_element_type=jnp.float32))
        # One K=256 output-projection matmul instead of 8 K=32 pushes + adds.
        ctx = jnp.concatenate(ctxs, axis=-1)                        # (S, D)
        attn = jnp.dot(ctx.astype(jnp.bfloat16), wo_ref[...],
                       preferred_element_type=jnp.float32)
        attn = attn + slab_ref[_R_BO:_R_BO + 1, :]

        x1 = _layernorm(x + attn,
                        slab_ref[_R_LN1G:_R_LN1G + 1, :],
                        slab_ref[_R_LN1B:_R_LN1B + 1, :])
        # cross-attention block: memory is None in the original forward -> skipped.
        x2 = _layernorm(x1,
                        slab_ref[_R_LN2G:_R_LN2G + 1, :],
                        slab_ref[_R_LN2B:_R_LN2B + 1, :])
        xs_ref[...] = x2
        acc_ref[...] = jnp.zeros_like(acc_ref)

    # ------------- every step: one streamed FFN chunk ------------------------
    xcur = xs_ref[...]
    h1 = jnp.dot(xcur.astype(jnp.bfloat16), w1_ref[...],
                 preferred_element_type=jnp.float32) + b1_ref[...]
    h1 = jnp.maximum(h1, 0.0)
    acc_ref[...] += jnp.dot(h1.astype(jnp.bfloat16), w2_ref[...],
                            preferred_element_type=jnp.float32)

    # ------------- last step: LN3, BatchNorm, head, log_softmax -------------
    @pl.when(k == pl.num_programs(0) - 1)
    def _():
        xc = xs_ref[...]
        ff = acc_ref[...] + slab_ref[_R_B2:_R_B2 + 1, :]
        x3 = _layernorm(xc + ff,
                        slab_ref[_R_LN3G:_R_LN3G + 1, :],
                        slab_ref[_R_LN3B:_R_LN3B + 1, :])

        # F.dropout(p=0.5) -> identity (deterministic forward)

        # BatchNorm1d(256): batch (seq-axis) statistics
        mu = jnp.mean(x3, axis=0, keepdims=True)
        var = jnp.mean((x3 - mu) ** 2, axis=0, keepdims=True)
        xb = (x3 - mu) * jax.lax.rsqrt(var + BN_EPS)
        xb = xb * slab_ref[_R_BNG:_R_BNG + 1, :] + slab_ref[_R_BNB:_R_BNB + 1, :]

        # head: folded 256 -> 2 (weight stored transposed in the slab), log_softmax
        w_head_t = slab_ref[_R_WHEAD:_R_WHEAD + 2, :]               # (2, D)
        y = jax.lax.dot_general(xb, w_head_t, (((1,), (1,)), ((), ())),
                                preferred_element_type=jnp.float32)  # (S, 2)
        y = y + slab_ref[_R_BHEAD:_R_BHEAD + 1, 0:2]
        y = y - jnp.max(y, axis=-1, keepdims=True)
        lse = jnp.log(jnp.sum(jnp.exp(y), axis=-1, keepdims=True))
        o_ref[...] = (y - lse).astype(o_ref.dtype)


@jax.jit
def transformer_forward(x, packed_params):
    wqkv, wo, slab, w1, b1, w2 = packed_params
    n_chunks = FF // TFF
    grid_spec = pltpu.PrefetchScalarGridSpec(
        num_scalar_prefetch=0,
        grid=(n_chunks,),
        in_specs=[
            pl.BlockSpec((S, D), lambda k: (0, 0)),            # x (resident)
            pl.BlockSpec((D, 3 * D), lambda k: (0, 0)),        # Wqkv (resident)
            pl.BlockSpec((D, D), lambda k: (0, 0)),            # Wo (resident)
            pl.BlockSpec((SLAB_ROWS, D), lambda k: (0, 0)),    # param slab (resident)
            pl.BlockSpec((D, TFF), lambda k: (0, k)),          # W1 chunk (streamed)
            pl.BlockSpec((1, TFF), lambda k: (0, k)),          # b1 chunk (streamed)
            pl.BlockSpec((TFF, D), lambda k: (k, 0)),          # W2 chunk (streamed)
        ],
        out_specs=pl.BlockSpec((S, 2), lambda k: (0, 0)),
        scratch_shapes=[
            pltpu.VMEM((S, D), jnp.float32),   # post-LN2 activation, reused all chunks
            pltpu.VMEM((S, D), jnp.float32),   # FFN accumulator
        ],
    )
    return pl.pallas_call(
        transformer_kernel,
        out_shape=jax.ShapeDtypeStruct((S, 2), jnp.float32),
        grid_spec=grid_spec,
        compiler_params=pltpu.CompilerParams(
            dimension_semantics=("arbitrary",),
            vmem_limit_bytes=16 * 1024 * 1024,   # footprint ~1.6 MiB; safe on v7x
        ),
    )(x, wqkv, wo, slab, w1, b1, w2)


def init_params(key):
    """Deterministic parameter init (PyTorch-like shapes, weights stored (in, out))."""
    def linear(key, fan_in, fan_out):
        kw, kb = jax.random.split(key)
        bound = 1.0 / math.sqrt(fan_in)
        w = jax.random.uniform(kw, (fan_in, fan_out), jnp.float32, -bound, bound)
        b = jax.random.uniform(kb, (1, fan_out), jnp.float32, -bound, bound)
        return w, b

    keys = jax.random.split(key, 8)
    wq, bq = linear(keys[0], D, D)
    wk, bk = linear(keys[1], D, D)
    wv, bv = linear(keys[2], D, D)
    wo, bo = linear(keys[3], D, D)
    w1, b1 = linear(keys[4], D, FF)
    w2, b2 = linear(keys[5], FF, D)
    wlin, blin = linear(keys[6], D, 64)
    wout, bout = linear(keys[7], 64, 2)

    ones_d = jnp.ones((1, D), jnp.float32)
    zeros_d = jnp.zeros((1, D), jnp.float32)
    # LayerNorm / BatchNorm affine params use PyTorch default init (gamma=1, beta=0).
    return [
        wq, bq, wk, bk, wv, bv, wo, bo,
        ones_d, zeros_d,   # ln1
        ones_d, zeros_d,   # ln2
        ones_d, zeros_d,   # ln3
        w1, b1, w2, b2,
        ones_d, zeros_d,   # batchnorm gamma/beta
        wlin, blin, wout, bout,
    ]


def pack_params(params):
    """One-time host-side packing: QKV fusion, bf16 weight cast, head-linear fold,
    and consolidation of all small vectors into a single (16, 256) f32 slab."""
    (wq, bq, wk, bk, wv, bv, wo, bo,
     ln1g, ln1b, ln2g, ln2b, ln3g, ln3b,
     w1, b1, w2, b2,
     bng, bnb,
     wlin, blin, wout, bout) = params

    wqkv = jnp.concatenate([wq, wk, wv], axis=1).astype(jnp.bfloat16)   # (D, 3D)

    # No nonlinearity between the two head linears -> fold exactly.
    w_head = jnp.dot(wlin, wout)                                        # (D, 2)
    b_head = jnp.dot(blin, wout) + bout                                 # (1, 2)
    b_head_row = jnp.zeros((1, D), jnp.float32).at[:, :2].set(b_head)

    slab = jnp.concatenate(
        [bq, bk, bv, bo,
         ln1g, ln1b, ln2g, ln2b, ln3g, ln3b,
         b2, bng, bnb,
         w_head.T,          # rows 13..14
         b_head_row],       # row 15
        axis=0).astype(jnp.float32)                                     # (16, D)
    assert slab.shape == (SLAB_ROWS, D)

    # TODO(synk): optionally store W1/W2 as int8 (v5e/v6e) or fp8 (v7x) with
    # per-column scales to halve the dominant FFN weight DMA.
    return [
        wqkv,
        wo.astype(jnp.bfloat16),
        slab,
        w1.astype(jnp.bfloat16),
        b1,
        w2.astype(jnp.bfloat16),
    ]


if __name__ == "__main__":
    key = jax.random.PRNGKey(0)
    kx, kp = jax.random.split(key)
    x = jax.random.normal(kx, (S, D), jnp.float32)
    params = init_params(kp)
    packed = pack_params(params)

    out = transformer_forward(x, packed)
    out = jax.block_until_ready(out)

    assert out.shape == (S, 2) and out.dtype == jnp.float32
    # log_softmax rows must (exp-)sum to ~1
    assert bool(jnp.all(jnp.abs(jnp.sum(jnp.exp(out), axis=-1) - 1.0) < 1e-4))
    print("KERNEL_OK")
</pallas_src>

<mosaic_0001>
module attributes {stable_mosaic.version = 11 : i64} {
  func.func @transformer_kernel(%arg0: i32, %arg1: memref<8x256xf32, #tpu.memory_space<vmem>>, %arg2: memref<256x768xbf16, #tpu.memory_space<vmem>>, %arg3: memref<256x256xbf16, #tpu.memory_space<vmem>>, %arg4: memref<16x256xf32, #tpu.memory_space<vmem>>, %arg5: memref<256x512xbf16, #tpu.memory_space<vmem>>, %arg6: memref<1x512xf32, #tpu.memory_space<vmem>>, %arg7: memref<512x256xbf16, #tpu.memory_space<vmem>>, %arg8: memref<8x2xf32, #tpu.memory_space<vmem>>, %arg9: memref<8x256xf32, #tpu.memory_space<vmem>>, %arg10: memref<8x256xf32, #tpu.memory_space<vmem>>) attributes {dimension_semantics = [#tpu.dimension_semantics<arbitrary>], iteration_bounds = array<i64: 4>, scalar_prefetch = 0 : i64, scratch_operands = 2 : i64, tpu.core_type = #tpu.core_type<tc>, window_params = [{pipeline_mode = #tpu.pipeline_mode<synchronous>, transform_indices = @transform_0, window_bounds = array<i64: 8, 256>}, {pipeline_mode = #tpu.pipeline_mode<synchronous>, transform_indices = @transform_1, window_bounds = array<i64: 256, 768>}, {pipeline_mode = #tpu.pipeline_mode<synchronous>, transform_indices = @transform_2, window_bounds = array<i64: 256, 256>}, {pipeline_mode = #tpu.pipeline_mode<synchronous>, transform_indices = @transform_3, window_bounds = array<i64: 16, 256>}, {transform_indices = @transform_4, window_bounds = array<i64: 256, 512>}, {transform_indices = @transform_5, window_bounds = array<i64: 1, 512>}, {transform_indices = @transform_6, window_bounds = array<i64: 512, 256>}, {pipeline_mode = #tpu.pipeline_mode<synchronous>, transform_indices = @transform_7, window_bounds = array<i64: 8, 2>}]} {
    %c0_i32 = arith.constant 0 : i32
    %0 = arith.cmpi eq, %arg0, %c0_i32 : i32
    %1 = arith.extui %0 : i1 to i32
    %c0_i32_0 = arith.constant 0 : i32
    %2 = arith.cmpi ne, %1, %c0_i32_0 : i32
    scf.if %2 {
      %c0_15 = arith.constant 0 : index
      %c0_16 = arith.constant 0 : index
      %21 = vector.load %arg1[%c0_15, %c0_16] : memref<8x256xf32, #tpu.memory_space<vmem>>, vector<8x256xf32>
      %22 = arith.truncf %21 : vector<8x256xf32> to vector<8x256xbf16>
      %c0_17 = arith.constant 0 : index
      %c0_18 = arith.constant 0 : index
      %23 = vector.load %arg2[%c0_17, %c0_18] : memref<256x768xbf16, #tpu.memory_space<vmem>>, vector<256x768xbf16>
      %cst_19 = arith.constant dense<0.000000e+00> : vector<8x768xf32>
      %24 = tpu.matmul %22, %23, %cst_19 {dimension_numbers = #tpu.dot_dimension_numbers<[1], [0], [0], [1], [0, 0, 1, 1], [], []>} : vector<8x256xbf16>, vector<256x768xbf16>, vector<8x768xf32> -> vector<8x768xf32>
      %25 = vector.extract_strided_slice %24 {offsets = [0, 0], sizes = [8, 256], strides = [1, 1]} : vector<8x768xf32> to vector<8x256xf32>
      %c0_20 = arith.constant 0 : index
      %c0_21 = arith.constant 0 : index
      %26 = vector.load %arg4[%c0_20, %c0_21] : memref<16x256xf32, #tpu.memory_space<vmem>>, vector<1x256xf32>
      %27 = vector.broadcast %26 : vector<1x256xf32> to vector<8x256xf32>
      %28 = arith.addf %25, %27 : vector<8x256xf32>
      %29 = vector.extract_strided_slice %24 {offsets = [0, 256], sizes = [8, 256], strides = [1, 1]} : vector<8x768xf32> to vector<8x256xf32>
      %c1 = arith.constant 1 : index
      %c0_22 = arith.constant 0 : index
      %30 = vector.load %arg4[%c1, %c0_22] : memref<16x256xf32, #tpu.memory_space<vmem>>, vector<1x256xf32>
      %31 = vector.broadcast %30 : vector<1x256xf32> to vector<8x256xf32>
      %32 = arith.addf %29, %31 : vector<8x256xf32>
      %33 = vector.extract_strided_slice %24 {offsets = [0, 512], sizes = [8, 256], strides = [1, 1]} : vector<8x768xf32> to vector<8x256xf32>
      %c2 = arith.constant 2 : index
      %c0_23 = arith.constant 0 : index
      %34 = vector.load %arg4[%c2, %c0_23] : memref<16x256xf32, #tpu.memory_space<vmem>>, vector<1x256xf32>
      %35 = vector.broadcast %34 : vector<1x256xf32> to vector<8x256xf32>
      %36 = arith.addf %33, %35 : vector<8x256xf32>
      %37 = vector.extract_strided_slice %28 {offsets = [0, 0], sizes = [8, 32], strides = [1, 1]} : vector<8x256xf32> to vector<8x32xf32>
      %38 = vector.extract_strided_slice %32 {offsets = [0, 0], sizes = [8, 32], strides = [1, 1]} : vector<8x256xf32> to vector<8x32xf32>
      %39 = vector.extract_strided_slice %36 {offsets = [0, 0], sizes = [8, 32], strides = [1, 1]} : vector<8x256xf32> to vector<8x32xf32>
      %cst_24 = arith.constant dense<0.000000e+00> : vector<8x8xf32>
      %40 = tpu.matmul %37, %38, %cst_24 {dimension_numbers = #tpu.dot_dimension_numbers<[1], [1], [0], [0], [0, 0, 1, 0], [], []>} : vector<8x32xf32>, vector<8x32xf32>, vector<8x8xf32> -> vector<8x8xf32>
      %cst_25 = arith.constant 0.176776692 : f32
      %41 = vector.broadcast %cst_25 : f32 to vector<8x8xf32>
      %42 = arith.mulf %40, %41 : vector<8x8xf32>
      %cst_26 = arith.constant dense<0xFF800000> : vector<8xf32>
      %43 = vector.multi_reduction <maximumf>, %42, %cst_26 [1] : vector<8x8xf32> to vector<8xf32>
      %44 = vector.shape_cast %43 : vector<8xf32> to vector<8x1xf32>
      %45 = vector.broadcast %44 : vector<8x1xf32> to vector<8x8xf32>
      %46 = arith.subf %42, %45 : vector<8x8xf32>
      %47 = math.exp %46 : vector<8x8xf32>
      %cst_27 = arith.constant dense<0.000000e+00> : vector<8xf32>
      %48 = vector.multi_reduction <add>, %47, %cst_27 [1] : vector<8x8xf32> to vector<8xf32>
      %49 = vector.shape_cast %48 : vector<8xf32> to vector<8x1xf32>
      %50 = tpu.reciprocal %49 {approx = true} : vector<8x1xf32> -> vector<8x1xf32>
      %51 = vector.broadcast %50 : vector<8x1xf32> to vector<8x8xf32>
      %52 = arith.mulf %47, %51 : vector<8x8xf32>
      %cst_28 = arith.constant dense<0.000000e+00> : vector<8x32xf32>
      %53 = tpu.matmul %52, %39, %cst_28 {dimension_numbers = #tpu.dot_dimension_numbers<[1], [0], [0], [1], [0, 0, 1, 1], [], []>} : vector<8x8xf32>, vector<8x32xf32>, vector<8x32xf32> -> vector<8x32xf32>
      %54 = vector.extract_strided_slice %28 {offsets = [0, 32], sizes = [8, 32], strides = [1, 1]} : vector<8x256xf32> to vector<8x32xf32>
      %55 = vector.extract_strided_slice %32 {offsets = [0, 32], sizes = [8, 32], strides = [1, 1]} : vector<8x256xf32> to vector<8x32xf32>
      %56 = vector.extract_strided_slice %36 {offsets = [0, 32], sizes = [8, 32], strides = [1, 1]} : vector<8x256xf32> to vector<8x32xf32>
      %cst_29 = arith.constant dense<0.000000e+00> : vector<8x8xf32>
      %57 = tpu.matmul %54, %55, %cst_29 {dimension_numbers = #tpu.dot_dimension_numbers<[1], [1], [0], [0], [0, 0, 1, 0], [], []>} : vector<8x32xf32>, vector<8x32xf32>, vector<8x8xf32> -> vector<8x8xf32>
      %cst_30 = arith.constant 0.176776692 : f32
      %58 = vector.broadcast %cst_30 : f32 to vector<8x8xf32>
      %59 = arith.mulf %57, %58 : vector<8x8xf32>
      %cst_31 = arith.constant dense<0xFF800000> : vector<8xf32>
      %60 = vector.multi_reduction <maximumf>, %59, %cst_31 [1] : vector<8x8xf32> to vector<8xf32>
      %61 = vector.shape_cast %60 : vector<8xf32> to vector<8x1xf32>
      %62 = vector.broadcast %61 : vector<8x1xf32> to vector<8x8xf32>
      %63 = arith.subf %59, %62 : vector<8x8xf32>
      %64 = math.exp %63 : vector<8x8xf32>
      %cst_32 = arith.constant dense<0.000000e+00> : vector<8xf32>
      %65 = vector.multi_reduction <add>, %64, %cst_32 [1] : vector<8x8xf32> to vector<8xf32>
      %66 = vector.shape_cast %65 : vector<8xf32> to vector<8x1xf32>
      %67 = tpu.reciprocal %66 {approx = true} : vector<8x1xf32> -> vector<8x1xf32>
      %68 = vector.broadcast %67 : vector<8x1xf32> to vector<8x8xf32>
      %69 = arith.mulf %64, %68 : vector<8x8xf32>
      %cst_33 = arith.constant dense<0.000000e+00> : vector<8x32xf32>
      %70 = tpu.matmul %69, %56, %cst_33 {dimension_numbers = #tpu.dot_dimension_numbers<[1], [0], [0], [1], [0, 0, 1, 1], [], []>} : vector<8x8xf32>, vector<8x32xf32>, vector<8x32xf32> -> vector<8x32xf32>
      %71 = vector.extract_strided_slice %28 {offsets = [0, 64], sizes = [8, 32], strides = [1, 1]} : vector<8x256xf32> to vector<8x32xf32>
      %72 = vector.extract_strided_slice %32 {offsets = [0, 64], sizes = [8, 32], strides = [1, 1]} : vector<8x256xf32> to vector<8x32xf32>
      %73 = vector.extract_strided_slice %36 {offsets = [0, 64], sizes = [8, 32], strides = [1, 1]} : vector<8x256xf32> to vector<8x32xf32>
      %cst_34 = arith.constant dense<0.000000e+00> : vector<8x8xf32>
      %74 = tpu.matmul %71, %72, %cst_34 {dimension_numbers = #tpu.dot_dimension_numbers<[1], [1], [0], [0], [0, 0, 1, 0], [], []>} : vector<8x32xf32>, vector<8x32xf32>, vector<8x8xf32> -> vector<8x8xf32>
      %cst_35 = arith.constant 0.176776692 : f32
      %75 = vector.broadcast %cst_35 : f32 to vector<8x8xf32>
      %76 = arith.mulf %74, %75 : vector<8x8xf32>
      %cst_36 = arith.constant dense<0xFF800000> : vector<8xf32>
      %77 = vector.multi_reduction <maximumf>, %76, %cst_36 [1] : vector<8x8xf32> to vector<8xf32>
      %78 = vector.shape_cast %77 : vector<8xf32> to vector<8x1xf32>
      %79 = vector.broadcast %78 : vector<8x1xf32> to vector<8x8xf32>
      %80 = arith.subf %76, %79 : vector<8x8xf32>
      %81 = math.exp %80 : vector<8x8xf32>
      %cst_37 = arith.constant dense<0.000000e+00> : vector<8xf32>
      %82 = vector.multi_reduction <add>, %81, %cst_37 [1] : vector<8x8xf32> to vector<8xf32>
      %83 = vector.shape_cast %82 : vector<8xf32> to vector<8x1xf32>
      %84 = tpu.reciprocal %83 {approx = true} : vector<8x1xf32> -> vector<8x1xf32>
      %85 = vector.broadcast %84 : vector<8x1xf32> to vector<8x8xf32>
      %86 = arith.mulf %81, %85 : vector<8x8xf32>
      %cst_38 = arith.constant dense<0.000000e+00> : vector<8x32xf32>
      %87 = tpu.matmul %86, %73, %cst_38 {dimension_numbers = #tpu.dot_dimension_numbers<[1], [0], [0], [1], [0, 0, 1, 1], [], []>} : vector<8x8xf32>, vector<8x32xf32>, vector<8x32xf32> -> vector<8x32xf32>
      %88 = vector.extract_strided_slice %28 {offsets = [0, 96], sizes = [8, 32], strides = [1, 1]} : vector<8x256xf32> to vector<8x32xf32>
      %89 = vector.extract_strided_slice %32 {offsets = [0, 96], sizes = [8, 32], strides = [1, 1]} : vector<8x256xf32> to vector<8x32xf32>
      %90 = vector.extract_strided_slice %36 {offsets = [0, 96], sizes = [8, 32], strides = [1, 1]} : vector<8x256xf32> to vector<8x32xf32>
      %cst_39 = arith.constant dense<0.000000e+00> : vector<8x8xf32>
      %91 = tpu.matmul %88, %89, %cst_39 {dimension_numbers = #tpu.dot_dimension_numbers<[1], [1], [0], [0], [0, 0, 1, 0], [], []>} : vector<8x32xf32>, vector<8x32xf32>, vector<8x8xf32> -> vector<8x8xf32>
      %cst_40 = arith.constant 0.176776692 : f32
      %92 = vector.broadcast %cst_40 : f32 to vector<8x8xf32>
      %93 = arith.mulf %91, %92 : vector<8x8xf32>
      %cst_41 = arith.constant dense<0xFF800000> : vector<8xf32>
      %94 = vector.multi_reduction <maximumf>, %93, %cst_41 [1] : vector<8x8xf32> to vector<8xf32>
      %95 = vector.shape_cast %94 : vector<8xf32> to vector<8x1xf32>
      %96 = vector.broadcast %95 : vector<8x1xf32> to vector<8x8xf32>
      %97 = arith.subf %93, %96 : vector<8x8xf32>
      %98 = math.exp %97 : vector<8x8xf32>
      %cst_42 = arith.constant dense<0.000000e+00> : vector<8xf32>
      %99 = vector.multi_reduction <add>, %98, %cst_42 [1] : vector<8x8xf32> to vector<8xf32>
      %100 = vector.shape_cast %99 : vector<8xf32> to vector<8x1xf32>
      %101 = tpu.reciprocal %100 {approx = true} : vector<8x1xf32> -> vector<8x1xf32>
      %102 = vector.broadcast %101 : vector<8x1xf32> to vector<8x8xf32>
      %103 = arith.mulf %98, %102 : vector<8x8xf32>
      %cst_43 = arith.constant dense<0.000000e+00> : vector<8x32xf32>
      %104 = tpu.matmul %103, %90, %cst_43 {dimension_numbers = #tpu.dot_dimension_numbers<[1], [0], [0], [1], [0, 0, 1, 1], [], []>} : vector<8x8xf32>, vector<8x32xf32>, vector<8x32xf32> -> vector<8x32xf32>
      %105 = vector.extract_strided_slice %28 {offsets = [0, 128], sizes = [8, 32], strides = [1, 1]} : vector<8x256xf32> to vector<8x32xf32>
      %106 = vector.extract_strided_slice %32 {offsets = [0, 128], sizes = [8, 32], strides = [1, 1]} : vector<8x256xf32> to vector<8x32xf32>
      %107 = vector.extract_strided_slice %36 {offsets = [0, 128], sizes = [8, 32], strides = [1, 1]} : vector<8x256xf32> to vector<8x32xf32>
      %cst_44 = arith.constant dense<0.000000e+00> : vector<8x8xf32>
      %108 = tpu.matmul %105, %106, %cst_44 {dimension_numbers = #tpu.dot_dimension_numbers<[1], [1], [0], [0], [0, 0, 1, 0], [], []>} : vector<8x32xf32>, vector<8x32xf32>, vector<8x8xf32> -> vector<8x8xf32>
      %cst_45 = arith.constant 0.176776692 : f32
      %109 = vector.broadcast %cst_45 : f32 to vector<8x8xf32>
      %110 = arith.mulf %108, %109 : vector<8x8xf32>
      %cst_46 = arith.constant dense<0xFF800000> : vector<8xf32>
      %111 = vector.multi_reduction <maximumf>, %110, %cst_46 [1] : vector<8x8xf32> to vector<8xf32>
      %112 = vector.shape_cast %111 : vector<8xf32> to vector<8x1xf32>
      %113 = vector.broadcast %112 : vector<8x1xf32> to vector<8x8xf32>
      %114 = arith.subf %110, %113 : vector<8x8xf32>
      %115 = math.exp %114 : vector<8x8xf32>
      %cst_47 = arith.constant dense<0.000000e+00> : vector<8xf32>
      %116 = vector.multi_reduction <add>, %115, %cst_47 [1] : vector<8x8xf32> to vector<8xf32>
      %117 = vector.shape_cast %116 : vector<8xf32> to vector<8x1xf32>
      %118 = tpu.reciprocal %117 {approx = true} : vector<8x1xf32> -> vector<8x1xf32>
      %119 = vector.broadcast %118 : vector<8x1xf32> to vector<8x8xf32>
      %120 = arith.mulf %115, %119 : vector<8x8xf32>
      %cst_48 = arith.constant dense<0.000000e+00> : vector<8x32xf32>
      %121 = tpu.matmul %120, %107, %cst_48 {dimension_numbers = #tpu.dot_dimension_numbers<[1], [0], [0], [1], [0, 0, 1, 1], [], []>} : vector<8x8xf32>, vector<8x32xf32>, vector<8x32xf32> -> vector<8x32xf32>
      %122 = vector.extract_strided_slice %28 {offsets = [0, 160], sizes = [8, 32], strides = [1, 1]} : vector<8x256xf32> to vector<8x32xf32>
      %123 = vector.extract_strided_slice %32 {offsets = [0, 160], sizes = [8, 32], strides = [1, 1]} : vector<8x256xf32> to vector<8x32xf32>
      %124 = vector.extract_strided_slice %36 {offsets = [0, 160], sizes = [8, 32], strides = [1, 1]} : vector<8x256xf32> to vector<8x32xf32>
      %cst_49 = arith.constant dense<0.000000e+00> : vector<8x8xf32>
      %125 = tpu.matmul %122, %123, %cst_49 {dimension_numbers = #tpu.dot_dimension_numbers<[1], [1], [0], [0], [0, 0, 1, 0], [], []>} : vector<8x32xf32>, vector<8x32xf32>, vector<8x8xf32> -> vector<8x8xf32>
      %cst_50 = arith.constant 0.176776692 : f32
      %126 = vector.broadcast %cst_50 : f32 to vector<8x8xf32>
      %127 = arith.mulf %125, %126 : vector<8x8xf32>
      %cst_51 = arith.constant dense<0xFF800000> : vector<8xf32>
      %128 = vector.multi_reduction <maximumf>, %127, %cst_51 [1] : vector<8x8xf32> to vector<8xf32>
      %129 = vector.shape_cast %128 : vector<8xf32> to vector<8x1xf32>
      %130 = vector.broadcast %129 : vector<8x1xf32> to vector<8x8xf32>
      %131 = arith.subf %127, %130 : vector<8x8xf32>
      %132 = math.exp %131 : vector<8x8xf32>
      %cst_52 = arith.constant dense<0.000000e+00> : vector<8xf32>
      %133 = vector.multi_reduction <add>, %132, %cst_52 [1] : vector<8x8xf32> to vector<8xf32>
      %134 = vector.shape_cast %133 : vector<8xf32> to vector<8x1xf32>
      %135 = tpu.reciprocal %134 {approx = true} : vector<8x1xf32> -> vector<8x1xf32>
      %136 = vector.broadcast %135 : vector<8x1xf32> to vector<8x8xf32>
      %137 = arith.mulf %132, %136 : vector<8x8xf32>
      %cst_53 = arith.constant dense<0.000000e+00> : vector<8x32xf32>
      %138 = tpu.matmul %137, %124, %cst_53 {dimension_numbers = #tpu.dot_dimension_numbers<[1], [0], [0], [1], [0, 0, 1, 1], [], []>} : vector<8x8xf32>, vector<8x32xf32>, vector<8x32xf32> -> vector<8x32xf32>
      %139 = vector.extract_strided_slice %28 {offsets = [0, 192], sizes = [8, 32], strides = [1, 1]} : vector<8x256xf32> to vector<8x32xf32>
      %140 = vector.extract_strided_slice %32 {offsets = [0, 192], sizes = [8, 32], strides = [1, 1]} : vector<8x256xf32> to vector<8x32xf32>
      %141 = vector.extract_strided_slice %36 {offsets = [0, 192], sizes = [8, 32], strides = [1, 1]} : vector<8x256xf32> to vector<8x32xf32>
      %cst_54 = arith.constant dense<0.000000e+00> : vector<8x8xf32>
      %142 = tpu.matmul %139, %140, %cst_54 {dimension_numbers = #tpu.dot_dimension_numbers<[1], [1], [0], [0], [0, 0, 1, 0], [], []>} : vector<8x32xf32>, vector<8x32xf32>, vector<8x8xf32> -> vector<8x8xf32>
      %cst_55 = arith.constant 0.176776692 : f32
      %143 = vector.broadcast %cst_55 : f32 to vector<8x8xf32>
      %144 = arith.mulf %142, %143 : vector<8x8xf32>
      %cst_56 = arith.constant dense<0xFF800000> : vector<8xf32>
      %145 = vector.multi_reduction <maximumf>, %144, %cst_56 [1] : vector<8x8xf32> to vector<8xf32>
      %146 = vector.shape_cast %145 : vector<8xf32> to vector<8x1xf32>
      %147 = vector.broadcast %146 : vector<8x1xf32> to vector<8x8xf32>
      %148 = arith.subf %144, %147 : vector<8x8xf32>
      %149 = math.exp %148 : vector<8x8xf32>
      %cst_57 = arith.constant dense<0.000000e+00> : vector<8xf32>
      %150 = vector.multi_reduction <add>, %149, %cst_57 [1] : vector<8x8xf32> to vector<8xf32>
      %151 = vector.shape_cast %150 : vector<8xf32> to vector<8x1xf32>
      %152 = tpu.reciprocal %151 {approx = true} : vector<8x1xf32> -> vector<8x1xf32>
      %153 = vector.broadcast %152 : vector<8x1xf32> to vector<8x8xf32>
      %154 = arith.mulf %149, %153 : vector<8x8xf32>
      %cst_58 = arith.constant dense<0.000000e+00> : vector<8x32xf32>
      %155 = tpu.matmul %154, %141, %cst_58 {dimension_numbers = #tpu.dot_dimension_numbers<[1], [0], [0], [1], [0, 0, 1, 1], [], []>} : vector<8x8xf32>, vector<8x32xf32>, vector<8x32xf32> -> vector<8x32xf32>
      %156 = vector.extract_strided_slice %28 {offsets = [0, 224], sizes = [8, 32], strides = [1, 1]} : vector<8x256xf32> to vector<8x32xf32>
      %157 = vector.extract_strided_slice %32 {offsets = [0, 224], sizes = [8, 32], strides = [1, 1]} : vector<8x256xf32> to vector<8x32xf32>
      %158 = vector.extract_strided_slice %36 {offsets = [0, 224], sizes = [8, 32], strides = [1, 1]} : vector<8x256xf32> to vector<8x32xf32>
      %cst_59 = arith.constant dense<0.000000e+00> : vector<8x8xf32>
      %159 = tpu.matmul %156, %157, %cst_59 {dimension_numbers = #tpu.dot_dimension_numbers<[1], [1], [0], [0], [0, 0, 1, 0], [], []>} : vector<8x32xf32>, vector<8x32xf32>, vector<8x8xf32> -> vector<8x8xf32>
      %cst_60 = arith.constant 0.176776692 : f32
      %160 = vector.broadcast %cst_60 : f32 to vector<8x8xf32>
      %161 = arith.mulf %159, %160 : vector<8x8xf32>
      %cst_61 = arith.constant dense<0xFF800000> : vector<8xf32>
      %162 = vector.multi_reduction <maximumf>, %161, %cst_61 [1] : vector<8x8xf32> to vector<8xf32>
      %163 = vector.shape_cast %162 : vector<8xf32> to vector<8x1xf32>
      %164 = vector.broadcast %163 : vector<8x1xf32> to vector<8x8xf32>
      %165 = arith.subf %161, %164 : vector<8x8xf32>
      %166 = math.exp %165 : vector<8x8xf32>
      %cst_62 = arith.constant dense<0.000000e+00> : vector<8xf32>
      %167 = vector.multi_reduction <add>, %166, %cst_62 [1] : vector<8x8xf32> to vector<8xf32>
      %168 = vector.shape_cast %167 : vector<8xf32> to vector<8x1xf32>
      %169 = tpu.reciprocal %168 {approx = true} : vector<8x1xf32> -> vector<8x1xf32>
      %170 = vector.broadcast %169 : vector<8x1xf32> to vector<8x8xf32>
      %171 = arith.mulf %166, %170 : vector<8x8xf32>
      %cst_63 = arith.constant dense<0.000000e+00> : vector<8x32xf32>
      %172 = tpu.matmul %171, %158, %cst_63 {dimension_numbers = #tpu.dot_dimension_numbers<[1], [0], [0], [1], [0, 0, 1, 1], [], []>} : vector<8x8xf32>, vector<8x32xf32>, vector<8x32xf32> -> vector<8x32xf32>
      %173 = tpu.concatenate %53, %70, %87, %104, %121, %138, %155, %172 in 1 : vector<8x32xf32>, vector<8x32xf32>, vector<8x32xf32>, vector<8x32xf32>, vector<8x32xf32>, vector<8x32xf32>, vector<8x32xf32>, vector<8x32xf32> -> vector<8x256xf32>
      %174 = arith.truncf %173 : vector<8x256xf32> to vector<8x256xbf16>
      %c0_64 = arith.constant 0 : index
      %c0_65 = arith.constant 0 : index
      %175 = vector.load %arg3[%c0_64, %c0_65] : memref<256x256xbf16, #tpu.memory_space<vmem>>, vector<256x256xbf16>
      %cst_66 = arith.constant dense<0.000000e+00> : vector<8x256xf32>
      %176 = tpu.matmul %174, %175, %cst_66 {dimension_numbers = #tpu.dot_dimension_numbers<[1], [0], [0], [1], [0, 0, 1, 1], [], []>} : vector<8x256xbf16>, vector<256x256xbf16>, vector<8x256xf32> -> vector<8x256xf32>
      %c3 = arith.constant 3 : index
      %c0_67 = arith.constant 0 : index
      %177 = vector.load %arg4[%c3, %c0_67] : memref<16x256xf32, #tpu.memory_space<vmem>>, vector<1x256xf32>
      %178 = vector.broadcast %177 : vector<1x256xf32> to vector<8x256xf32>
      %179 = arith.addf %176, %178 : vector<8x256xf32>
      %180 = arith.addf %21, %179 : vector<8x256xf32>
      %c4 = arith.constant 4 : index
      %c0_68 = arith.constant 0 : index
      %181 = vector.load %arg4[%c4, %c0_68] : memref<16x256xf32, #tpu.memory_space<vmem>>, vector<1x256xf32>
      %c5 = arith.constant 5 : index
      %c0_69 = arith.constant 0 : index
      %182 = vector.load %arg4[%c5, %c0_69] : memref<16x256xf32, #tpu.memory_space<vmem>>, vector<1x256xf32>
      %cst_70 = arith.constant dense<0.000000e+00> : vector<8xf32>
      %183 = vector.multi_reduction <add>, %180, %cst_70 [1] : vector<8x256xf32> to vector<8xf32>
      %184 = vector.shape_cast %183 : vector<8xf32> to vector<8x1xf32>
      %cst_71 = arith.constant 2.560000e+02 : f32
      %185 = vector.broadcast %cst_71 : f32 to vector<8x1xf32>
      %186 = arith.divf %184, %185 : vector<8x1xf32>
      %187 = vector.broadcast %186 : vector<8x1xf32> to vector<8x256xf32>
      %188 = arith.subf %180, %187 : vector<8x256xf32>
      %189 = arith.mulf %188, %188 : vector<8x256xf32>
      %cst_72 = arith.constant dense<0.000000e+00> : vector<8xf32>
      %190 = vector.multi_reduction <add>, %189, %cst_72 [1] : vector<8x256xf32> to vector<8xf32>
      %191 = vector.shape_cast %190 : vector<8xf32> to vector<8x1xf32>
      %cst_73 = arith.constant 2.560000e+02 : f32
      %192 = vector.broadcast %cst_73 : f32 to vector<8x1xf32>
      %193 = arith.divf %191, %192 : vector<8x1xf32>
      %194 = vector.broadcast %186 : vector<8x1xf32> to vector<8x256xf32>
      %195 = arith.subf %180, %194 : vector<8x256xf32>
      %cst_74 = arith.constant 9.99999974E-6 : f32
      %196 = vector.broadcast %cst_74 : f32 to vector<8x1xf32>
      %197 = arith.addf %193, %196 : vector<8x1xf32>
      %198 = math.rsqrt %197 : vector<8x1xf32>
      %199 = vector.broadcast %198 : vector<8x1xf32> to vector<8x256xf32>
      %200 = arith.mulf %195, %199 : vector<8x256xf32>
      %201 = vector.broadcast %181 : vector<1x256xf32> to vector<8x256xf32>
      %202 = arith.mulf %200, %201 : vector<8x256xf32>
      %203 = vector.broadcast %182 : vector<1x256xf32> to vector<8x256xf32>
      %204 = arith.addf %202, %203 : vector<8x256xf32>
      %c6 = arith.constant 6 : index
      %c0_75 = arith.constant 0 : index
      %205 = vector.load %arg4[%c6, %c0_75] : memref<16x256xf32, #tpu.memory_space<vmem>>, vector<1x256xf32>
      %c7 = arith.constant 7 : index
      %c0_76 = arith.constant 0 : index
      %206 = vector.load %arg4[%c7, %c0_76] : memref<16x256xf32, #tpu.memory_space<vmem>>, vector<1x256xf32>
      %cst_77 = arith.constant dense<0.000000e+00> : vector<8xf32>
      %207 = vector.multi_reduction <add>, %204, %cst_77 [1] : vector<8x256xf32> to vector<8xf32>
      %208 = vector.shape_cast %207 : vector<8xf32> to vector<8x1xf32>
      %cst_78 = arith.constant 2.560000e+02 : f32
      %209 = vector.broadcast %cst_78 : f32 to vector<8x1xf32>
      %210 = arith.divf %208, %209 : vector<8x1xf32>
      %211 = vector.broadcast %210 : vector<8x1xf32> to vector<8x256xf32>
      %212 = arith.subf %204, %211 : vector<8x256xf32>
      %213 = arith.mulf %212, %212 : vector<8x256xf32>
      %cst_79 = arith.constant dense<0.000000e+00> : vector<8xf32>
      %214 = vector.multi_reduction <add>, %213, %cst_79 [1] : vector<8x256xf32> to vector<8xf32>
      %215 = vector.shape_cast %214 : vector<8xf32> to vector<8x1xf32>
      %cst_80 = arith.constant 2.560000e+02 : f32
      %216 = vector.broadcast %cst_80 : f32 to vector<8x1xf32>
      %217 = arith.divf %215, %216 : vector<8x1xf32>
      %218 = vector.broadcast %210 : vector<8x1xf32> to vector<8x256xf32>
      %219 = arith.subf %204, %218 : vector<8x256xf32>
      %cst_81 = arith.constant 9.99999974E-6 : f32
      %220 = vector.broadcast %cst_81 : f32 to vector<8x1xf32>
      %221 = arith.addf %217, %220 : vector<8x1xf32>
      %222 = math.rsqrt %221 : vector<8x1xf32>
      %223 = vector.broadcast %222 : vector<8x1xf32> to vector<8x256xf32>
      %224 = arith.mulf %219, %223 : vector<8x256xf32>
      %225 = vector.broadcast %205 : vector<1x256xf32> to vector<8x256xf32>
      %226 = arith.mulf %224, %225 : vector<8x256xf32>
      %227 = vector.broadcast %206 : vector<1x256xf32> to vector<8x256xf32>
      %228 = arith.addf %226, %227 : vector<8x256xf32>
      %c0_82 = arith.constant 0 : index
      %c0_83 = arith.constant 0 : index
      %229 = vector.load %arg9[%c0_82, %c0_83] : memref<8x256xf32, #tpu.memory_space<vmem>>, vector<8x256xf32>
      tpu.vector_store %arg9[%c0_82, %c0_83], %228 {strides = array<i32>} : memref<8x256xf32, #tpu.memory_space<vmem>>, vector<8x256xf32>,
      %cst_84 = arith.constant 0.000000e+00 : f32
      %230 = vector.broadcast %cst_84 : f32 to vector<8x256xf32>
      %c0_85 = arith.constant 0 : index
      %c0_86 = arith.constant 0 : index
      %231 = vector.load %arg10[%c0_85, %c0_86] : memref<8x256xf32, #tpu.memory_space<vmem>>, vector<8x256xf32>
      tpu.vector_store %arg10[%c0_85, %c0_86], %230 {strides = array<i32>} : memref<8x256xf32, #tpu.memory_space<vmem>>, vector<8x256xf32>,
    } else {
    }
    %c0 = arith.constant 0 : index
    %c0_1 = arith.constant 0 : index
    %3 = vector.load %arg9[%c0, %c0_1] : memref<8x256xf32, #tpu.memory_space<vmem>>, vector<8x256xf32>
    %4 = arith.truncf %3 : vector<8x256xf32> to vector<8x256xbf16>
    %c0_2 = arith.constant 0 : index
    %c0_3 = arith.constant 0 : index
    %5 = vector.load %arg5[%c0_2, %c0_3] : memref<256x512xbf16, #tpu.memory_space<vmem>>, vector<256x512xbf16>
    %cst = arith.constant dense<0.000000e+00> : vector<8x512xf32>
    %6 = tpu.matmul %4, %5, %cst {dimension_numbers = #tpu.dot_dimension_numbers<[1], [0], [0], [1], [0, 0, 1, 1], [], []>} : vector<8x256xbf16>, vector<256x512xbf16>, vector<8x512xf32> -> vector<8x512xf32>
    %c0_4 = arith.constant 0 : index
    %c0_5 = arith.constant 0 : index
    %7 = vector.load %arg6[%c0_4, %c0_5] : memref<1x512xf32, #tpu.memory_space<vmem>>, vector<1x512xf32>
    %8 = vector.broadcast %7 : vector<1x512xf32> to vector<8x512xf32>
    %9 = arith.addf %6, %8 : vector<8x512xf32>
    %cst_6 = arith.constant 0.000000e+00 : f32
    %10 = vector.broadcast %cst_6 : f32 to vector<8x512xf32>
    %11 = arith.maximumf %9, %10 : vector<8x512xf32>
    %c0_7 = arith.constant 0 : index
    %c0_8 = arith.constant 0 : index
    %12 = vector.load %arg10[%c0_7, %c0_8] : memref<8x256xf32, #tpu.memory_space<vmem>>, vector<8x256xf32>
    %13 = arith.truncf %11 : vector<8x512xf32> to vector<8x512xbf16>
    %c0_9 = arith.constant 0 : index
    %c0_10 = arith.constant 0 : index
    %14 = vector.load %arg7[%c0_9, %c0_10] : memref<512x256xbf16, #tpu.memory_space<vmem>>, vector<512x256xbf16>
    %cst_11 = arith.constant dense<0.000000e+00> : vector<8x256xf32>
    %15 = tpu.matmul %13, %14, %cst_11 {dimension_numbers = #tpu.dot_dimension_numbers<[1], [0], [0], [1], [0, 0, 1, 1], [], []>} : vector<8x512xbf16>, vector<512x256xbf16>, vector<8x256xf32> -> vector<8x256xf32>
    %16 = arith.addf %12, %15 : vector<8x256xf32>
    %c0_12 = arith.constant 0 : index
    %c0_13 = arith.constant 0 : index
    %17 = vector.load %arg10[%c0_12, %c0_13] : memref<8x256xf32, #tpu.memory_space<vmem>>, vector<8x256xf32>
    tpu.vector_store %arg10[%c0_12, %c0_13], %16 {strides = array<i32>} : memref<8x256xf32, #tpu.memory_space<vmem>>, vector<8x256xf32>,
    %c3_i32 = arith.constant 3 : i32
    %18 = arith.cmpi eq, %arg0, %c3_i32 : i32
    %19 = arith.extui %18 : i1 to i32
    %c0_i32_14 = arith.constant 0 : i32
    %20 = arith.cmpi ne, %19, %c0_i32_14 : i32
    scf.if %20 {
      %c0_15 = arith.constant 0 : index
      %c0_16 = arith.constant 0 : index
      %21 = vector.load %arg9[%c0_15, %c0_16] : memref<8x256xf32, #tpu.memory_space<vmem>>, vector<8x256xf32>
      %c0_17 = arith.constant 0 : index
      %c0_18 = arith.constant 0 : index
      %22 = vector.load %arg10[%c0_17, %c0_18] : memref<8x256xf32, #tpu.memory_space<vmem>>, vector<8x256xf32>
      %c10 = arith.constant 10 : index
      %c0_19 = arith.constant 0 : index
      %23 = vector.load %arg4[%c10, %c0_19] : memref<16x256xf32, #tpu.memory_space<vmem>>, vector<1x256xf32>
      %24 = vector.broadcast %23 : vector<1x256xf32> to vector<8x256xf32>
      %25 = arith.addf %22, %24 : vector<8x256xf32>
      %26 = arith.addf %21, %25 : vector<8x256xf32>
      %c8 = arith.constant 8 : index
      %c0_20 = arith.constant 0 : index
      %27 = vector.load %arg4[%c8, %c0_20] : memref<16x256xf32, #tpu.memory_space<vmem>>, vector<1x256xf32>
      %c9 = arith.constant 9 : index
      %c0_21 = arith.constant 0 : index
      %28 = vector.load %arg4[%c9, %c0_21] : memref<16x256xf32, #tpu.memory_space<vmem>>, vector<1x256xf32>
      %cst_22 = arith.constant dense<0.000000e+00> : vector<8xf32>
      %29 = vector.multi_reduction <add>, %26, %cst_22 [1] : vector<8x256xf32> to vector<8xf32>
      %30 = vector.shape_cast %29 : vector<8xf32> to vector<8x1xf32>
      %cst_23 = arith.constant 2.560000e+02 : f32
      %31 = vector.broadcast %cst_23 : f32 to vector<8x1xf32>
      %32 = arith.divf %30, %31 : vector<8x1xf32>
      %33 = vector.broadcast %32 : vector<8x1xf32> to vector<8x256xf32>
      %34 = arith.subf %26, %33 : vector<8x256xf32>
      %35 = arith.mulf %34, %34 : vector<8x256xf32>
      %cst_24 = arith.constant dense<0.000000e+00> : vector<8xf32>
      %36 = vector.multi_reduction <add>, %35, %cst_24 [1] : vector<8x256xf32> to vector<8xf32>
      %37 = vector.shape_cast %36 : vector<8xf32> to vector<8x1xf32>
      %cst_25 = arith.constant 2.560000e+02 : f32
      %38 = vector.broadcast %cst_25 : f32 to vector<8x1xf32>
      %39 = arith.divf %37, %38 : vector<8x1xf32>
      %40 = vector.broadcast %32 : vector<8x1xf32> to vector<8x256xf32>
      %41 = arith.subf %26, %40 : vector<8x256xf32>
      %cst_26 = arith.constant 9.99999974E-6 : f32
      %42 = vector.broadcast %cst_26 : f32 to vector<8x1xf32>
      %43 = arith.addf %39, %42 : vector<8x1xf32>
      %44 = math.rsqrt %43 : vector<8x1xf32>
      %45 = vector.broadcast %44 : vector<8x1xf32> to vector<8x256xf32>
      %46 = arith.mulf %41, %45 : vector<8x256xf32>
      %47 = vector.broadcast %27 : vector<1x256xf32> to vector<8x256xf32>
      %48 = arith.mulf %46, %47 : vector<8x256xf32>
      %49 = vector.broadcast %28 : vector<1x256xf32> to vector<8x256xf32>
      %50 = arith.addf %48, %49 : vector<8x256xf32>
      %cst_27 = arith.constant dense<0.000000e+00> : vector<256xf32>
      %51 = vector.multi_reduction <add>, %50, %cst_27 [0] : vector<8x256xf32> to vector<256xf32>
      %52 = vector.shape_cast %51 : vector<256xf32> to vector<1x256xf32>
      %cst_28 = arith.constant 8.000000e+00 : f32
      %53 = vector.broadcast %cst_28 : f32 to vector<1x256xf32>
      %54 = arith.divf %52, %53 : vector<1x256xf32>
      %55 = vector.broadcast %54 : vector<1x256xf32> to vector<8x256xf32>
      %56 = arith.subf %50, %55 : vector<8x256xf32>
      %57 = arith.mulf %56, %56 : vector<8x256xf32>
      %cst_29 = arith.constant dense<0.000000e+00> : vector<256xf32>
      %58 = vector.multi_reduction <add>, %57, %cst_29 [0] : vector<8x256xf32> to vector<256xf32>
      %59 = vector.shape_cast %58 : vector<256xf32> to vector<1x256xf32>
      %cst_30 = arith.constant 8.000000e+00 : f32
      %60 = vector.broadcast %cst_30 : f32 to vector<1x256xf32>
      %61 = arith.divf %59, %60 : vector<1x256xf32>
      %62 = vector.broadcast %54 : vector<1x256xf32> to vector<8x256xf32>
      %63 = arith.subf %50, %62 : vector<8x256xf32>
      %cst_31 = arith.constant 9.99999974E-6 : f32
      %64 = vector.broadcast %cst_31 : f32 to vector<1x256xf32>
      %65 = arith.addf %61, %64 : vector<1x256xf32>
      %66 = math.rsqrt %65 : vector<1x256xf32>
      %67 = vector.broadcast %66 : vector<1x256xf32> to vector<8x256xf32>
      %68 = arith.mulf %63, %67 : vector<8x256xf32>
      %c11 = arith.constant 11 : index
      %c0_32 = arith.constant 0 : index
      %69 = vector.load %arg4[%c11, %c0_32] : memref<16x256xf32, #tpu.memory_space<vmem>>, vector<1x256xf32>
      %70 = vector.broadcast %69 : vector<1x256xf32> to vector<8x256xf32>
      %71 = arith.mulf %68, %70 : vector<8x256xf32>
      %c12 = arith.constant 12 : index
      %c0_33 = arith.constant 0 : index
      %72 = vector.load %arg4[%c12, %c0_33] : memref<16x256xf32, #tpu.memory_space<vmem>>, vector<1x256xf32>
      %73 = vector.broadcast %72 : vector<1x256xf32> to vector<8x256xf32>
      %74 = arith.addf %71, %73 : vector<8x256xf32>
      %c13 = arith.constant 13 : index
      %c0_34 = arith.constant 0 : index
      %75 = vector.load %arg4[%c13, %c0_34] : memref<16x256xf32, #tpu.memory_space<vmem>>, vector<2x256xf32>
      %cst_35 = arith.constant dense<0.000000e+00> : vector<8x2xf32>
      %76 = tpu.matmul %74, %75, %cst_35 {dimension_numbers = #tpu.dot_dimension_numbers<[1], [1], [0], [0], [0, 0, 1, 0], [], []>} : vector<8x256xf32>, vector<2x256xf32>, vector<8x2xf32> -> vector<8x2xf32>
      %c15 = arith.constant 15 : index
      %c0_36 = arith.constant 0 : index
      %77 = vector.load %arg4[%c15, %c0_36] : memref<16x256xf32, #tpu.memory_space<vmem>>, vector<1x2xf32>
      %78 = vector.broadcast %77 : vector<1x2xf32> to vector<8x2xf32>
      %79 = arith.addf %76, %78 : vector<8x2xf32>
      %cst_37 = arith.constant dense<0xFF800000> : vector<8xf32>
      %80 = vector.multi_reduction <maximumf>, %79, %cst_37 [1] : vector<8x2xf32> to vector<8xf32>
      %81 = vector.shape_cast %80 : vector<8xf32> to vector<8x1xf32>
      %82 = vector.broadcast %81 : vector<8x1xf32> to vector<8x2xf32>
      %83 = arith.subf %79, %82 : vector<8x2xf32>
      %84 = math.exp %83 : vector<8x2xf32>
      %cst_38 = arith.constant dense<0.000000e+00> : vector<8xf32>
      %85 = vector.multi_reduction <add>, %84, %cst_38 [1] : vector<8x2xf32> to vector<8xf32>
      %86 = vector.shape_cast %85 : vector<8xf32> to vector<8x1xf32>
      %87 = math.log %86 : vector<8x1xf32>
      %88 = vector.broadcast %87 : vector<8x1xf32> to vector<8x2xf32>
      %89 = arith.subf %83, %88 : vector<8x2xf32>
      %c0_39 = arith.constant 0 : index
      %c0_40 = arith.constant 0 : index
      %90 = vector.load %arg8[%c0_39, %c0_40] : memref<8x2xf32, #tpu.memory_space<vmem>>, vector<8x2xf32>
      tpu.vector_store %arg8[%c0_39, %c0_40], %89 {strides = array<i32>} : memref<8x2xf32, #tpu.memory_space<vmem>>, vector<8x2xf32>,
    } else {
    }
    return
  }
  func.func @transform_0(%arg0: i32) -> (i32, i32) {
    %c0_i32 = arith.constant 0 : i32
    %c0_i32_0 = arith.constant 0 : i32
    %c0_i32_1 = arith.constant 0 : i32
    return %c0_i32, %c0_i32_0 : i32, i32
  }
  func.func @transform_1(%arg0: i32) -> (i32, i32) {
    %c0_i32 = arith.constant 0 : i32
    %c0_i32_0 = arith.constant 0 : i32
    %c0_i32_1 = arith.constant 0 : i32
    return %c0_i32, %c0_i32_0 : i32, i32
  }
  func.func @transform_2(%arg0: i32) -> (i32, i32) {
    %c0_i32 = arith.constant 0 : i32
    %c0_i32_0 = arith.constant 0 : i32
    %c0_i32_1 = arith.constant 0 : i32
    return %c0_i32, %c0_i32_0 : i32, i32
  }
  func.func @transform_3(%arg0: i32) -> (i32, i32) {
    %c0_i32 = arith.constant 0 : i32
    %c0_i32_0 = arith.constant 0 : i32
    %c0_i32_1 = arith.constant 0 : i32
    return %c0_i32, %c0_i32_0 : i32, i32
  }
  func.func @transform_4(%arg0: i32) -> (i32, i32) {
    %c0_i32 = arith.constant 0 : i32
    %c0_i32_0 = arith.constant 0 : i32
    return %c0_i32, %arg0 : i32, i32
  }
  func.func @transform_5(%arg0: i32) -> (i32, i32) {
    %c0_i32 = arith.constant 0 : i32
    %c0_i32_0 = arith.constant 0 : i32
    return %c0_i32, %arg0 : i32, i32
  }
  func.func @transform_6(%arg0: i32) -> (i32, i32) {
    %c0_i32 = arith.constant 0 : i32
    %c0_i32_0 = arith.constant 0 : i32
    return %arg0, %c0_i32 : i32, i32
  }
  func.func @transform_7(%arg0: i32) -> (i32, i32) {
    %c0_i32 = arith.constant 0 : i32
    %c0_i32_0 = arith.constant 0 : i32
    %c0_i32_1 = arith.constant 0 : i32
    return %c0_i32, %c0_i32_0 : i32, i32
  }
}

</mosaic_0001>

<bundles_post_ra>
// kernel: transformer_forward.1
= control target key start
LH: loop header
LB: loop body
LE: loop exit
PB: predicated region body
PF: predicated region fallthrough
CT: control target
= control target key end

     0   :  { %s5857_s0 = inlined_call_operand.hbm [shape: f32[8,256], index: 0, kind: input, shape index: {}]   ;;  %s5858_s1 = inlined_call_operand.hbm [shape: bf16[256,768], index: 1, kind: input, shape index: {}]   ;;  %s5859_s2 = inlined_call_operand.hbm [shape: bf16[256,256], index: 2, kind: input, shape index: {}]   ;;  %s5860_s3 = inlined_call_operand.hbm [shape: f32[16,256], index: 3, kind: input, shape index: {}]   ;;  %s5861_s4 = inlined_call_operand.hbm [shape: bf16[256,2048], index: 4, kind: input, shape index: {}]   ;;  %s5862_s5 = inlined_call_operand.hbm [shape: f32[1,2048], index: 5, kind: input, shape index: {}]   ;;  %s5863_s6 = inlined_call_operand.hbm [shape: bf16[2048,256], index: 6, kind: input, shape index: {}]   ;;  %s5864_s7 = inlined_call_operand.vmem [shape: f32[8,2], index: 7, kind: output, shape index: {}]  }
   0x1   :  { %5871 = sst [smem:[#allocation22_spill]] %s5857_s0 }
   0x2   :  { %5872 = sst [smem:[#allocation23_spill]] %s5858_s1 }
   0x3   :  { %5873 = sst [smem:[#allocation24_spill]] %s5861_s4 }
   0x4   :  { %5874 = sst [smem:[#allocation25_spill]] %s5864_s7 }
   0x5   :  { %12 = vsyncpa [#allocation5], 0 }
   0x6   :  { %13 = vsyncpa [#allocation7], 0 }
   0x7   :  { %14 = vsyncpa [#allocation10], 0  ;;  %s5262_s24 = smov 0   ;;  %s5264_s25 = smov 0  }
   0x8   :  { %s5266_s26 = smov 0   ;;  %s5268_s27 = smov 0  }
   0x9 LB: > { %5875 = sst [smem:[#allocation18_spill]] %s5194_s25  ;;  %s5281_s28 = sadd.s32 4294967295, %s5202_s27   ;;  %s5202_s27 = sphi %s5268_s27, %s5891_s27   ;;  %s5198_s26 = sphi %s5266_s26, %s5895_s26   ;;  %s5194_s25 = sphi %s5264_s25, %s5894_s25   ;;  %s5190_s24 = sphi %s5262_s24, %s5892_s24  }
   0xa   : > { %s5284_s29 = sadd.s32 1, %s5202_s27   ;;  %s111_s8 = sadd.s32 1, %s5198_s26 }
   0xb   : > { %5876 = sst [smem:[#allocation19_spill]] %s5284_s29  ;;  %s108_s30 = ssub.s32 %s5202_s27, %s5284_s29 }
   0xc   : > { %p109_p0 = scmp.eq.s32.totalorder %s108_s30, 0  ;;  %p118_p1 = scmp.ne.s32.totalorder %s5198_s26, %s5194_s25 }
   0xd   : > { %p119_p2 = scmp.eq.s32.totalorder %s5202_s27, 0  ;;  %p124_p3 = scmp.ne.s32.totalorder %s5194_s25, %s5190_s24 }
   0xe   : > { %s5294_s9 = scalar_select %p109_p0, %s5198_s26, %s111_s8  }
   0xf   : > { %p5296_p4 = por %p119_p2, %p118_p1  ;;  %p125_p5 = scmp.eq.s32.totalorder %s5281_s28, 0 }
  0x10   : > { %5877 = sst [smem:[#allocation20_spill]] %s5294_s9  ;;  %p3434_p6 = scmp.ge.s32.totalorder %s5202_s27, 1 }
  0x11   : > { %p208_p7 = scmp.lt.s32.totalorder %s5202_s27, 5  ;;  %p5305_p8 = por %p125_p5, %p124_p3 }
  0x12   : > { %p3435_p9 = scmp.ne.s32.totalorder %s5281_s28, 0  ;;  %s5882_s0 = sld [smem:[#allocation22_spill]] }
  0x13   : > { %s5879_s11 = scalar_select %p5305_p8, 1, 0 }
  0x14   : > { %p5310_p10 = pnand %p3434_p6, %p208_p7  ;;  %s5204_s16 = smov [#allocation4]  }
  0x15   : > { %5880 = sst [smem:[#allocation21_spill]] %s5879_s11  ;;  %s222_s17 = sshll.u32 %s5204_s16, 4  ;;  %s223_s17 = int_to_ptr.vmem [resolvable:$true] %s222_s17 }
  0x16   : > { %p4790_p11 = pneg %p5310_p10  ;;  %p4817_p13 = scmp.lt.s32.totalorder %s5202_s27, 4 }
  0x17   : > { %s275_s20 = sand.u32 1, %s5202_s27   ;;  %s5865_s21 = sand.u32 1, %s5198_s26  }
  0x18   : > { %s220_s15 = sshll.u32 %s5882_s0, 4  ;;  %p5321_p12 = pnand %p4790_p11, %p125_p5  ;;  %s221_s15 = int_to_ptr.hbm [resolvable:$true] %s220_s15 }
  0x19   : > { %p5328_p0 = pnand %p4817_p13, %p5296_p4  ;;  %s5338_s22 = sshll.u32 %s5865_s21, 9 }
  0x1a   : > { %4793 = dma.hbm_to_vmem [thread:$0]  (!%p5321_p12), %s221_s15, 256, %s223_s17, [#allocation5]  }
  0x1b   : > { %s4509_s23 = sshll.u32 %s5202_s27, 4  ;;  %s5885_s4 = sld [smem:[#allocation24_spill]] }
  0x1c   : > { %s279_s13 = scalar_lea.vmem [#allocation11], %s5338_s22  ;;  %s5886_s1 = sld [smem:[#allocation23_spill]] }
  0x1d   : > { %s287_s14 = sshll.u32 %s279_s13, 4  ;;  %s5348_s0 = scalar_lea.sflag [#allocation5], %s275_s20  ;;  %s288_s14 = int_to_ptr.vmem [resolvable:$true] %s287_s14 }
  0x1e   : > { %p4980_p2 = pneg %p5328_p0 }
  0x21   : > { %s284_s8 = scalar_lea.hbm %s5885_s4, %s4509_s23  ;;  %s4983_s30 = scalar_lea.hbm %s5885_s4, 2048 }
  0x22   : > { %s285_s10 = sshll.u32 %s284_s8, 4  ;;  %s231_s17 = sshll.u32 %s5886_s1, 4  ;;  %s286_s10 = int_to_ptr.hbm [resolvable:$true] %s285_s10  ;;  %s232_s17 = int_to_ptr.hbm [resolvable:$true] %s231_s17 }
  0x23   : > { %s4976_s9 = sshra.s32 %s286_s10, 4  ;;  %s4977_s9 = int_to_ptr.hbm [resolvable:$true] %s4976_s9 }
  0x24   : > { %s4978_s21 = scalar_lea.hbm %s4977_s9, 512  ;;  %p4984_p6 = scmp.lt.s32.totalorder %s4977_s9, %s5885_s4 }
  0x25   : > { %p4979_p1 = scmp.ne.s32.totalorder %s4977_s9, %s4978_s21  ;;  %p4985_p7 = scmp.lt.s32.totalorder %s4983_s30, %s4978_s21 }
  0x27   : > { %p4981_p3 = pnand %p4980_p2, %p4979_p1  ;;  %p4986_p11 = por %p4985_p7, %p4984_p6 }
  0x29   : > { %p4982_p4 = pneg %p4981_p3 }
  0x2b   : > { %p4987_p13 = pnand %p4986_p11, %p4982_p4 }
  0x2d   : > { %4990 = shalt.err (!%p4987_p13)
}
  0x2e   : > { %s5205_s20 = smov 1024   ;;  %s5206_s16 = smov 256  }
  0x2f   : > { %s5207_s15 = smov 16   ;;  %s5208_s23 = smov [#allocation6]  }
  0x30   : > { %4806 = dma.hbm_to_vmem [thread:$0]  (!%p5328_p0), %s286_s10, 8192, %s288_s14, %s5348_s0, %s5205_s20, %s5206_s16, %s5207_s15  }
  0x31   : > { %s233_s24 = sshll.u32 %s5208_s23, 4  ;;  %s5209_s9 = smov 384   ;;  %s234_s24 = int_to_ptr.vmem [resolvable:$true] %s233_s24 }
  0x32   : > { %s5210_s21 = smov 24   ;;  %s5887_s30 = sand.u32 1, %s5198_s26  }
  0x33   : > { %4796 = dma.hbm_to_vmem [thread:$0]  (!%p5321_p12), %s232_s17, 12288, %s234_s24, [#allocation7], %s5209_s9, %s5209_s9, %s5210_s21  }
  0x34   : > { %s3443_s8 = sshll.u32 %s5887_s30, 2  ;;  %s3444_s13 = sshll.u32 %s5202_s27, 2 }
  0x35   : > { %s305_s29 = scalar_lea.hbm %s5862_s5, %s3444_s13  ;;  %s301_s11 = scalar_lea.vmem [#allocation12], %s3443_s8 }
  0x36   : > { %s307_s7 = sshll.u32 %s305_s29, 4  ;;  %s309_s25 = sshll.u32 %s301_s11, 4  ;;  %s308_s7 = int_to_ptr.hbm [resolvable:$true] %s307_s7  ;;  %s310_s25 = int_to_ptr.vmem [resolvable:$true] %s309_s25 }
  0x37   : > { %s5036_s10 = sshra.s32 %s308_s7, 4  ;;  %s5043_s23 = scalar_lea.hbm %s5862_s5, 16  ;;  %s5037_s10 = int_to_ptr.hbm [resolvable:$true] %s5036_s10 }
  0x38   : > { %s5038_s14 = scalar_lea.hbm %s5037_s10, 4  ;;  %p5044_p6 = scmp.lt.s32.totalorder %s5037_s10, %s5862_s5 }
  0x39   : > { %p5039_p1 = scmp.ne.s32.totalorder %s5037_s10, %s5038_s14  ;;  %p5045_p7 = scmp.lt.s32.totalorder %s5043_s23, %s5038_s14 }
  0x3b   : > { %p5041_p3 = pnand %p5039_p1, %p4980_p2  ;;  %p5046_p11 = por %p5045_p7, %p5044_p6 }
  0x3d   : > { %p5042_p4 = pneg %p5041_p3 }
  0x3f   : > { %p5047_p13 = pnand %p5046_p11, %p5042_p4 }
  0x41   : > { %5050 = shalt.err (!%p5047_p13)
}
  0x42   : > { %4809 = dma.hbm_to_vmem [thread:$0]  (!%p5328_p0), %s308_s7, 64, %s310_s25, %s5348_s0  }
  0x43   : > { %s245_s11 = sshll.u32 %s5859_s2, 4  ;;  %s5211_s9 = smov [#allocation8]   ;;  %s246_s11 = int_to_ptr.hbm [resolvable:$true] %s245_s11 }
  0x44   : > { %s247_s21 = sshll.u32 %s5211_s9, 4  ;;  %s259_s13 = sshll.u32 %s5860_s3, 4  ;;  %s248_s21 = int_to_ptr.vmem [resolvable:$true] %s247_s21  ;;  %s260_s13 = int_to_ptr.hbm [resolvable:$true] %s259_s13 }
  0x45   : > { %s5212_s10 = smov 128   ;;  %s5213_s14 = smov 8  }
  0x46   : > { %4799 = dma.hbm_to_vmem [thread:$0]  (!%p5321_p12), %s246_s11, 4096, %s248_s21, [#allocation7], %s5212_s10, %s5212_s10, %s5213_s14  }
  0x47   : > { %s5214_s7 = smov [#allocation9]   ;;  %s4511_s17 = sshll.u32 %s5202_s27, 9 }
  0x48   : > { %s261_s25 = sshll.u32 %s5214_s7, 4  ;;  %s326_s24 = scalar_lea.hbm %s5863_s6, %s4511_s17  ;;  %s262_s25 = int_to_ptr.vmem [resolvable:$true] %s261_s25 }
  0x49   : > { %4802 = dma.hbm_to_vmem [thread:$0]  (!%p5321_p12), %s260_s13, 512, %s262_s25, [#allocation10], %s5206_s16, %s5206_s16, %s5207_s15  }
  0x4a   : > { %s320_s1 = scalar_lea.vmem [#allocation13], %s5338_s22  ;;  %s327_s29 = sshll.u32 %s326_s24, 4  ;;  %s328_s29 = int_to_ptr.hbm [resolvable:$true] %s327_s29 }
  0x4b   : > { %s329_s4 = sshll.u32 %s320_s1, 4  ;;  %s5126_s11 = sshra.s32 %s328_s29, 4  ;;  %s330_s4 = int_to_ptr.vmem [resolvable:$true] %s329_s4  ;;  %s5127_s11 = int_to_ptr.hbm [resolvable:$true] %s5126_s11 }
  0x4c   : > { %s5128_s9 = scalar_lea.hbm %s5127_s11, 512  ;;  %s5133_s16 = scalar_lea.hbm %s5863_s6, 2048 }
  0x4d   : > { %p5129_p1 = scmp.ne.s32.totalorder %s5127_s11, %s5128_s9  ;;  %p5134_p12 = scmp.lt.s32.totalorder %s5127_s11, %s5863_s6 }
  0x4e   : > { %p5135_p6 = scmp.lt.s32.totalorder %s5133_s16, %s5128_s9 }
  0x4f   : > { %p5131_p3 = pnand %p5129_p1, %p4980_p2 }
  0x50   : > { %p5136_p7 = por %p5135_p6, %p5134_p12 }
  0x51   : > { %p5132_p4 = pneg %p5131_p3 }
  0x53   : > { %p5137_p11 = pnand %p5136_p7, %p5132_p4 }
  0x55   : > { %5140 = shalt.err (!%p5137_p11)
}
  0x56   : > { %4812 = dma.hbm_to_vmem [thread:$0]  (!%p5328_p0), %s328_s29, 8192, %s330_s4, %s5348_s0, %s5212_s10, %s5212_s10, %s5213_s14  }
  0x57   : > { %341 = sbr.rel (%p5310_p10) target bundleno = 2911 (0xb5f), region = 48 }
  0x5c   : > { %5173 = dma.done.wait (%p125_p5), [#allocation5], 256  }
  0x5d   : > { %5175 = vsyncadd (%p125_p5), [#allocation5], 4294967040 }
  0x5e   : > { %5177 = dma.done.wait (%p125_p5), [#allocation7], 16384  }
  0x5f   : > { %5179 = vsyncadd (%p125_p5), [#allocation7], 4294950912 }
  0x60   : > { %5181 = dma.done.wait (%p125_p5), [#allocation10], 512  }
  0x61   : > { %5183 = vsyncadd (%p125_p5), [#allocation10], 4294966784  ;;  %s5888_s0 = sld [smem:[#allocation18_spill]]  ;;  %s363_s19 = sand.u32 1, %s5281_s28  }
  0x62   : > { %s364_s8 = scalar_lea.sflag [#allocation5], %s363_s19 }
  0x67   : > { %s365_s22 = sand.u32 1, %s5888_s0  }
  0x68   : > { %s3454_s30 = sshll.u32 %s365_s22, 9 }
  0x69   : > { %s5438_s13 = scalar_lea.vmem [#allocation11], %s3454_s30 }
  0x6a   : > { %5185 = dma.done.wait (%p5305_p8), %s364_s8, 16448  }
  0x6b   : > { %5187 = vsyncadd (%p5305_p8), %s364_s8, 4294950848  ;;  %s5444_s10 = sshll.u32 %s365_s22, 2  ;;  %s5447_s7 = scalar_lea.vmem [#allocation13], %s3454_s30 }
  0x6c   : > { %s377_s14 = scalar_lea.vmem [#allocation12], %s5444_s10  ;;  %430 = sbr.rel (%p3435_p9) target bundleno = 1824 (0x720), region = 80 }
  0x6d   : > { %s5215_s25 = smov (!%p3435_p9), 64   ;;  %s5216_s17 = smov (!%p3435_p9), 32  }
  0x6e   : > { %s5217_s20 = smov (!%p3435_p9), 96  }
  0x71   : > { %v3628_v0 = vld [vmem:[#allocation6 + $0x150] sm:$0xf]  ;;  %v4557_v1 = vld [vmem:[#allocation6 + $0x164] sm:$0xf0]  ;;  %v3604_v5 = vld [vmem:[#allocation6 + $0x120] sm:$0xf] }
  0x72   : > { %v3820_v2 = vld [vmem:[#allocation6 + $0x2d0] sm:$0xf]  ;;  %v3629_v3 = vor.u32 %v4557_v1, %v3628_v0  ;;  %v4605_v4 = vld [vmem:[#allocation6 + $0x2e4] sm:$0xf0]  ;;  %v4551_v6 = vld [vmem:[#allocation6 + $0x134] sm:$0xf0] }
  0x73   : > { %v3821_v7 = vor.u32 %v4605_v4, %v3820_v2  ;;  %v3796_v8 = vld [vmem:[#allocation6 + $0x2a0] sm:$0xf]  ;;  %v4599_v9 = vld [vmem:[#allocation6 + $0x2b4] sm:$0xf0]  ;;  %v3605_v10 = vor.u32 %v4551_v6, %v3604_v5  ;;  %v3580_v12 = vld [vmem:[#allocation6 + $0xf0] sm:$0xf] }
  0x74   : > { %1011 = vmatpush.bf16.msra.mxu0 %v3629_v3  ;;  %v3797_v11 = vor.u32 %v4599_v9, %v3796_v8  ;;  %v4545_v13 = vld [vmem:[#allocation6 + $0x104] sm:$0xf0]  ;;  %v3772_v14 = vld [vmem:[#allocation6 + $0x270] sm:$0xf]  ;;  %v4554_v16 = vld [vmem:[#allocation6 + $0x154] sm:$0xf] }
  0x75   : > { %1024 = vmatpush.bf16.msra.mxu1 %v3821_v7  ;;  %v4593_v15 = vld [vmem:[#allocation6 + $0x284] sm:$0xf0]  ;;  %v3581_v17 = vor.u32 %v4545_v13, %v3580_v12  ;;  %v3630_v18 = vld [vmem:[#allocation6 + $0x168] sm:$0xf0]  ;;  %v4602_v19 = vld [vmem:[#allocation6 + $0x2d4] sm:$0xf] }
  0x76   : > { %v3822_v20 = vld [vmem:[#allocation6 + $0x2e8] sm:$0xf0]  ;;  %v3773_v21 = vor.u32 %v4593_v15, %v3772_v14  ;;  %v3556_v22 = vld [vmem:[#allocation6 + $0xc0] sm:$0xf]  ;;  %v4539_v23 = vld [vmem:[#allocation6 + $0xd4] sm:$0xf0]  ;;  %v3633_v25 = vor.u32 %v4554_v16, %v3630_v18 }
  0x77   : > { %v3748_v24 = vld [vmem:[#allocation6 + $0x240] sm:$0xf]  ;;  %v3825_v26 = vor.u32 %v4602_v19, %v3822_v20  ;;  %v4587_v27 = vld [vmem:[#allocation6 + $0x254] sm:$0xf0]  ;;  %v4548_v28 = vld [vmem:[#allocation6 + $0x124] sm:$0xf]  ;;  %v3557_v33 = vor.u32 %v4539_v23, %v3556_v22 }
  0x78   : > { %1012 = vmatpush.bf16.msra.mxu0 %v3605_v10  ;;  %v3606_v29 = vld [vmem:[#allocation6 + $0x138] sm:$0xf0]  ;;  %1037 = vmatpush.bf16.msra.mxu2 %v3633_v25  ;;  %v4596_v31 = vld [vmem:[#allocation6 + $0x2a4] sm:$0xf]  ;;  %v3532_v34 = vld [vmem:[#allocation6 + $0x90] sm:$0xf]  ;;  %v3749_v37 = vor.u32 %v4587_v27, %v3748_v24 }
  0x79   : > { %1025 = vmatpush.bf16.msra.mxu1 %v3797_v11  ;;  %1050 = vmatpush.bf16.msra.mxu3 %v3825_v26  ;;  %v3609_v30 = vor.u32 %v4548_v28, %v3606_v29  ;;  %v3798_v32 = vld [vmem:[#allocation6 + $0x2b8] sm:$0xf0]  ;;  %v4533_v35 = vld [vmem:[#allocation6 + $0xa4] sm:$0xf0]  ;;  %v4542_v38 = vld [vmem:[#allocation6 + $0xf4] sm:$0xf] }
  0x7a   : > { %v3801_v36 = vor.u32 %v4596_v31, %v3798_v32  ;;  %v3582_v39 = vld [vmem:[#allocation6 + $0x108] sm:$0xf0]  ;;  %v4590_v40 = vld [vmem:[#allocation6 + $0x274] sm:$0xf]  ;;  %v3724_v41 = vld [vmem:[#allocation6 + $0x210] sm:$0xf]  ;;  %v3533_v46 = vor.u32 %v4533_v35, %v3532_v34 }
  0x7b   : > { %v4581_v42 = vld [vmem:[#allocation6 + $0x224] sm:$0xf0]  ;;  %v3774_v43 = vld [vmem:[#allocation6 + $0x288] sm:$0xf0]  ;;  %v3585_v44 = vor.u32 %v4542_v38, %v3582_v39  ;;  %v3508_v47 = vld [vmem:[#allocation6 + $0x60] sm:$0xf] }
  0x7c   : > { %1013 = vmatpush.bf16.msra.mxu0 %v3581_v17  ;;  %1038 = vmatpush.bf16.msra.mxu2 %v3609_v30  ;;  %v3777_v45 = vor.u32 %v4590_v40, %v3774_v43  ;;  %v4527_v48 = vld [vmem:[#allocation6 + $0x74] sm:$0xf0]  ;;  %v3725_v49 = vor.u32 %v4581_v42, %v3724_v41  ;;  %v4536_v50 = vld [vmem:[#allocation6 + $0xc4] sm:$0xf]  ;;  %v3558_v51 = vld [vmem:[#allocation6 + $0xd8] sm:$0xf0] }
  0x7d   : > { %1026 = vmatpush.bf16.msra.mxu1 %v3773_v21  ;;  %1051 = vmatpush.bf16.msra.mxu3 %v3801_v36  ;;  %v4584_v52 = vld [vmem:[#allocation6 + $0x244] sm:$0xf]  ;;  %v3700_v53 = vld [vmem:[#allocation6 + $0x1e0] sm:$0xf]  ;;  %v4575_v54 = vld [vmem:[#allocation6 + $0x1f4] sm:$0xf0]  ;;  %v3561_v56 = vor.u32 %v4536_v50, %v3558_v51  ;;  %v3509_v59 = vor.u32 %v4527_v48, %v3508_v47 }
  0x7e   : > { %v3750_v55 = vld [vmem:[#allocation6 + $0x258] sm:$0xf0]  ;;  %v4530_v58 = vld [vmem:[#allocation6 + $0x94] sm:$0xf]  ;;  %v3534_v60 = vld [vmem:[#allocation6 + $0xa8] sm:$0xf0]  ;;  %v3701_v63 = vor.u32 %v4575_v54, %v3700_v53 }
  0x7f   : > { %v3753_v57 = vor.u32 %v4584_v52, %v3750_v55  ;;  %v4578_v61 = vld [vmem:[#allocation6 + $0x214] sm:$0xf]  ;;  %v3726_v62 = vld [vmem:[#allocation6 + $0x228] sm:$0xf0]  ;;  %v3484_v0 = vld [vmem:[#allocation6 + $0x30] sm:$0xf]  ;;  %v3537_v4 = vor.u32 %v4530_v58, %v3534_v60 }
  0x80   : > { %1014 = vmatpush.bf16.msra.mxu0 %v3557_v33  ;;  %1039 = vmatpush.bf16.msra.mxu2 %v3585_v44  ;;  %v4521_v1 = vld [vmem:[#allocation6 + $0x44] sm:$0xf0]  ;;  %v3676_v2 = vld [vmem:[#allocation6 + $0x1b0] sm:$0xf]  ;;  %v3729_v5 = vor.u32 %v4578_v61, %v3726_v62  ;;  %v4524_v6 = vld [vmem:[#allocation6 + $0x64] sm:$0xf] }
  0x81   : > { %1027 = vmatpush.bf16.msra.mxu1 %v3749_v37  ;;  %1052 = vmatpush.bf16.msra.mxu3 %v3777_v45  ;;  %v4569_v3 = vld [vmem:[#allocation6 + $0x1c4] sm:$0xf0]  ;;  %v3485_v7 = vor.u32 %v4521_v1, %v3484_v0  ;;  %v3510_v8 = vld [vmem:[#allocation6 + $0x78] sm:$0xf0]  ;;  %v4572_v9 = vld [vmem:[#allocation6 + $0x1e4] sm:$0xf] }
  0x82   : > { %v3702_v10 = vld [vmem:[#allocation6 + $0x1f8] sm:$0xf0]  ;;  %v3677_v11 = vor.u32 %v4569_v3, %v3676_v2  ;;  %v3460_v12 = vld [vmem:[#allocation6] sm:$0xf]  ;;  %v4515_v13 = vld [vmem:[#allocation6 + $0x14] sm:$0xf0]  ;;  %v3513_v20 = vor.u32 %v4524_v6, %v3510_v8 }
  0x83   : > { %v3652_v14 = vld [vmem:[#allocation6 + $0x180] sm:$0xf]  ;;  %v4563_v15 = vld [vmem:[#allocation6 + $0x194] sm:$0xf0]  ;;  %v4558_v17 = vld [vmem:[#allocation6 + $0x16c] sm:$0xf0]  ;;  %v3705_v21 = vor.u32 %v4572_v9, %v3702_v10  ;;  %v3461_v22 = vor.u32 %v4515_v13, %v3460_v12 }
  0x84   : > { %1015 = vmatpush.bf16.msra.mxu0 %v3533_v46  ;;  %1040 = vmatpush.bf16.msra.mxu2 %v3561_v56  ;;  %v3636_v16 = vld [vmem:[#allocation6 + $0x158] sm:$0xf]  ;;  %v4606_v19 = vld [vmem:[#allocation6 + $0x2ec] sm:$0xf0]  ;;  %v4518_v24 = vld [vmem:[#allocation6 + $0x34] sm:$0xf]  ;;  %v3653_v26 = vor.u32 %v4563_v15, %v3652_v14 }
  0x85   : > { %1028 = vmatpush.bf16.msra.mxu1 %v3725_v49  ;;  %1053 = vmatpush.bf16.msra.mxu3 %v3753_v57  ;;  %v3828_v18 = vld [vmem:[#allocation6 + $0x2d8] sm:$0xf]  ;;  %v431_v23 = vld [vmem:[#allocation4] sm:$0xff]  ;;  %v3486_v25 = vld [vmem:[#allocation6 + $0x48] sm:$0xf0]  ;;  %v3637_v27 = vor.u32 %v4558_v17, %v3636_v16  ;;  %vm1193_vm0 = vcmask 261120  }
  0x86   : > { %v432_v28 = vld [vmem:[#allocation4 + $0x8] sm:$0xff]  ;;  %v4566_v29 = vld [vmem:[#allocation6 + $0x1b4] sm:$0xf]  ;;  %v3678_v30 = vld [vmem:[#allocation6 + $0x1c8] sm:$0xf0]  ;;  %v3829_v31 = vor.u32 %v4606_v19, %v3828_v18  ;;  %v5451_v36 = vpack.c.bf16 %v431_v23, %v431_v23  ;;  %v3489_v37 = vor.u32 %v4518_v24, %v3486_v25  ;;  %vm1221_vm1 = vcmask 64512  }
  0x87   : > { %v3612_v32 = vld [vmem:[#allocation6 + $0x128] sm:$0xf]  ;;  %v4552_v33 = vld [vmem:[#allocation6 + $0x13c] sm:$0xf0]  ;;  %v5453_v38 = vpack.c.bf16 %v432_v28, %v432_v28  ;;  %v3588_v39 = vld [vmem:[#allocation6 + $0xf8] sm:$0xf]  ;;  %v3681_v40 = vor.u32 %v4566_v29, %v3678_v30 }
  0x88   : > { %1016 = vmatpush.bf16.msra.mxu0 %v3509_v59  ;;  %1041 = vmatpush.bf16.msra.mxu2 %v3537_v4  ;;  %v3804_v34 = vld [vmem:[#allocation6 + $0x2a8] sm:$0xf]  ;;  %v4600_v35 = vld [vmem:[#allocation6 + $0x2bc] sm:$0xf0]  ;;  %v4512_v41 = vld [vmem:[#allocation6 + $0x4] sm:$0xf]  ;;  %v3613_v44 = vor.u32 %v4552_v33, %v3612_v32 }
  0x89   : > { %1029 = vmatpush.bf16.msra.mxu1 %v3701_v63  ;;  %1054 = vmatpush.bf16.msra.mxu3 %v3729_v5  ;;  %v3462_v42 = vld [vmem:[#allocation6 + $0x18] sm:$0xf0]  ;;  %v4560_v43 = vld [vmem:[#allocation6 + $0x184] sm:$0xf]  ;;  %v3638_v47 = vld [vmem:[#allocation6 + $0x170] sm:$0xf0]  ;;  %v3805_v48 = vor.u32 %v4600_v35, %v3804_v34 }
  0x8a   : > { %v3654_v45 = vld [vmem:[#allocation6 + $0x198] sm:$0xf0]  ;;  %v4546_v49 = vld [vmem:[#allocation6 + $0x10c] sm:$0xf0]  ;;  %v3830_v51 = vld [vmem:[#allocation6 + $0x2f0] sm:$0xf0]  ;;  %v3465_v54 = vor.u32 %v4512_v41, %v3462_v42 }
  0x8b   : > { %v4555_v46 = vld [vmem:[#allocation6 + $0x15c] sm:$0xf]  ;;  %v3780_v52 = vld [vmem:[#allocation6 + $0x278] sm:$0xf]  ;;  %v4594_v53 = vld [vmem:[#allocation6 + $0x28c] sm:$0xf0]  ;;  %v3657_v55 = vor.u32 %v4560_v43, %v3654_v45  ;;  %v3589_v57 = vor.u32 %v4546_v49, %v3588_v39 }
  0x8c   : > { %1017 = vmatpush.bf16.msra.mxu0 %v3485_v7  ;;  %1042 = vmatpush.bf16.msra.mxu2 %v3513_v20  ;;  %v4603_v50 = vld [vmem:[#allocation6 + $0x2dc] sm:$0xf]  ;;  %v3641_v56 = vor.u32 %v4555_v46, %v3638_v47  ;;  %v3564_v58 = vld [vmem:[#allocation6 + $0xc8] sm:$0xf]  ;;  %v4549_v60 = vld [vmem:[#allocation6 + $0x12c] sm:$0xf]  ;;  %v3781_v62 = vor.u32 %v4594_v53, %v3780_v52 }
  0x8d   : > { %1030 = vmatpush.bf16.msra.mxu1 %v3677_v11  ;;  %1055 = vmatpush.bf16.msra.mxu3 %v3705_v21  ;;  %v3833_v59 = vor.u32 %v4603_v50, %v3830_v51  ;;  %v3614_v61 = vld [vmem:[#allocation6 + $0x140] sm:$0xf0]  ;;  %v4540_v63 = vld [vmem:[#allocation6 + $0xdc] sm:$0xf0]  ;;  %v4597_v0 = vld [vmem:[#allocation6 + $0x2ac] sm:$0xf] }
  0x8e   : > { %v3806_v1 = vld [vmem:[#allocation6 + $0x2c0] sm:$0xf0]  ;;  %v3756_v2 = vld [vmem:[#allocation6 + $0x248] sm:$0xf]  ;;  %v4588_v3 = vld [vmem:[#allocation6 + $0x25c] sm:$0xf0]  ;;  %v3617_v4 = vor.u32 %v4549_v60, %v3614_v61  ;;  %v3565_v5 = vor.u32 %v4540_v63, %v3564_v58 }
  0x8f   : > { %v3540_v6 = vld [vmem:[#allocation6 + $0x98] sm:$0xf]  ;;  %v3809_v7 = vor.u32 %v4597_v0, %v3806_v1  ;;  %v4543_v8 = vld [vmem:[#allocation6 + $0xfc] sm:$0xf]  ;;  %v3590_v9 = vld [vmem:[#allocation6 + $0x110] sm:$0xf0]  ;;  %v3757_v10 = vor.u32 %v4588_v3, %v3756_v2 }
  0x90   : > { %1018 = vmatpush.bf16.msra.mxu0 %v3461_v22  ;;  %1043 = vmatpush.bf16.msra.mxu2 %v3489_v37  ;;  %v4534_v11 = vld [vmem:[#allocation6 + $0xac] sm:$0xf0]  ;;  %v4591_v12 = vld [vmem:[#allocation6 + $0x27c] sm:$0xf]  ;;  %v3782_v13 = vld [vmem:[#allocation6 + $0x290] sm:$0xf0]  ;;  %v3593_v16 = vor.u32 %v4543_v8, %v3590_v9 }
  0x91   : > { %1031 = vmatpush.bf16.msra.mxu1 %v3653_v26  ;;  %1056 = vmatpush.bf16.msra.mxu3 %v3681_v40  ;;  %v3732_v14 = vld [vmem:[#allocation6 + $0x218] sm:$0xf]  ;;  %v4582_v15 = vld [vmem:[#allocation6 + $0x22c] sm:$0xf0]  ;;  %v3541_v17 = vor.u32 %v4534_v11, %v3540_v6  ;;  %v3516_v18 = vld [vmem:[#allocation6 + $0x68] sm:$0xf]  ;;  %v3785_v19 = vor.u32 %v4591_v12, %v3782_v13 }
  0x92   : > { %v4537_v20 = vld [vmem:[#allocation6 + $0xcc] sm:$0xf]  ;;  %v3566_v21 = vld [vmem:[#allocation6 + $0xe0] sm:$0xf0]  ;;  %v3733_v22 = vor.u32 %v4582_v15, %v3732_v14  ;;  %v4528_v23 = vld [vmem:[#allocation6 + $0x7c] sm:$0xf0] }
  0x93   : > { %1019 = vmatmul.bf16.vlgmr.msra.gmra.mxu0 %v5451_v36  ;;  %v4585_v24 = vld [vmem:[#allocation6 + $0x24c] sm:$0xf]  ;;  %v3758_v25 = vld [vmem:[#allocation6 + $0x260] sm:$0xf0]  ;;  %v3708_v26 = vld [vmem:[#allocation6 + $0x1e8] sm:$0xf]  ;;  %v3569_v28 = vor.u32 %v4537_v20, %v3566_v21  ;;  %v3517_v29 = vor.u32 %v4528_v23, %v3516_v18 }
  0x94   : > { %1063 = vmatpush.bf16.msrb.mxu0 %v3637_v27  ;;  %1032 = vmatmul.bf16.vlgmr.msra.gmra.mxu1 %v5453_v38  ;;  %v4576_v27 = vld [vmem:[#allocation6 + $0x1fc] sm:$0xf0]  ;;  %v3492_v30 = vld [vmem:[#allocation6 + $0x38] sm:$0xf]  ;;  %v4531_v32 = vld [vmem:[#allocation6 + $0x9c] sm:$0xf] }
  0x95   : > { %1076 = vmatpush.bf16.msrb.mxu1 %v3829_v31  ;;  %1044 = vmatpush.bf16.msra.mxu2 %v3465_v54  ;;  %v3761_v31 = vor.u32 %v4585_v24, %v3758_v25  ;;  %v3542_v33 = vld [vmem:[#allocation6 + $0xb0] sm:$0xf0]  ;;  %v3709_v34 = vor.u32 %v4576_v27, %v3708_v26  ;;  %v4522_v35 = vld [vmem:[#allocation6 + $0x4c] sm:$0xf0]  ;;  %v4579_v37 = vld [vmem:[#allocation6 + $0x21c] sm:$0xf] }
  0x96   : > { %1057 = vmatpush.bf16.msra.mxu3 %v3657_v55  ;;  %v3734_v39 = vld [vmem:[#allocation6 + $0x230] sm:$0xf0]  ;;  %v3684_v40 = vld [vmem:[#allocation6 + $0x1b8] sm:$0xf]  ;;  %v4570_v41 = vld [vmem:[#allocation6 + $0x1cc] sm:$0xf0]  ;;  %v3545_v43 = vor.u32 %v4531_v32, %v3542_v33 }
  0x97   : > { %v3468_v42 = vld [vmem:[#allocation6 + $0x8] sm:$0xf]  ;;  %v4516_v45 = vld [vmem:[#allocation6 + $0x1c] sm:$0xf0]  ;;  %v3737_v46 = vor.u32 %v4579_v37, %v3734_v39  ;;  %v4525_v47 = vld [vmem:[#allocation6 + $0x6c] sm:$0xf]  ;;  %v3685_v49 = vor.u32 %v4570_v41, %v3684_v40 }
  0x98   : > { %1064 = vmatpush.bf16.msrb.mxu0 %v3613_v44  ;;  %1045 = vmatmul.bf16.vlgmr.msra.gmra.mxu2 %v5451_v36  ;;  %v3493_v44 = vor.u32 %v4522_v35, %v3492_v30  ;;  %v3660_v50 = vld [vmem:[#allocation6 + $0x188] sm:$0xf]  ;;  %v4573_v51 = vld [vmem:[#allocation6 + $0x1ec] sm:$0xf]  ;;  %v3710_v52 = vld [vmem:[#allocation6 + $0x200] sm:$0xf0] }
  0x99   : > { %1077 = vmatpush.bf16.msrb.mxu1 %v3805_v48  ;;  %1089 = vmatpush.bf16.msrb.mxu2 %v3641_v56  ;;  %v3518_v48 = vld [vmem:[#allocation6 + $0x80] sm:$0xf0]  ;;  %v4564_v53 = vld [vmem:[#allocation6 + $0x19c] sm:$0xf0]  ;;  %v4559_v55 = vld [vmem:[#allocation6 + $0x174] sm:$0xf0]  ;;  %v3713_v58 = vor.u32 %v4573_v51, %v3710_v52 }
  0x9a   : > { %1102 = vmatpush.bf16.msrb.mxu3 %v3833_v59  ;;  %v3644_v54 = vld [vmem:[#allocation6 + $0x160] sm:$0xf]  ;;  %v3521_v56 = vor.u32 %v4525_v47, %v3518_v48  ;;  %v4519_v59 = vld [vmem:[#allocation6 + $0x3c] sm:$0xf]  ;;  %v3494_v60 = vld [vmem:[#allocation6 + $0x50] sm:$0xf0]  ;;  %v3661_v61 = vor.u32 %v4564_v53, %v3660_v50 }
  0x9b   : > { %1058 = vmatmul.bf16.vlgmr.msra.gmra.mxu3 %v5453_v38  ;;  %v3686_v63 = vld [vmem:[#allocation6 + $0x1d0] sm:$0xf0]  ;;  %v3645_v0 = vor.u32 %v4559_v55, %v3644_v54  ;;  %v3620_v1 = vld [vmem:[#allocation6 + $0x130] sm:$0xf]  ;;  %v4553_v2 = vld [vmem:[#allocation6 + $0x144] sm:$0xf0]  ;;  %v3497_v3 = vor.u32 %v4519_v59, %v3494_v60 }
  0x9c   : > { %1065 = vmatpush.bf16.msrb.mxu0 %v3589_v57  ;;  %v3469_v57 = vor.u32 %v4516_v45, %v3468_v42  ;;  %v3470_v6 = vld [vmem:[#allocation6 + $0x20] sm:$0xf0]  ;;  %v3621_v9 = vor.u32 %v4553_v2, %v3620_v1  ;;  %v4547_v11 = vld [vmem:[#allocation6 + $0x114] sm:$0xf0]  ;;  %v3572_v15 = vld [vmem:[#allocation6 + $0xd0] sm:$0xf] }
  0x9d   : > { %1078 = vmatpush.bf16.msrb.mxu1 %v3781_v62  ;;  %1090 = vmatpush.bf16.msrb.mxu2 %v3617_v4  ;;  %v4567_v62 = vld [vmem:[#allocation6 + $0x1bc] sm:$0xf]  ;;  %v3662_v8 = vld [vmem:[#allocation6 + $0x1a0] sm:$0xf0]  ;;  %v3548_v18 = vld [vmem:[#allocation6 + $0xa0] sm:$0xf] }
  0x9e   : > { %1103 = vmatpush.bf16.msrb.mxu3 %v3809_v7  ;;  %v3689_v4 = vor.u32 %v4567_v62, %v3686_v63  ;;  %v4561_v7 = vld [vmem:[#allocation6 + $0x18c] sm:$0xf]  ;;  %v3524_v20 = vld [vmem:[#allocation6 + $0x70] sm:$0xf]  ;;  %v3500_v24 = vld [vmem:[#allocation6 + $0x40] sm:$0xf] }
  0x9f   : > { %v3665_v13 = vor.u32 %v4561_v7, %v3662_v8  ;;  %v4523_v25 = vld [vmem:[#allocation6 + $0x54] sm:$0xf0]  ;;  %v3476_v26 = vld [vmem:[#allocation6 + $0x10] sm:$0xf]  ;;  %v4517_v27 = vld [vmem:[#allocation6 + $0x24] sm:$0xf0] }
  0xa0   : > { %1066 = vmatpush.bf16.msrb.mxu0 %v3565_v5  ;;  %v4513_v5 = vld [vmem:[#allocation6 + $0xc] sm:$0xf]  ;;  %v3501_v30 = vor.u32 %v4523_v25, %v3500_v24  ;;  %v4604_v32 = vld [vmem:[#allocation6 + $0x2e4] sm:$0xf]  ;;  %v3838_v33 = vld [vmem:[#allocation6 + $0x2f8] sm:$0xf0]  ;;  %v3477_v48 = vor.u32 %v4517_v27, %v3476_v26 }
  0xa1   : > { %1079 = vmatpush.bf16.msrb.mxu1 %v3757_v10  ;;  %1091 = vmatpush.bf16.msrb.mxu2 %v3593_v16  ;;  %v3596_v10 = vld [vmem:[#allocation6 + $0x100] sm:$0xf]  ;;  %v3473_v12 = vor.u32 %v4513_v5, %v3470_v6  ;;  %v4541_v16 = vld [vmem:[#allocation6 + $0xe4] sm:$0xf0]  ;;  %v3841_v35 = vor.u32 %v4604_v32, %v3838_v33  ;;  %v3622_v37 = vld [vmem:[#allocation6 + $0x148] sm:$0xf0] }
  0xa2   : > { %1104 = vmatpush.bf16.msrb.mxu3 %v3785_v19  ;;  %v3597_v14 = vor.u32 %v4547_v11, %v3596_v10  ;;  %v4535_v19 = vld [vmem:[#allocation6 + $0xb4] sm:$0xf0]  ;;  %v4598_v39 = vld [vmem:[#allocation6 + $0x2b4] sm:$0xf]  ;;  %v3814_v40 = vld [vmem:[#allocation6 + $0x2c8] sm:$0xf0] }
  0xa3   : > { %v3549_v21 = vor.u32 %v4535_v19, %v3548_v18  ;;  %v3836_v42 = vld [vmem:[#allocation6 + $0x2e0] sm:$0xf]  ;;  %v3598_v47 = vld [vmem:[#allocation6 + $0x118] sm:$0xf0]  ;;  %v3812_v53 = vld [vmem:[#allocation6 + $0x2b0] sm:$0xf] }
  0xa4   : > { %1067 = vmatpush.bf16.msrb.mxu0 %v3541_v17  ;;  %v3573_v17 = vor.u32 %v4541_v16, %v3572_v15  ;;  %v3790_v50 = vld [vmem:[#allocation6 + $0x298] sm:$0xf0]  ;;  %v4601_v54 = vld [vmem:[#allocation6 + $0x2c4] sm:$0xf0]  ;;  %v3766_v60 = vld [vmem:[#allocation6 + $0x268] sm:$0xf0] }
  0xa5   : > { %1080 = vmatpush.bf16.msrb.mxu1 %v3733_v22  ;;  %1092 = vmatpush.bf16.msrb.mxu2 %v3569_v28  ;;  %v4529_v22 = vld [vmem:[#allocation6 + $0x84] sm:$0xf0]  ;;  %v4556_v28 = vld [vmem:[#allocation6 + $0x164] sm:$0xf]  ;;  %v3813_v55 = vor.u32 %v4601_v54, %v3812_v53  ;;  %v3788_v62 = vld [vmem:[#allocation6 + $0x280] sm:$0xf] }
  0xa6   : > { %1105 = vmatpush.bf16.msrb.mxu3 %v3761_v31  ;;  %v3525_v23 = vor.u32 %v4529_v22, %v3524_v20  ;;  %v4595_v63 = vld [vmem:[#allocation6 + $0x294] sm:$0xf0]  ;;  %v4580_v5 = vld [vmem:[#allocation6 + $0x224] sm:$0xf]  ;;  %v3742_v7 = vld [vmem:[#allocation6 + $0x238] sm:$0xf0] }
  0xa7   : > { %v3789_v1 = vor.u32 %v4595_v63, %v3788_v62  ;;  %v3745_v8 = vor.u32 %v4580_v5, %v3742_v7  ;;  %v4589_v10 = vld [vmem:[#allocation6 + $0x264] sm:$0xf0]  ;;  %v3718_v16 = vld [vmem:[#allocation6 + $0x208] sm:$0xf0]  ;;  %v4583_v20 = vld [vmem:[#allocation6 + $0x234] sm:$0xf0] }
  0xa8   : > { %1068 = vmatpush.bf16.msrb.mxu0 %v3517_v29  ;;  %v3646_v29 = vld [vmem:[#allocation6 + $0x178] sm:$0xf0]  ;;  %v4568_v25 = vld [vmem:[#allocation6 + $0x1c4] sm:$0xf]  ;;  %vm1740_vm2 = vcmask 523264   ;;  %vm1742_vm3 = vcmask 785408  }
  0xa9   : > { %1081 = vmatpush.bf16.msrb.mxu1 %v3709_v34  ;;  %1093 = vmatpush.bf16.msrb.mxu2 %v3545_v43  ;;  %v3649_v31 = vor.u32 %v4556_v28, %v3646_v29  ;;  %v4550_v34 = vld [vmem:[#allocation6 + $0x134] sm:$0xf]  ;;  %v4607_v43 = vld [vmem:[#allocation6 + $0x2f4] sm:$0xf0]  ;;  %v3502_v24 = vld [vmem:[#allocation6 + $0x58] sm:$0xf0] }
  0xaa   : > { %1106 = vmatpush.bf16.msrb.mxu3 %v3737_v46  ;;  %v3625_v41 = vor.u32 %v4550_v34, %v3622_v37  ;;  %v3837_v45 = vor.u32 %v4607_v43, %v3836_v42  ;;  %v4544_v46 = vld [vmem:[#allocation6 + $0x104] sm:$0xf]  ;;  %v3694_v27 = vld [vmem:[#allocation6 + $0x1d8] sm:$0xf0]  ;;  %v3716_v29 = vld [vmem:[#allocation6 + $0x1f0] sm:$0xf] }
  0xab   : > { %v3601_v51 = vor.u32 %v4544_v46, %v3598_v47  ;;  %v3697_v28 = vor.u32 %v4568_v25, %v3694_v27  ;;  %v3478_v34 = vld [vmem:[#allocation6 + $0x28] sm:$0xf0]  ;;  %v3692_v42 = vld [vmem:[#allocation6 + $0x1c0] sm:$0xf]  ;;  %v4571_v43 = vld [vmem:[#allocation6 + $0x1d4] sm:$0xf0] }
  0xac   : > { %1069 = vmatpush.bf16.msrb.mxu0 %v3493_v44  ;;  %v3817_v44 = vor.u32 %v4598_v39, %v3814_v40  ;;  %v3670_v37 = vld [vmem:[#allocation6 + $0x1a8] sm:$0xf0]  ;;  %v4565_v46 = vld [vmem:[#allocation6 + $0x1a4] sm:$0xf0] }
  0xad   : > { %1082 = vmatpush.bf16.msrb.mxu1 %v3685_v49  ;;  %1094 = vmatpush.bf16.msrb.mxu2 %v3521_v56  ;;  %v4592_v49 = vld [vmem:[#allocation6 + $0x284] sm:$0xf]  ;;  %v4538_v56 = vld [vmem:[#allocation6 + $0xd4] sm:$0xf] }
  0xae   : > { %1107 = vmatpush.bf16.msrb.mxu3 %v3713_v58  ;;  %v3793_v52 = vor.u32 %v4592_v49, %v3790_v50  ;;  %v4586_v58 = vld [vmem:[#allocation6 + $0x254] sm:$0xf]  ;;  %v1176_v50 = vld [vmem:[#allocation9 + $0x1] ss:$8 sm:$0x3] }
  0xaf   : > { %v1167_v53 = vld [vmem:[#allocation9] ss:$8 sm:$0x3] }
  0xb0   : > { %1070 = vmatpush.bf16.msrb.mxu0 %v3469_v57  ;;  %v3574_v57 = vld [vmem:[#allocation6 + $0xe8] sm:$0xf0] }
  0xb1   : > { %1083 = vmatpush.bf16.msrb.mxu1 %v3661_v61  ;;  %1095 = vmatpush.bf16.msrb.mxu2 %v3497_v3  ;;  %v3577_v59 = vor.u32 %v4538_v56, %v3574_v57  ;;  %v3769_v61 = vor.u32 %v4586_v58, %v3766_v60  ;;  %v4532_v3 = vld [vmem:[#allocation6 + $0xa4] sm:$0xf]  ;;  %v1169_v57 = vperm.slane %v1167_v53, 0 }
  0xb2   : > { %1108 = vmatpush.bf16.msrb.mxu3 %v3689_v4  ;;  %v3550_v4 = vld [vmem:[#allocation6 + $0xb8] sm:$0xf0] }
  0xb3   : > { %1071 = vmatmul.bf16.vlgmr.msrb.gmra.mxu0 %v5451_v36  ;;  %v3553_v6 = vor.u32 %v4532_v3, %v3550_v4 }
  0xb4   : > { %1115 = vmatpush.bf16.msra.mxu0 %v3645_v0  ;;  %1084 = vmatmul.bf16.vlgmr.msrb.gmra.mxu1 %v5453_v38 }
  0xb5   : > { %1096 = vmatpush.bf16.msrb.mxu2 %v3473_v12  ;;  %1128 = vmatpush.bf16.msra.mxu1 %v3837_v45  ;;  %v4526_v12 = vld [vmem:[#allocation6 + $0x74] sm:$0xf]  ;;  %v3668_v45 = vld [vmem:[#allocation6 + $0x190] sm:$0xf] }
  0xb6   : > { %1109 = vmatpush.bf16.msrb.mxu3 %v3665_v13  ;;  %v3526_v13 = vld [vmem:[#allocation6 + $0x88] sm:$0xf0]  ;;  %v3669_v47 = vor.u32 %v4565_v46, %v3668_v45 }
  0xb7   : > { %v3529_v15 = vor.u32 %v4526_v12, %v3526_v13 }
  0xb8   : > { %1116 = vmatpush.bf16.msra.mxu0 %v3621_v9  ;;  %1097 = vmatmul.bf16.vlgmr.msrb.gmra.mxu2 %v5451_v36  ;;  %v3764_v9 = vld [vmem:[#allocation6 + $0x250] sm:$0xf] }
  0xb9   : > { %1110 = vmatmul.bf16.vlgmr.msrb.gmra.mxu3 %v5453_v38  ;;  %1141 = vmatpush.bf16.msra.mxu2 %v3649_v31  ;;  %v3765_v11 = vor.u32 %v4589_v10, %v3764_v9  ;;  %v4514_v31 = vld [vmem:[#allocation6 + $0x14] sm:$0xf] }
  0xba   : > { %1154 = vmatpush.bf16.msra.mxu3 %v3841_v35  ;;  %1129 = vmatpush.bf16.msra.mxu1 %v3813_v55  ;;  %v4562_v35 = vld [vmem:[#allocation6 + $0x194] sm:$0xf]  ;;  %v3481_v40 = vor.u32 %v4514_v31, %v3478_v34 }
  0xbc   : > { %1117 = vmatpush.bf16.msra.mxu0 %v3597_v14  ;;  %v4574_v14 = vld [vmem:[#allocation6 + $0x1f4] sm:$0xf] }
  0xbd   : > { %1142 = vmatpush.bf16.msra.mxu2 %v3625_v41  ;;  %v3721_v19 = vor.u32 %v4574_v14, %v3718_v16  ;;  %v3673_v41 = vor.u32 %v4562_v35, %v3670_v37 }
  0xbe   : > { %1155 = vmatpush.bf16.msra.mxu3 %v3817_v44  ;;  %1130 = vmatpush.bf16.msra.mxu1 %v3789_v1  ;;  %v3693_v44 = vor.u32 %v4571_v43, %v3692_v42 }
  0xc0   : > { %1118 = vmatpush.bf16.msra.mxu0 %v3573_v17  ;;  %v3740_v17 = vld [vmem:[#allocation6 + $0x220] sm:$0xf] }
  0xc1   : > { %1143 = vmatpush.bf16.msra.mxu2 %v3601_v51  ;;  %v3741_v22 = vor.u32 %v4583_v20, %v3740_v17 }
  0xc2   : > { %1156 = vmatpush.bf16.msra.mxu3 %v3793_v52  ;;  %1131 = vmatpush.bf16.msra.mxu1 %v3765_v11  ;;  %v1178_v52 = vperm.slane %v1176_v50, 0  ;;  %v1185_v11 = vld [vmem:[#allocation9 + $0x2] ss:$8 sm:$0x3] }
  0xc3   : > { %v1187_v13 = vperm.slane %v1185_v11, 0 }
  0xc4   : > { %1119 = vmatpush.bf16.msra.mxu0 %v3549_v21 }
  0xc5   : > { %1144 = vmatpush.bf16.msra.mxu2 %v3577_v59 }
  0xc6   : > { %1157 = vmatpush.bf16.msra.mxu3 %v3769_v61  ;;  %1132 = vmatpush.bf16.msra.mxu1 %v3741_v22  ;;  %v1179_v61 = vperm.slane %v1176_v50, 1 }
  0xc8   : > { %1120 = vmatpush.bf16.msra.mxu0 %v3525_v23  ;;  %v4520_v23 = vld [vmem:[#allocation6 + $0x44] sm:$0xf] }
  0xc9   : > { %1145 = vmatpush.bf16.msra.mxu2 %v3553_v6  ;;  %v3505_v26 = vor.u32 %v4520_v23, %v3502_v24 }
  0xca   : > { %1158 = vmatpush.bf16.msra.mxu3 %v3745_v8 }
  0xcc   : > { %1121 = vmatpush.bf16.msra.mxu0 %v3501_v30  ;;  %v4577_v30 = vld [vmem:[#allocation6 + $0x204] sm:$0xf0] }
  0xcd   : > { %1146 = vmatpush.bf16.msra.mxu2 %v3529_v15  ;;  %v3717_v33 = vor.u32 %v4577_v30, %v3716_v29  ;;  %v1188_v15 = vperm.slane %v1185_v11, 1 }
  0xce   : > { %1159 = vmatpush.bf16.msra.mxu3 %v3721_v19 }
  0xcf   : > { %1133 = vmatpush.bf16.msra.mxu1 %v3717_v33 }
  0xd0   : > { %1122 = vmatpush.bf16.msra.mxu0 %v3477_v48 }
  0xd1   : > { %1147 = vmatpush.bf16.msra.mxu2 %v3505_v26 }
  0xd2   : > { %1160 = vmatpush.bf16.msra.mxu3 %v3697_v28 }
  0xd3   : > { %1123 = vmatmul.bf16.vlgmr.msra.gmra.mxu0 %v5451_v36  ;;  %1134 = vmatpush.bf16.msra.mxu1 %v3693_v44 }
  0xd5   : > { %1148 = vmatpush.bf16.msra.mxu2 %v3481_v40 }
  0xd6   : > { %1161 = vmatpush.bf16.msra.mxu3 %v3673_v41 }
  0xd7   : > { %1135 = vmatpush.bf16.msra.mxu1 %v3669_v47 }
  0xd8   : > { %1149 = vmatmul.bf16.vlgmr.msra.gmra.mxu2 %v5451_v36 }
  0xd9   : > { %1162 = vmatmul.bf16.vlgmr.msra.gmra.mxu3 %v5453_v38 }
  0xda   : > { %1136 = vmatmul.bf16.vlgmr.msra.gmra.mxu1 %v5453_v38 }
 0x110   : > { %v5464_v0 = vpop.f32.mrf.mxu0 }
 0x111   : > { %v5466_v2 = vpop.f32.mrf.mxu1 }
 0x112   : > { %v1034_v56 = vadd.f32 %v5466_v2, %v5464_v0  ;;  %v1170_v0 = vperm.slane %v1167_v53, 1 }
 0x114   : > { %v1173_v36 = vadd.f32 %v1169_v57, %v1034_v56 }
 0x118   : > { %v1022_v18 = vpop.f32.mrf.mxu0 }
 0x119   : > { %v1035_v21 = vpop.f32.mrf.mxu1 }
 0x11b   : > { %v1046_v32 = vpop.f32.mrf.mxu2 }
 0x11e   : > { %v1059_v39 = vpop.f32.mrf.mxu3 }
 0x11f   : > { %v1060_v63 = vadd.f32 %v1059_v39, %v1046_v32 }
 0x121   : > { %v1174_v3 = vadd.f32 %v1170_v0, %v1060_v63 }
 0x123   : > { %v1048_v48 = vpop.f32.mrf.mxu2 }
 0x126   : > { %v1061_v49 = vpop.f32.mrf.mxu3 }
 0x130   : > { %v1072_v51 = vpop.f32.mrf.mxu0 }
 0x131   : > { %v1085_v54 = vpop.f32.mrf.mxu1 }
 0x132   : > { %v1086_v55 = vadd.f32 %v1085_v54, %v1072_v51 }
 0x134   : > { %v1182_v58 = vadd.f32 %v1178_v52, %v1086_v55 }
 0x136   : > { %1325 = vrot.lane.b32.xlu2 %v1182_v58, %s5215_s25  ;;  %1391 = vrot.lane.b32.xlu1 %v1182_v58, %s5216_s17 }
 0x137   : > { %1258 = vrot.lane.b32.xlu0 %v1182_v58, %s5217_s20  ;;  %3842 = vmatpush.xpose.msk.msrb.mxu0 %vm1193_vm0, %v1182_v58 }
 0x138   : > { %v1074_v38 = vpop.f32.mrf.mxu0 }
 0x139   : > { %v1087_v59 = vpop.f32.mrf.mxu1 }
 0x13a   : > { %3843 = vmatmul.msk.f32.vlgmr.msrb.gmra.mxu0 %vm1193_vm0, %v1173_v36 }
 0x13b   : > { %v1098_v60 = vpop.f32.mrf.mxu2 }
 0x13c   : > { %v1111_v62 = vpop.f32.mrf.mxu3 }
 0x13d   : > { %v1112_v1 = vadd.f32 %v1111_v62, %v1098_v60 }
 0x13e   : > { %1389 = vrot.lane.b32.xlu1 %v1173_v36, %s5216_s17 }
 0x13f   : > { %1256 = vrot.lane.b32.xlu0 %v1173_v36, %s5217_s20  ;;  %v1183_v2 = vadd.f32 %v1179_v61, %v1112_v1 }
 0x141   : > { %1518 = vrot.lane.b32.xlu2 %v1183_v2, %s5217_s20 }
 0x143   : > { %v1100_v4 = vpop.f32.mrf.mxu2 }
 0x144   : > { %v1113_v5 = vpop.f32.mrf.mxu3 }
 0x146   : > { %1323 = vrot.lane.b32.xlu1 %v1173_v36, %s5215_s25 }
 0x147   : > { %1516 = vrot.lane.b32.xlu0 %v1174_v3, %s5217_s20 }
 0x149   : > { %1651 = vrot.lane.b32.xlu2 %v1183_v2, %s5216_s17 }
 0x14e   : > { %1585 = vrot.lane.b32.xlu1 %v1183_v2, %s5215_s25 }
 0x14f   : > { %1649 = vrot.lane.b32.xlu0 %v1174_v3, %s5216_s17 }
 0x150   : > { %v1124_v6 = vpop.f32.mrf.mxu0 }
 0x151   : > { %1583 = vrot.lane.b32.xlu2 %v1174_v3, %s5215_s25 }
 0x157   : > { %v1137_v12 = vpop.f32.mrf.mxu1 }
 0x158   : > { %v1126_v7 = vpop.f32.mrf.mxu0  ;;  %v1138_v16 = vadd.f32 %v1137_v12, %v1124_v6 }
 0x15a   : > { %v5491_v19 = vadd.f32 %v1187_v13, %v1138_v16 }
 0x15b   : > { %v1150_v14 = vpop.f32.mrf.mxu2 }
 0x15c   : > { %v1163_v17 = vpop.f32.mrf.mxu3  ;;  %1251 = vmatpush.msrb.mxu1 %v5491_v19 }
 0x15d   : > { %v1164_v18 = vadd.f32 %v1163_v17, %v1150_v14 }
 0x15f   : > { %v5493_v20 = vadd.f32 %v1188_v15, %v1164_v18  ;;  %v1139_v25 = vpop.f32.mrf.mxu1 }
 0x163   : > { %v1152_v24 = vpop.f32.mrf.mxu2 }
 0x164   : > { %v1165_v26 = vpop.f32.mrf.mxu3 }
 0x190   : > { %v1326_v8 = vpop.permute.xlu2 %1325 }
 0x191   : > { %3848 = vmatpush.xpose.msk.msra.mxu0 %vm1193_vm0, %v1326_v8 }
 0x195   : > { %3854 = vmatpush.xpose.msk.msrb.mxu0 %vm1193_vm0, %v1183_v2 }
 0x19b   : > { %v1519_v21 = vpop.permute.xlu2 %1518 }
 0x1a3   : > { %v1652_v30 = vpop.permute.xlu2 %1651 }
 0x1a8   : > { %v1392_v9 = vpop.permute.xlu1 %1391 }
 0x1a9   : > { %v1259_v10 = vpop.permute.xlu0 %1258 }
 0x1aa   : > { %3845 = vmatpush.xpose.msk.msrb.mxu2 %vm1193_vm0, %v1259_v10 }
 0x1ab   : > { %v1584_v35 = vpop.permute.xlu2 %1583 }
 0x1ae   : > { %3851 = vmatpush.xpose.msk.msra.mxu2 %vm1193_vm0, %v1392_v9 }
 0x1b0   : > { %v1390_v22 = vpop.permute.xlu1 %1389 }
 0x1b1   : > { %v1257_v23 = vpop.permute.xlu0 %1256 }
 0x1b2   : > { %3846 = vmatmul.msk.f32.vlgmr.msrb.gmra.mxu2 %vm1193_vm0, %v1257_v23 }
 0x1b3   : > { %3857 = vmatpush.xpose.msk.msrb.mxu2 %vm1193_vm0, %v1519_v21 }
 0x1b7   : > { %v1217_v27 = vpop.f32.mrf.mxu0 }
 0x1b8   : > { %v1220_v28 = vmul.f32 0.17677669, %v1217_v27  ;;  %v1324_v29 = vpop.permute.xlu1 %1323 }
 0x1b9   : > { %3849 = vmatmul.msk.f32.vlgmr.msra.gmra.mxu0 %vm1193_vm0, %v1324_v29  ;;  %v1517_v32 = vpop.permute.xlu0 %1516 }
 0x1ba   : > { %3852 = vmatmul.msk.f32.vlgmr.msra.gmra.mxu2 %vm1193_vm0, %v1390_v22  ;;  %v1222_v31 = vsel %vm1221_vm1, %v1220_v28, -inf }
 0x1bb   : > { %1223 = vmax.xlane.f32.xlu1 %v1222_v31  ;;  %3863 = vmatpush.xpose.msk.msra.mxu2 %vm1193_vm0, %v1652_v30 }
 0x1c0   : > { %v1586_v33 = vpop.permute.xlu1 %1585 }
 0x1c1   : > { %3855 = vmatmul.msk.f32.vlgmr.msrb.gmra.mxu0 %vm1193_vm0, %v1174_v3  ;;  %v1650_v34 = vpop.permute.xlu0 %1649 }
 0x1c2   : > { %3858 = vmatmul.msk.f32.vlgmr.msrb.gmra.mxu2 %vm1193_vm0, %v1517_v32  ;;  %3860 = vmatpush.xpose.msk.msra.mxu0 %vm1193_vm0, %v1586_v33 }
 0x1c9   : > { %3861 = vmatmul.msk.f32.vlgmr.msra.gmra.mxu0 %vm1193_vm0, %v1584_v35 }
 0x1ca   : > { %3864 = vmatmul.msk.f32.vlgmr.msra.gmra.mxu2 %vm1193_vm0, %v1650_v34 }
 0x22e   : > { %v1224_v37 = vpop.xlane.xlu1 %1223 }
 0x22f   : > { %v1225_v39 = vsub.f32 %v1220_v28, %v1224_v37  ;;  %v4872_v28 = vpack.i.bf16 %v5493_v20, %v5491_v19 }
 0x231   : > { %v1226_v40 = vmul.f32 1.442695, %v1225_v39 }
 0x233   : > { %4892 = vpow2.f32 %v1226_v40 }
 0x235   : > { %v1281_v41 = vpop.f32.mrf.mxu2 }
 0x236   : > { %v1284_v42 = vmul.f32 0.17677669, %v1281_v41  ;;  %v1348_v43 = vpop.f32.mrf.mxu0 }
 0x237   : > { %v1351_v44 = vmul.f32 0.17677669, %v1348_v43 }
 0x238   : > { %v1285_v45 = vsel %vm1221_vm1, %v1284_v42, -inf }
 0x239   : > { %1286 = vmax.xlane.f32.xlu0 %v1285_v45  ;;  %v1352_v46 = vsel %vm1221_vm1, %v1351_v44, -inf  ;;  %v4893_v48 = vpop.eup %4892 }
 0x23a   : > { %1353 = vmax.xlane.f32.xlu2 %v1352_v46  ;;  %v1228_v52 = vsel %vm1221_vm1, %v4893_v48, 0.0 }
 0x23d   : > { %v1414_v47 = vpop.f32.mrf.mxu2 }
 0x23e   : > { %v1478_v49 = vpop.f32.mrf.mxu0  ;;  %v1417_v53 = vmul.f32 0.17677669, %v1414_v47 }
 0x23f   : > { %v1481_v50 = vmul.f32 0.17677669, %v1478_v49 }
 0x240   : > { %v1418_v58 = vsel %vm1221_vm1, %v1417_v53, -inf }
 0x241   : > { %v1482_v51 = vsel %vm1221_vm1, %v1481_v50, -inf }
 0x242   : > { %1483 = vmax.xlane.f32.xlu1 %v1482_v51  ;;  %1229 = vadd.xlane.f32.xlu2 %v1228_v52 }
 0x245   : > { %v1541_v54 = vpop.f32.mrf.mxu2 }
 0x246   : > { %v1608_v55 = vpop.f32.mrf.mxu0  ;;  %v1544_v36 = vmul.f32 0.17677669, %v1541_v54 }
 0x247   : > { %v5511_v56 = vmul.f32 0.17677669, %v1608_v55 }
 0x248   : > { %v1545_v60 = vsel %vm1221_vm1, %v1544_v36, -inf }
 0x249   : > { %v1612_v57 = vsel %vm1221_vm1, %v5511_v56, -inf }
 0x24a   : > { %1613 = vmax.xlane.f32.xlu0 %v1612_v57  ;;  %1419 = vmax.xlane.f32.xlu2 %v1418_v58 }
 0x24d   : > { %v1674_v38 = vpop.f32.mrf.mxu2 }
 0x24e   : > { %v1677_v59 = vmul.f32 0.17677669, %v1674_v38 }
 0x250   : > { %v1678_v61 = vsel %vm1221_vm1, %v1677_v59, -inf }
 0x252   : > { %1546 = vmax.xlane.f32.xlu0 %v1545_v60  ;;  %1679 = vmax.xlane.f32.xlu2 %v1678_v61 }
 0x266   : > { %1363 = vrot.lane.b32.xlu0 %v5491_v19, %s5215_s25 }
 0x2ac   : > { %v1287_v62 = vpop.xlane.xlu0 %1286 }
 0x2ad   : > { %v1288_v63 = vsub.f32 %v1284_v42, %v1287_v62  ;;  %v1354_v0 = vpop.xlane.xlu2 %1353 }
 0x2ae   : > { %v1355_v1 = vsub.f32 %v1351_v44, %v1354_v0 }
 0x2af   : > { %v1289_v2 = vmul.f32 1.442695, %v1288_v63 }
 0x2b0   : > { %v1356_v3 = vmul.f32 1.442695, %v1355_v1 }
 0x2b1   : > { %4894 = vpow2.f32 %v1289_v2 }
 0x2b2   : > { %4896 = vpow2.f32 %v1356_v3 }
 0x2b5   : > { %v1230_v4 = vpop.xlane.xlu2 %1229  ;;  %v1484_v5 = vpop.xlane.xlu1 %1483 }
 0x2b6   : > { %4898 = vrcp.f32 %v1230_v4  ;;  %v1485_v6 = vsub.f32 %v1481_v50, %v1484_v5 }
 0x2b7   : > { %v5520_v7 = vpop.eup %4894 }
 0x2b8   : > { %v4897_v8 = vpop.eup %4896  ;;  %v1486_v9 = vmul.f32 1.442695, %v1485_v6  ;;  %v1291_v10 = vsel %vm1221_vm1, %v5520_v7, 0.0 }
 0x2b9   : > { %1292 = vadd.xlane.f32.xlu1 %v1291_v10  ;;  %v1358_v11 = vsel %vm1221_vm1, %v4897_v8, 0.0 }
 0x2ba   : > { %4900 = vpow2.f32 %v1486_v9  ;;  %1359 = vadd.xlane.f32.xlu2 %v1358_v11 }
 0x2bc   : > { %v4899_v12 = vpop.eup %4898 }
 0x2bd   : > { %v1232_v13 = vmul.f32 %v4899_v12, %v4893_v48  ;;  %v1614_v14 = vpop.xlane.xlu0 %1613  ;;  %v1420_v15 = vpop.xlane.xlu2 %1419  ;;  %v3924_v12 = vld [vmem:[#allocation8 + $0x70] sm:$0xf] }
 0x2be   : > { %v1421_v16 = vsub.f32 %v1417_v53, %v1420_v15  ;;  %v1615_v32 = vsub.f32 %v5511_v56, %v1614_v14  ;;  %v3988_v14 = vld [vmem:[#allocation8 + $0xf0] sm:$0xf] }
 0x2bf   : > { %3844 = vmatmul.msk.f32.vlgmr.msrb.gmra.mxu1 %vm1221_vm1, %v1232_v13  ;;  %v4623_v13 = vld [vmem:[#allocation8 + $0x74] sm:$0xf0] }
 0x2c0   : > { %v4901_v17 = vpop.eup %4900  ;;  %v1422_v18 = vmul.f32 1.442695, %v1421_v16  ;;  %v1616_v34 = vmul.f32 1.442695, %v1615_v32  ;;  %v3925_v15 = vor.u32 %v4623_v13, %v3924_v12  ;;  %v4639_v16 = vld [vmem:[#allocation8 + $0xf4] sm:$0xf0] }
 0x2c1   : > { %v1488_v21 = vsel %vm1221_vm1, %v4901_v17, 0.0  ;;  %v4620_v32 = vld [vmem:[#allocation8 + $0x64] sm:$0xf]  ;;  %v3948_v12 = vld [vmem:[#allocation8 + $0xa0] sm:$0xf] }
 0x2c2   : > { %1489 = vadd.xlane.f32.xlu0 %v1488_v21  ;;  %4902 = vpow2.f32 %v1422_v18  ;;  %v3926_v18 = vld [vmem:[#allocation8 + $0x78] sm:$0xf0]  ;;  %v3989_v21 = vor.u32 %v4639_v16, %v3988_v14  ;;  %1948 = vmatpush.bf16.msrb.mxu0 %v3925_v15  ;;  %v4629_v14 = vld [vmem:[#allocation8 + $0xa4] sm:$0xf0]  ;;  %v4612_v15 = vld [vmem:[#allocation8 + $0x24] sm:$0xf] }
 0x2c3   : > { %v3886_v16 = vld [vmem:[#allocation8 + $0x28] sm:$0xf0] }
 0x2c5   : > { %v1547_v22 = vpop.xlane.xlu0 %1546  ;;  %v1680_v31 = vpop.xlane.xlu2 %1679 }
 0x2c6   : > { %v1548_v23 = vsub.f32 %v1544_v36, %v1547_v22  ;;  %v1681_v33 = vsub.f32 %v1677_v59, %v1680_v31 }
 0x2c8   : > { %v1549_v24 = vmul.f32 1.442695, %v1548_v23  ;;  %v4903_v25 = vpop.eup %4902  ;;  %v1682_v35 = vmul.f32 1.442695, %v1681_v33  ;;  %v4638_v23 = vld [vmem:[#allocation8 + $0xf4] sm:$0xf] }
 0x2c9   : > { %v1424_v26 = vsel %vm1221_vm1, %v4903_v25, 0.0  ;;  %v3918_v33 = vld [vmem:[#allocation8 + $0x68] sm:$0xf0] }
 0x2ca   : > { %4904 = vpow2.f32 %v1549_v24  ;;  %1425 = vadd.xlane.f32.xlu0 %v1424_v26  ;;  %v3990_v24 = vld [vmem:[#allocation8 + $0xf8] sm:$0xf0] }
 0x2cb   : > { %4906 = vpow2.f32 %v1616_v34  ;;  %v3993_v26 = vor.u32 %v4638_v23, %v3990_v24  ;;  %v4636_v34 = vld [vmem:[#allocation8 + $0xe4] sm:$0xf]  ;;  %v3876_v24 = vld [vmem:[#allocation8 + $0x10] sm:$0xf] }
 0x2cc   : > { %4908 = vpow2.f32 %v1682_v35  ;;  %v3921_v35 = vor.u32 %v4620_v32, %v3918_v33  ;;  %v4626_v33 = vld [vmem:[#allocation8 + $0x94] sm:$0xf] }
 0x2d0   : > { %v4905_v27 = vpop.eup %4904 }
 0x2d1   : > { %v1551_v29 = vsel %vm1221_vm1, %v4905_v27, 0.0 }
 0x2d2   : > { %4873 = vrot.lane.b32.xlu1 %v4872_v28, %s5217_s20  ;;  %1429 = vrot.lane.b32.xlu2 %v5491_v19, %s5216_s17  ;;  %v4907_v19 = vpop.eup %4906  ;;  %v3980_v28 = vld [vmem:[#allocation8 + $0xe0] sm:$0xf] }
 0x2d3   : > { %1552 = vadd.xlane.f32.xlu0 %v1551_v29  ;;  %v4909_v37 = vpop.eup %4908  ;;  %v1618_v39 = vsel %vm1221_vm1, %v4907_v19, 0.0  ;;  %v4637_v29 = vld [vmem:[#allocation8 + $0xe4] sm:$0xf0] }
 0x2d4   : > { %v1684_v40 = vsel %vm1221_vm1, %v4909_v37, 0.0  ;;  %v3981_v31 = vor.u32 %v4637_v29, %v3980_v28  ;;  %v4627_v28 = vld [vmem:[#allocation8 + $0x94] sm:$0xf0]  ;;  %v4610_v29 = vld [vmem:[#allocation8 + $0x14] sm:$0xf] }
 0x2d8   : > { %v1364_v30 = vpop.permute.xlu0 %1363 }
 0x2d9   : > { %1384 = vmatpush.msra.mxu1 %v1364_v30 }
 0x2db   : > { %1511 = vmatpush.msrb.mxu1 %v5493_v20 }
 0x2e7   : > { %1689 = vrot.lane.b32.xlu0 %v5493_v20, %s5216_s17 }
 0x2ef   : > { %1623 = vrot.lane.b32.xlu0 %v5493_v20, %s5215_s25 }
 0x2fb   : > { %1619 = vadd.xlane.f32.xlu2 %v1618_v39  ;;  %v4619_v39 = vld [vmem:[#allocation8 + $0x54] sm:$0xf0] }
 0x2fc   : > { %1685 = vadd.xlane.f32.xlu1 %v1684_v40 }
 0x32c   : > { %v1293_v45 = vpop.xlane.xlu1 %1292 }
 0x32d   : > { %v1360_v41 = vpop.xlane.xlu2 %1359 }
 0x32e   : > { %4910 = vrcp.f32 %v1360_v41  ;;  %v3972_v41 = vld [vmem:[#allocation8 + $0xd0] sm:$0xf] }
 0x334   : > { %v4911_v42 = vpop.eup %4910 }
 0x335   : > { %v1362_v43 = vmul.f32 %v4911_v42, %v4897_v8  ;;  %v1490_v44 = vpop.xlane.xlu0 %1489  ;;  %v1430_v52 = vpop.permute.xlu2 %1429  ;;  %v4635_v42 = vld [vmem:[#allocation8 + $0xd4] sm:$0xf0] }
 0x336   : > { %4912 = vrcp.f32 %v1490_v44 }
 0x337   : > { %3850 = vmatmul.msk.f32.vlgmr.msra.gmra.mxu1 %vm1221_vm1, %v1362_v43  ;;  %4914 = vrcp.f32 %v1293_v45  ;;  %v4618_v43 = vld [vmem:[#allocation8 + $0x54] sm:$0xf]  ;;  %v3910_v45 = vld [vmem:[#allocation8 + $0x58] sm:$0xf0] }
 0x33c   : > { %v4913_v20 = vpop.eup %4912  ;;  %v5550_v3 = vpop.f32.mrf.mxu1 }
 0x33d   : > { %v1492_v46 = vmul.f32 %v4913_v20, %v4901_v17  ;;  %v1426_v47 = vpop.xlane.xlu0 %1425  ;;  %v4915_v48 = vpop.eup %4914  ;;  %v4622_v17 = vld [vmem:[#allocation8 + $0x74] sm:$0xf] }
 0x33e   : > { %4916 = vrcp.f32 %v1426_v47  ;;  %v1295_v51 = vmul.f32 %v4915_v48, %v5520_v7  ;;  %v3929_v22 = vor.u32 %v4622_v17, %v3926_v18  ;;  %v4634_v20 = vld [vmem:[#allocation8 + $0xd4] sm:$0xf]  ;;  %v3973_v47 = vor.u32 %v4635_v42, %v3972_v41  ;;  %v4625_v41 = vld [vmem:[#allocation8 + $0x84] sm:$0xf0]  ;;  %v4608_v42 = vld [vmem:[#allocation8 + $0x4] sm:$0xf] }
 0x33f   : > { %3856 = vmatmul.msk.f32.vlgmr.msrb.gmra.mxu1 %vm1221_vm1, %v1492_v46  ;;  %v3974_v46 = vld [vmem:[#allocation8 + $0xd8] sm:$0xf0]  ;;  %v3913_v48 = vor.u32 %v4618_v43, %v3910_v45  ;;  %v3949_v17 = vor.u32 %v4629_v14, %v3948_v12  ;;  %v3889_v18 = vor.u32 %v4612_v15, %v3886_v16  ;;  %v3870_v43 = vld [vmem:[#allocation8 + $0x8] sm:$0xf0]  ;;  %v4930_v12 = vld [vmem:[#allocation4] sm:$0xff] }
 0x340   : > { %1974 = vmatpush.bf16.msrb.mxu2 %v3929_v22  ;;  %v3950_v22 = vld [vmem:[#allocation8 + $0xa8] sm:$0xf0]  ;;  %v3873_v45 = vor.u32 %v4608_v42, %v3870_v43  ;;  %v4931_v14 = vld [vmem:[#allocation4 + $0x8] sm:$0xff] }
 0x344   : > { %v4874_v49 = vpop.permute.xlu1 %4873  ;;  %v4917_v55 = vpop.eup %4916  ;;  %1975 = vmatpush.bf16.msrb.mxu2 %v3921_v35 }
 0x345   : > { %v4875_v50 = vunpack.i.l.bf16 %v4874_v49  ;;  %v4876_v53 = vunpack.i.h.bf16 %v4874_v49  ;;  %v1428_v56 = vmul.f32 %v4917_v55, %v4903_v25  ;;  %v3916_v25 = vld [vmem:[#allocation8 + $0x60] sm:$0xf]  ;;  %v3902_v55 = vld [vmem:[#allocation8 + $0x48] sm:$0xf0] }
 0x346   : > { %v1553_v54 = vpop.xlane.xlu0 %1552  ;;  %v3900_v49 = vld [vmem:[#allocation8 + $0x40] sm:$0xf] }
 0x347   : > { %1318 = vmatpush.msrb.mxu3 %v4875_v50  ;;  %4918 = vrcp.f32 %v1553_v54  ;;  %v4617_v50 = vld [vmem:[#allocation8 + $0x44] sm:$0xf0]  ;;  %v4616_v54 = vld [vmem:[#allocation8 + $0x44] sm:$0xf] }
 0x348   : > { %3847 = vmatmul.msk.f32.vlgmr.msrb.gmra.mxu3 %vm1221_vm1, %v1295_v51  ;;  %v3964_v51 = vld [vmem:[#allocation8 + $0xc0] sm:$0xf]  ;;  %1976 = vmatpush.bf16.msrb.mxu2 %v3913_v48 }
 0x349   : > { %1450 = vmatpush.msra.mxu3 %v1430_v52  ;;  %v3977_v52 = vor.u32 %v4634_v20, %v3974_v46  ;;  %v4624_v20 = vld [vmem:[#allocation8 + $0x84] sm:$0xf]  ;;  %v3934_v46 = vld [vmem:[#allocation8 + $0x88] sm:$0xf0] }
 0x34b   : > { %1578 = vmatpush.msrb.mxu3 %v4876_v53  ;;  %v4633_v53 = vld [vmem:[#allocation8 + $0xc4] sm:$0xf0] }
 0x34d   : > { %v4919_v57 = vpop.eup %4918 }
 0x34e   : > { %v1555_v58 = vmul.f32 %v4919_v57, %v4905_v27  ;;  %v4621_v27 = vld [vmem:[#allocation8 + $0x64] sm:$0xf0]  ;;  %v3966_v57 = vld [vmem:[#allocation8 + $0xc8] sm:$0xf0] }
 0x34f   : > { %v3917_v30 = vor.u32 %v4621_v27, %v3916_v25  ;;  %v4611_v25 = vld [vmem:[#allocation8 + $0x14] sm:$0xf0] }
 0x350   : > { %3853 = vmatmul.msk.f32.vlgmr.msra.gmra.mxu3 %vm1221_vm1, %v1428_v56  ;;  %v4632_v56 = vld [vmem:[#allocation8 + $0xc4] sm:$0xf]  ;;  %v3877_v27 = vor.u32 %v4611_v25, %v3876_v24 }
 0x351   : > { %1949 = vmatpush.bf16.msrb.mxu0 %v3917_v30  ;;  %v3878_v30 = vld [vmem:[#allocation8 + $0x18] sm:$0xf0] }
 0x352   : > { %v3881_v32 = vor.u32 %v4610_v29, %v3878_v30 }
 0x358   : > { %3859 = vmatmul.msk.f32.vlgmr.msrb.gmra.mxu3 %vm1221_vm1, %v1555_v58  ;;  %v3901_v58 = vor.u32 %v4617_v50, %v3900_v49 }
 0x359   : > { %v1690_v36 = vpop.permute.xlu0 %1689 }
 0x35a   : > { %1710 = vmatpush.msra.mxu3 %v1690_v36  ;;  %v3965_v36 = vor.u32 %v4633_v53, %v3964_v51 }
 0x35c   : > { %1987 = vmatpush.bf16.msrb.mxu3 %v3993_v26  ;;  %v3940_v26 = vld [vmem:[#allocation8 + $0x90] sm:$0xf] }
 0x361   : > { %v1624_v38 = vpop.permute.xlu0 %1623 }
 0x362   : > { %1644 = vmatpush.msra.mxu1 %v1624_v38  ;;  %v3905_v38 = vor.u32 %v4616_v54, %v3902_v55 }
 0x364   : > { %1961 = vmatpush.bf16.msrb.mxu1 %v3989_v21  ;;  %1977 = vmatpush.bf16.msrb.mxu2 %v3905_v38  ;;  %v4628_v21 = vld [vmem:[#allocation8 + $0xa4] sm:$0xf] }
 0x365   : > { %v3953_v23 = vor.u32 %v4628_v21, %v3950_v22  ;;  %v5218_v21 = vmov 256.0  }
 0x368   : > { %1962 = vmatpush.bf16.msrb.mxu1 %v3981_v31  ;;  %v3941_v31 = vor.u32 %v4627_v28, %v3940_v26 }
 0x36c   : > { %1963 = vmatpush.bf16.msrb.mxu1 %v3973_v47  ;;  %v3937_v47 = vor.u32 %v4624_v20, %v3934_v46  ;;  %v2005_v20 = vld [vmem:[#allocation9 + $0x5] ss:$8 sm:$0x3] }
 0x36e   : > { %v1620_v59 = vpop.xlane.xlu2 %1619 }
 0x36f   : > { %4920 = vrcp.f32 %v1620_v59  ;;  %v1686_v60 = vpop.xlane.xlu1 %1685  ;;  %v3892_v59 = vld [vmem:[#allocation8 + $0x30] sm:$0xf] }
 0x370   : > { %4922 = vrcp.f32 %v1686_v60  ;;  %v4615_v60 = vld [vmem:[#allocation8 + $0x34] sm:$0xf0]  ;;  %1964 = vmatpush.bf16.msrb.mxu1 %v3965_v36 }
 0x371   : > { %4924 = vrcp.f32 %v5218_v21 }
 0x375   : > { %v4921_v61 = vpop.eup %4920 }
 0x376   : > { %v4923_v62 = vpop.eup %4922  ;;  %v1622_v63 = vmul.f32 %v4921_v61, %v4907_v19  ;;  %v3982_v19 = vld [vmem:[#allocation8 + $0xe8] sm:$0xf0]  ;;  %v3956_v61 = vld [vmem:[#allocation8 + $0xb0] sm:$0xf] }
 0x377   : > { %v1688_v0 = vmul.f32 %v4923_v62, %v4909_v37  ;;  %v3908_v37 = vld [vmem:[#allocation8 + $0x50] sm:$0xf]  ;;  %v3985_v40 = vor.u32 %v4636_v34, %v3982_v19  ;;  %v3969_v62 = vor.u32 %v4632_v56, %v3966_v57  ;;  %v3942_v34 = vld [vmem:[#allocation8 + $0x98] sm:$0xf0]  ;;  %v3868_v19 = vld [vmem:[#allocation8] sm:$0xf]  ;;  %v4925_v22 = vpop.eup %4924 }
 0x378   : > { %3862 = vmatmul.msk.f32.vlgmr.msra.gmra.mxu1 %vm1221_vm1, %v1622_v63  ;;  %v3909_v44 = vor.u32 %v4619_v39, %v3908_v37  ;;  %v4631_v63 = vld [vmem:[#allocation8 + $0xb4] sm:$0xf0]  ;;  %v3945_v35 = vor.u32 %v4626_v33, %v3942_v34  ;;  %v4609_v37 = vld [vmem:[#allocation8 + $0x4] sm:$0xf0]  ;;  %v3932_v39 = vld [vmem:[#allocation8 + $0x80] sm:$0xf]  ;;  %vm2014_vm4 = vweird.f32 %v4925_v22 }
 0x379   : > { %3865 = vmatmul.msk.f32.vlgmr.msra.gmra.mxu3 %vm1221_vm1, %v1688_v0  ;;  %v4614_v0 = vld [vmem:[#allocation8 + $0x34] sm:$0xf] }
 0x37a   : > { %1988 = vmatpush.bf16.msrb.mxu3 %v3985_v40  ;;  %1950 = vmatpush.bf16.msrb.mxu0 %v3909_v44  ;;  %v3869_v40 = vor.u32 %v4609_v37, %v3868_v19  ;;  %v3933_v44 = vor.u32 %v4625_v41, %v3932_v39 }
 0x37e   : > { %1989 = vmatpush.bf16.msrb.mxu3 %v3977_v52  ;;  %1951 = vmatpush.bf16.msrb.mxu0 %v3901_v58 }
 0x382   : > { %1990 = vmatpush.bf16.msrb.mxu3 %v3969_v62 }
 0x3b4   : > { %v1386_v6 = vpop.f32.mrf.mxu1 }
 0x3bc   : > { %v5553_v7 = vpop.f32.mrf.mxu1 }
 0x3cb   : > { %v1320_v1 = vpop.f32.mrf.mxu3 }
 0x3d3   : > { %v1452_v2 = vpop.f32.mrf.mxu3 }
 0x3db   : > { %v1580_v4 = vpop.f32.mrf.mxu3 }
 0x3dc   : > { %v4882_v5 = vpack.i.bf16 %v1580_v4, %v1320_v1  ;;  %v3894_v1 = vld [vmem:[#allocation8 + $0x38] sm:$0xf0] }
 0x3dd   : > { %v3958_v4 = vld [vmem:[#allocation8 + $0xb8] sm:$0xf0] }
 0x3de   : > { %4883 = vrot.lane.b32.xlu0 %v4882_v5, %s5216_s17  ;;  %v3893_v5 = vor.u32 %v4615_v60, %v3892_v59 }
 0x3e0   : > { %1952 = vmatpush.bf16.msrb.mxu0 %v3893_v5 }
 0x3f5   : > { %v1646_v8 = vpop.f32.mrf.mxu1 }
 0x3f6   : > { %v4877_v9 = vpack.i.bf16 %v1646_v8, %v1386_v6  ;;  %v3957_v6 = vor.u32 %v4631_v63, %v3956_v61  ;;  %v3897_v8 = vor.u32 %v4614_v0, %v3894_v1  ;;  %v1782_v63 = vld [vmem:[#allocation9 + $0x3] ss:$8 sm:$0x3] }
 0x3f7   : > { %v1784_v0 = vperm.slane %v1782_v63, 0 }
 0x3f8   : > { %4878 = vrot.lane.b32.xlu1 %v4877_v9, %s5215_s25  ;;  %1965 = vmatpush.bf16.msrb.mxu1 %v3957_v6 }
 0x3f9   : > { %1978 = vmatpush.bf16.msrb.mxu2 %v3897_v8 }
 0x3fc   : > { %v1712_v10 = vpop.f32.mrf.mxu3  ;;  %1966 = vmatpush.bf16.msrb.mxu1 %v3949_v17 }
 0x3fd   : > { %v4887_v11 = vpack.i.bf16 %v1712_v10, %v1452_v2  ;;  %v4630_v2 = vld [vmem:[#allocation8 + $0xb4] sm:$0xf]  ;;  %v3884_v10 = vld [vmem:[#allocation8 + $0x20] sm:$0xf]  ;;  %1979 = vmatpush.bf16.msrb.mxu2 %v3889_v18 }
 0x3fe   : > { %v3961_v9 = vor.u32 %v4630_v2, %v3958_v4  ;;  %v1785_v4 = vperm.slane %v1782_v63, 1  ;;  %v5219_v63 = vmov 0.0  }
 0x3ff   : > { %4888 = vrot.lane.b32.xlu0 %v4887_v11, %s5217_s20  ;;  %v4613_v11 = vld [vmem:[#allocation8 + $0x24] sm:$0xf0]  ;;  %2097 = vst [vmem:[#allocation3 + $0x8] sm:$0xff] %v5219_v63 }
 0x400   : > { %1991 = vmatpush.bf16.msrb.mxu3 %v3961_v9  ;;  %v3885_v13 = vor.u32 %v4613_v11, %v3884_v10  ;;  %1967 = vmatpush.bf16.msrb.mxu1 %v3941_v31  ;;  %2098 = vst [vmem:[#allocation3] sm:$0xff] %v5219_v63 }
 0x401   : > { %1980 = vmatpush.bf16.msrb.mxu2 %v3881_v32 }
 0x402   : > { %1953 = vmatpush.bf16.msrb.mxu0 %v3885_v13 }
 0x404   : > { %1992 = vmatpush.bf16.msrb.mxu3 %v3953_v23  ;;  %1968 = vmatpush.bf16.msrb.mxu1 %v3933_v44  ;;  %v2010_v23 = vmul.f32 256.0, %v4925_v22  ;;  %v2003_v44 = vld [vmem:[#allocation9 + $0x4] ss:$8 sm:$0x3] }
 0x405   : > { %1981 = vmatpush.bf16.msrb.mxu2 %v3873_v45  ;;  %v2039_v46 = vperm.slane %v2003_v44, 0 }
 0x406   : > { %1954 = vmatpush.bf16.msrb.mxu0 %v3877_v27  ;;  %v2011_v24 = vsub.f32 1.0, %v2010_v23 }
 0x408   : > { %1993 = vmatpush.bf16.msrb.mxu3 %v3945_v35  ;;  %v2012_v25 = vmul.f32 %v4925_v22, %v2011_v24 }
 0x40a   : > { %1955 = vmatpush.bf16.msrb.mxu0 %v3869_v40  ;;  %v2013_v26 = vadd.f32 %v4925_v22, %v2012_v25 }
 0x40c   : > { %1994 = vmatpush.bf16.msrb.mxu3 %v3937_v47  ;;  %v2015_v27 = vsel %vm2014_vm4, %v4925_v22, %v2013_v26  ;;  %v2040_v47 = vperm.slane %v2003_v44, 1 }
 0x450   : > { %v4884_v48 = vpop.permute.xlu0 %4883 }
 0x451   : > { %v4886_v50 = vunpack.i.h.bf16 %v4884_v48  ;;  %v4885_v51 = vunpack.i.l.bf16 %v4884_v48 }
 0x453   : > { %v1744_v55 = vsel %vm1193_vm0, %v5553_v7, %v4886_v50  ;;  %v1739_v56 = vsel %vm1193_vm0, %v5550_v3, %v4885_v51  ;;  %v2046_v51 = vperm.slane %v2005_v20, 0 }
 0x46a   : > { %v4879_v49 = vpop.permute.xlu1 %4878 }
 0x46b   : > { %v4881_v52 = vunpack.i.h.bf16 %v4879_v49  ;;  %v4880_v53 = vunpack.i.l.bf16 %v4879_v49 }
 0x46d   : > { %v1741_v36 = vsel %vm1740_vm2, %v1739_v56, %v4880_v53  ;;  %v1745_v38 = vsel %vm1740_vm2, %v1744_v55, %v4881_v52  ;;  %v2047_v52 = vperm.slane %v2005_v20, 1 }
 0x471   : > { %v4889_v54 = vpop.permute.xlu0 %4888 }
 0x472   : > { %v4891_v57 = vunpack.i.h.bf16 %v4889_v54  ;;  %v4890_v58 = vunpack.i.l.bf16 %v4889_v54 }
 0x474   : > { %v1746_v59 = vsel %vm1742_vm3, %v1745_v38, %v4891_v57  ;;  %v1743_v60 = vsel %vm1742_vm3, %v1741_v36, %v4890_v58 }
 0x475   : > { %v1748_v61 = vpack.c.bf16 %v1746_v59, %v1746_v59  ;;  %v1747_v62 = vpack.c.bf16 %v1743_v60, %v1743_v60 }
 0x477   : > { %1956 = vmatmul.bf16.vlgmr.msrb.gmra.mxu0 %v1747_v62  ;;  %1969 = vmatmul.bf16.vlgmr.msrb.gmra.mxu1 %v1748_v61 }
 0x478   : > { %1982 = vmatmul.bf16.vlgmr.msrb.gmra.mxu2 %v1747_v62  ;;  %1995 = vmatmul.bf16.vlgmr.msrb.gmra.mxu3 %v1748_v61 }
 0x4f4   : > { %v1957_v1 = vpop.f32.mrf.mxu0  ;;  %v1970_v2 = vpop.f32.mrf.mxu1 }
 0x4f5   : > { %v1958_v7 = vadd.f32 %v1957_v1, %v1784_v0 }
 0x4f7   : > { %v1971_v6 = vadd.f32 %v1970_v2, %v1958_v7 }
 0x4f9   : > { %v2000_v13 = vadd.f32 %v4930_v12, %v1971_v6  ;;  %v2053_v6 = vld [vmem:[#allocation9 + $0x6] ss:$8 sm:$0x3] }
 0x4fa   : > { %v2083_v12 = vperm.slane %v2053_v6, 1 }
 0x4fb   : > { %v1983_v5 = vpop.f32.mrf.mxu2  ;;  %v1996_v3 = vpop.f32.mrf.mxu3 }
 0x4fc   : > { %v1984_v8 = vadd.f32 %v1983_v5, %v1785_v4  ;;  %v1959_v9 = vpop.f32.mrf.mxu0  ;;  %v1972_v10 = vpop.f32.mrf.mxu1 }
 0x4fd   : > { %v2055_v9 = vld [vmem:[#allocation9 + $0x7] ss:$8 sm:$0x3] }
 0x4fe   : > { %v1997_v11 = vadd.f32 %v1996_v3, %v1984_v8 }
 0x500   : > { %v2001_v15 = vadd.f32 %v4931_v14, %v1997_v11  ;;  %v2082_v11 = vperm.slane %v2053_v6, 0  ;;  %v2089_v14 = vperm.slane %v2055_v9, 0 }
 0x502   : > { %v2006_v16 = vadd.f32 %v2001_v15, %v2000_v13 }
 0x503   : > { %v1985_v17 = vpop.f32.mrf.mxu2  ;;  %v1998_v18 = vpop.f32.mrf.mxu3 }
 0x504   : > { %2007 = vadd.xlane.f32.xlu0 %v2006_v16 }
 0x577   : > { %v2008_v28 = vpop.xlane.xlu0 %2007 }
 0x578   : > { %v2016_v29 = vmul.f32 %v2015_v27, %v2008_v28 }
 0x57a   : > { %v2017_v30 = vsub.f32 %v2000_v13, %v2016_v29  ;;  %v2018_v31 = vsub.f32 %v2001_v15, %v2016_v29  ;;  %v2090_v15 = vperm.slane %v2055_v9, 1 }
 0x57c   : > { %v2019_v32 = vmul.f32 %v2017_v30, %v2017_v30  ;;  %v2020_v33 = vmul.f32 %v2018_v31, %v2018_v31 }
 0x57e   : > { %v2021_v34 = vadd.f32 %v2020_v33, %v2019_v32 }
 0x580   : > { %2022 = vadd.xlane.f32.xlu2 %v2021_v34 }
 0x5f3   : > { %v2023_v35 = vpop.xlane.xlu2 %2022 }
 0x5f4   : > { %v2024_v19 = vmul.f32 %v2023_v35, %v2015_v27 }
 0x5f6   : > { %v2025_v37 = vadd.f32 1e-05, %v2024_v19 }
 0x5f8   : > { %4926 = vrsqrt.f32 %v2025_v37  ;;  %vm2032_vm6 = vweird.f32 %v2025_v37 }
 0x5fe   : > { %v4927_v39 = vpop.eup %4926 }
 0x5ff   : > { %v2027_v40 = vmul.f32 %v4927_v39, %v2025_v37  ;;  %vm2033_vm5 = vweird.f32 %v4927_v39 }
 0x600   : > { %vm2034_vm7 = vmor %vm2032_vm6, %vm2033_vm5 }
 0x601   : > { %v2028_v41 = vmul.f32 %v4927_v39, %v2027_v40 }
 0x603   : > { %v2029_v42 = vmul.f32 0.5, %v2028_v41 }
 0x605   : > { %v2030_v43 = vsub.f32 1.5, %v2029_v42 }
 0x607   : > { %v2031_v45 = vmul.f32 %v4927_v39, %v2030_v43 }
 0x609   : > { %v2035_v48 = vsel %vm2034_vm7, %v4927_v39, %v2031_v45 }
 0x60a   : > { %v2036_v49 = vmul.f32 %v2035_v48, %v2017_v30  ;;  %v2037_v50 = vmul.f32 %v2035_v48, %v2018_v31 }
 0x60c   : > { %v2043_v53 = vmul.f32 %v2039_v46, %v2036_v49  ;;  %v2044_v54 = vmul.f32 %v2040_v47, %v2037_v50 }
 0x60e   : > { %v2050_v55 = vadd.f32 %v2046_v51, %v2043_v53  ;;  %v2051_v56 = vadd.f32 %v2047_v52, %v2044_v54 }
 0x610   : > { %v2056_v57 = vadd.f32 %v2051_v56, %v2050_v55 }
 0x612   : > { %2057 = vadd.xlane.f32.xlu2 %v2056_v57 }
 0x685   : > { %v2058_v58 = vpop.xlane.xlu2 %2057 }
 0x686   : > { %v2059_v36 = vmul.f32 %v2058_v58, %v2015_v27 }
 0x688   : > { %v2060_v38 = vsub.f32 %v2050_v55, %v2059_v36  ;;  %v2061_v59 = vsub.f32 %v2051_v56, %v2059_v36 }
 0x68a   : > { %v2062_v60 = vmul.f32 %v2060_v38, %v2060_v38  ;;  %v2063_v61 = vmul.f32 %v2061_v59, %v2061_v59 }
 0x68c   : > { %v2064_v62 = vadd.f32 %v2063_v61, %v2062_v60 }
 0x68e   : > { %2065 = vadd.xlane.f32.xlu1 %v2064_v62 }
 0x701   : > { %v2066_v0 = vpop.xlane.xlu1 %2065 }
 0x702   : > { %v2067_v1 = vmul.f32 %v2066_v0, %v2015_v27 }
 0x704   : > { %v2068_v2 = vadd.f32 1e-05, %v2067_v1 }
 0x706   : > { %4928 = vrsqrt.f32 %v2068_v2  ;;  %vm2075_vm9 = vweird.f32 %v2068_v2 }
 0x70c   : > { %v4929_v7 = vpop.eup %4928 }
 0x70d   : > { %v2070_v4 = vmul.f32 %v4929_v7, %v2068_v2  ;;  %vm2076_vm8 = vweird.f32 %v4929_v7 }
 0x70e   : > { %vm2077_vm10 = vmor %vm2075_vm9, %vm2076_vm8 }
 0x70f   : > { %v2071_v5 = vmul.f32 %v4929_v7, %v2070_v4 }
 0x711   : > { %v2072_v3 = vmul.f32 0.5, %v2071_v5 }
 0x713   : > { %v2073_v8 = vsub.f32 1.5, %v2072_v3 }
 0x715   : > { %v2074_v10 = vmul.f32 %v4929_v7, %v2073_v8 }
 0x717   : > { %v2078_v13 = vsel %vm2077_vm10, %v4929_v7, %v2074_v10 }
 0x718   : > { %v2079_v16 = vmul.f32 %v2078_v13, %v2060_v38  ;;  %v2080_v17 = vmul.f32 %v2078_v13, %v2061_v59 }
 0x71a   : > { %v2086_v18 = vmul.f32 %v2082_v11, %v2079_v16  ;;  %v2087_v21 = vmul.f32 %v2083_v12, %v2080_v17 }
 0x71c   : > { %v2093_v22 = vadd.f32 %v2089_v14, %v2086_v18  ;;  %v2094_v23 = vadd.f32 %v2090_v15, %v2087_v21 }
 0x71e   : > { %2095 = vst [vmem:[#allocation2] sm:$0xff] %v2093_v22 }
 0x71f   : > { %2096 = vst [vmem:[#allocation2 + $0x8] sm:$0xff] %v2094_v23 }
 0x720 PF: > { %v4108_v24 = vld [vmem:[%s5438_s13 + $0xe0] sm:$0xf]  ;;  %v4670_v25 = vld [vmem:[%s5438_s13 + $0xec] sm:$0xf0]  ;;  %v4668_v29 = vld [vmem:[%s5438_s13 + $0xe4] sm:$0xf] }
 0x721   : > { %v4236_v26 = vld [vmem:[%s5438_s13 + $0x1e0] sm:$0xf]  ;;  %v4109_v27 = vor.u32 %v4670_v25, %v4108_v24  ;;  %v4702_v28 = vld [vmem:[%s5438_s13 + $0x1ec] sm:$0xf0]  ;;  %v4110_v30 = vld [vmem:[%s5438_s13 + $0xf0] sm:$0xf0] }
 0x722   : > { %v4237_v31 = vor.u32 %v4702_v28, %v4236_v26  ;;  %v4113_v32 = vor.u32 %v4668_v29, %v4110_v30  ;;  %v4700_v33 = vld [vmem:[%s5438_s13 + $0x1e4] sm:$0xf]  ;;  %v4238_v34 = vld [vmem:[%s5438_s13 + $0x1f0] sm:$0xf0]  ;;  %v4092_v35 = vld [vmem:[%s5438_s13 + $0xc0] sm:$0xf] }
 0x723   : > { %2497 = vmatpush.bf16.msra.mxu0 %v4109_v27  ;;  %v4241_v19 = vor.u32 %v4700_v33, %v4238_v34  ;;  %v4666_v37 = vld [vmem:[%s5438_s13 + $0xcc] sm:$0xf0]  ;;  %v4220_v39 = vld [vmem:[%s5438_s13 + $0x1c0] sm:$0xf]  ;;  %v4664_v43 = vld [vmem:[%s5438_s13 + $0xc4] sm:$0xf] }
 0x724   : > { %v4698_v40 = vld [vmem:[%s5438_s13 + $0x1cc] sm:$0xf0]  ;;  %2510 = vmatpush.bf16.msra.mxu1 %v4237_v31  ;;  %2523 = vmatpush.bf16.msra.mxu2 %v4113_v32  ;;  %v4093_v41 = vor.u32 %v4666_v37, %v4092_v35  ;;  %v4094_v44 = vld [vmem:[%s5438_s13 + $0xd0] sm:$0xf0]  ;;  %v4696_v45 = vld [vmem:[%s5438_s13 + $0x1c4] sm:$0xf] }
 0x725   : > { %v4221_v42 = vor.u32 %v4698_v40, %v4220_v39  ;;  %2536 = vmatpush.bf16.msra.mxu3 %v4241_v19  ;;  %v4097_v20 = vor.u32 %v4664_v43, %v4094_v44  ;;  %v4222_v46 = vld [vmem:[%s5438_s13 + $0x1d0] sm:$0xf0]  ;;  %v4076_v47 = vld [vmem:[%s5438_s13 + $0xa0] sm:$0xf]  ;;  %v4662_v48 = vld [vmem:[%s5438_s13 + $0xac] sm:$0xf0] }
 0x726   : > { %v4225_v49 = vor.u32 %v4696_v45, %v4222_v46  ;;  %v4204_v50 = vld [vmem:[%s5438_s13 + $0x1a0] sm:$0xf]  ;;  %v4694_v51 = vld [vmem:[%s5438_s13 + $0x1ac] sm:$0xf0]  ;;  %v4660_v52 = vld [vmem:[%s5438_s13 + $0xa4] sm:$0xf]  ;;  %v4077_v53 = vor.u32 %v4662_v48, %v4076_v47 }
 0x727   : > { %2498 = vmatpush.bf16.msra.mxu0 %v4093_v41  ;;  %v4078_v54 = vld [vmem:[%s5438_s13 + $0xb0] sm:$0xf0]  ;;  %v4692_v55 = vld [vmem:[%s5438_s13 + $0x1a4] sm:$0xf]  ;;  %v4205_v57 = vor.u32 %v4694_v51, %v4204_v50  ;;  %v4060_v36 = vld [vmem:[%s5438_s13 + $0x80] sm:$0xf] }
 0x728   : > { %v4206_v56 = vld [vmem:[%s5438_s13 + $0x1b0] sm:$0xf0]  ;;  %2511 = vmatpush.bf16.msra.mxu1 %v4221_v42  ;;  %2524 = vmatpush.bf16.msra.mxu2 %v4097_v20  ;;  %v4081_v58 = vor.u32 %v4660_v52, %v4078_v54  ;;  %v4658_v38 = vld [vmem:[%s5438_s13 + $0x8c] sm:$0xf0]  ;;  %v4188_v59 = vld [vmem:[%s5438_s13 + $0x180] sm:$0xf] }
 0x729   : > { %2537 = vmatpush.bf16.msra.mxu3 %v4225_v49  ;;  %v4209_v60 = vor.u32 %v4692_v55, %v4206_v56  ;;  %v4690_v61 = vld [vmem:[%s5438_s13 + $0x18c] sm:$0xf0]  ;;  %v4656_v62 = vld [vmem:[%s5438_s13 + $0x84] sm:$0xf]  ;;  %v4062_v63 = vld [vmem:[%s5438_s13 + $0x90] sm:$0xf0]  ;;  %v4061_v2 = vor.u32 %v4658_v38, %v4060_v36 }
 0x72a   : > { %v4688_v0 = vld [vmem:[%s5438_s13 + $0x184] sm:$0xf]  ;;  %v4190_v1 = vld [vmem:[%s5438_s13 + $0x190] sm:$0xf0]  ;;  %v4189_v7 = vor.u32 %v4690_v61, %v4188_v59  ;;  %v4065_v4 = vor.u32 %v4656_v62, %v4062_v63  ;;  %v4044_v5 = vld [vmem:[%s5438_s13 + $0x60] sm:$0xf] }
 0x72b   : > { %2499 = vmatpush.bf16.msra.mxu0 %v4077_v53  ;;  %v4654_v3 = vld [vmem:[%s5438_s13 + $0x6c] sm:$0xf0]  ;;  %v4172_v6 = vld [vmem:[%s5438_s13 + $0x160] sm:$0xf]  ;;  %v4193_v8 = vor.u32 %v4688_v0, %v4190_v1  ;;  %v4652_v10 = vld [vmem:[%s5438_s13 + $0x64] sm:$0xf] }
 0x72c   : > { %2512 = vmatpush.bf16.msra.mxu1 %v4205_v57  ;;  %2525 = vmatpush.bf16.msra.mxu2 %v4081_v58  ;;  %v4686_v9 = vld [vmem:[%s5438_s13 + $0x16c] sm:$0xf0]  ;;  %v4046_v11 = vld [vmem:[%s5438_s13 + $0x70] sm:$0xf0]  ;;  %v4684_v12 = vld [vmem:[%s5438_s13 + $0x164] sm:$0xf]  ;;  %v4045_v14 = vor.u32 %v4654_v3, %v4044_v5 }
 0x72d   : > { %2538 = vmatpush.bf16.msra.mxu3 %v4209_v60  ;;  %v4174_v13 = vld [vmem:[%s5438_s13 + $0x170] sm:$0xf0]  ;;  %v4173_v15 = vor.u32 %v4686_v9, %v4172_v6  ;;  %v4049_v16 = vor.u32 %v4652_v10, %v4046_v11  ;;  %v4028_v17 = vld [vmem:[%s5438_s13 + $0x40] sm:$0xf]  ;;  %v4650_v18 = vld [vmem:[%s5438_s13 + $0x4c] sm:$0xf0] }
 0x72e   : > { %v4156_v21 = vld [vmem:[%s5438_s13 + $0x140] sm:$0xf]  ;;  %v4177_v22 = vor.u32 %v4684_v12, %v4174_v13  ;;  %v4682_v23 = vld [vmem:[%s5438_s13 + $0x14c] sm:$0xf0]  ;;  %v4648_v24 = vld [vmem:[%s5438_s13 + $0x44] sm:$0xf]  ;;  %v4029_v28 = vor.u32 %v4650_v18, %v4028_v17 }
 0x72f   : > { %2500 = vmatpush.bf16.msra.mxu0 %v4061_v2  ;;  %v4030_v25 = vld [vmem:[%s5438_s13 + $0x50] sm:$0xf0]  ;;  %v4680_v26 = vld [vmem:[%s5438_s13 + $0x144] sm:$0xf]  ;;  %v4157_v29 = vor.u32 %v4682_v23, %v4156_v21  ;;  %v4012_v31 = vld [vmem:[%s5438_s13 + $0x20] sm:$0xf] }
 0x730   : > { %2513 = vmatpush.bf16.msra.mxu1 %v4189_v7  ;;  %2526 = vmatpush.bf16.msra.mxu2 %v4065_v4  ;;  %v4158_v27 = vld [vmem:[%s5438_s13 + $0x150] sm:$0xf0]  ;;  %v4033_v30 = vor.u32 %v4648_v24, %v4030_v25  ;;  %v4646_v32 = vld [vmem:[%s5438_s13 + $0x2c] sm:$0xf0]  ;;  %v4140_v33 = vld [vmem:[%s5438_s13 + $0x120] sm:$0xf] }
 0x731   : > { %2539 = vmatpush.bf16.msra.mxu3 %v4193_v8  ;;  %v4161_v34 = vor.u32 %v4680_v26, %v4158_v27  ;;  %v4678_v35 = vld [vmem:[%s5438_s13 + $0x12c] sm:$0xf0]  ;;  %v4644_v19 = vld [vmem:[%s5438_s13 + $0x24] sm:$0xf]  ;;  %v4014_v37 = vld [vmem:[%s5438_s13 + $0x30] sm:$0xf0]  ;;  %v4013_v41 = vor.u32 %v4646_v32, %v4012_v31 }
 0x732   : > { %v4676_v39 = vld [vmem:[%s5438_s13 + $0x124] sm:$0xf]  ;;  %v4142_v40 = vld [vmem:[%s5438_s13 + $0x130] sm:$0xf0]  ;;  %v3996_v42 = vld [vmem:[%s5438_s13] sm:$0xf]  ;;  %v4141_v44 = vor.u32 %v4678_v35, %v4140_v33  ;;  %v4017_v45 = vor.u32 %v4644_v19, %v4014_v37 }
 0x733   : > { %2501 = vmatpush.bf16.msra.mxu0 %v4045_v14  ;;  %v4642_v43 = vld [vmem:[%s5438_s13 + $0xc] sm:$0xf0]  ;;  %v4124_v20 = vld [vmem:[%s5438_s13 + $0x100] sm:$0xf]  ;;  %v4640_v47 = vld [vmem:[%s5438_s13 + $0x4] sm:$0xf]  ;;  %v4145_v48 = vor.u32 %v4676_v39, %v4142_v40 }
 0x734   : > { %2514 = vmatpush.bf16.msra.mxu1 %v4173_v15  ;;  %2527 = vmatpush.bf16.msra.mxu2 %v4049_v16  ;;  %v4674_v46 = vld [vmem:[%s5438_s13 + $0x10c] sm:$0xf0]  ;;  %v3998_v49 = vld [vmem:[%s5438_s13 + $0x10] sm:$0xf0]  ;;  %v4672_v50 = vld [vmem:[%s5438_s13 + $0x104] sm:$0xf]  ;;  %v3997_v55 = vor.u32 %v4642_v43, %v3996_v42 }
 0x735   : > { %2540 = vmatpush.bf16.msra.mxu3 %v4177_v22  ;;  %v4126_v51 = vld [vmem:[%s5438_s13 + $0x110] sm:$0xf0]  ;;  %v4116_v52 = vld [vmem:[%s5438_s13 + $0xe8] sm:$0xf]  ;;  %v4671_v53 = vld [vmem:[%s5438_s13 + $0xf4] sm:$0xf0]  ;;  %v4125_v36 = vor.u32 %v4674_v46, %v4124_v20  ;;  %v4001_v38 = vor.u32 %v4640_v47, %v3998_v49 }
 0x736   : > { %v4244_v54 = vld [vmem:[%s5438_s13 + $0x1e8] sm:$0xf]  ;;  %v4703_v56 = vld [vmem:[%s5438_s13 + $0x1f4] sm:$0xf0]  ;;  %v4669_v57 = vld [vmem:[%s5438_s13 + $0xec] sm:$0xf]  ;;  %v4129_v62 = vor.u32 %v4672_v50, %v4126_v51  ;;  %v4117_v63 = vor.u32 %v4671_v53, %v4116_v52 }
 0x737   : > { %2502 = vmatpush.bf16.msra.mxu0 %v4029_v28  ;;  %v4118_v58 = vld [vmem:[%s5438_s13 + $0xf8] sm:$0xf0]  ;;  %v4701_v59 = vld [vmem:[%s5438_s13 + $0x1ec] sm:$0xf]  ;;  %v2099_v61 = vld [vmem:[#allocation2] sm:$0xff]  ;;  %v4245_v1 = vor.u32 %v4703_v56, %v4244_v54  ;;  %p4506_p5 = scmp.ne.s32.totalorder %s5281_s28, 3 }
 0x738   : > { %2515 = vmatpush.bf16.msra.mxu1 %v4157_v29  ;;  %2528 = vmatpush.bf16.msra.mxu2 %v4033_v30  ;;  %v4246_v60 = vld [vmem:[%s5438_s13 + $0x1f8] sm:$0xf0]  ;;  %v4121_v2 = vor.u32 %v4669_v57, %v4118_v58  ;;  %v4100_v7 = vld [vmem:[%s5438_s13 + $0xc8] sm:$0xf]  ;;  %v4667_v4 = vld [vmem:[%s5438_s13 + $0xd4] sm:$0xf0]  ;;  %v5636_v6 = vpack.c.bf16 %v2099_v61, %v2099_v61 }
 0x739   : > { %2541 = vmatpush.bf16.msra.mxu3 %v4161_v34  ;;  %v2100_v0 = vld [vmem:[#allocation2 + $0x8] sm:$0xff]  ;;  %v4228_v5 = vld [vmem:[%s5438_s13 + $0x1c8] sm:$0xf]  ;;  %v4249_v3 = vor.u32 %v4701_v59, %v4246_v60  ;;  %v4665_v9 = vld [vmem:[%s5438_s13 + $0xcc] sm:$0xf]  ;;  %v4101_v14 = vor.u32 %v4667_v4, %v4100_v7  ;;  %s5890_s24 = sld [smem:[#allocation25_spill]] (!%p4506_p5) }
 0x73a   : > { %v4699_v8 = vld [vmem:[%s5438_s13 + $0x1d4] sm:$0xf0]  ;;  %v4102_v10 = vld [vmem:[%s5438_s13 + $0xd8] sm:$0xf0]  ;;  %v5641_v11 = vpack.c.bf16 %v2100_v0, %v2100_v0  ;;  %v4697_v12 = vld [vmem:[%s5438_s13 + $0x1cc] sm:$0xf] }
 0x73b   : > { %2503 = vmatpush.bf16.msra.mxu0 %v4013_v41  ;;  %v4230_v13 = vld [vmem:[%s5438_s13 + $0x1d8] sm:$0xf0]  ;;  %v4229_v15 = vor.u32 %v4699_v8, %v4228_v5  ;;  %v4105_v16 = vor.u32 %v4665_v9, %v4102_v10  ;;  %v4084_v17 = vld [vmem:[%s5438_s13 + $0xa8] sm:$0xf]  ;;  %v4663_v18 = vld [vmem:[%s5438_s13 + $0xb4] sm:$0xf0] }
 0x73c   : > { %2516 = vmatpush.bf16.msra.mxu1 %v4141_v44  ;;  %2529 = vmatpush.bf16.msra.mxu2 %v4017_v45  ;;  %v4212_v21 = vld [vmem:[%s5438_s13 + $0x1a8] sm:$0xf]  ;;  %v4233_v22 = vor.u32 %v4697_v12, %v4230_v13  ;;  %v4695_v23 = vld [vmem:[%s5438_s13 + $0x1b4] sm:$0xf0]  ;;  %v4661_v24 = vld [vmem:[%s5438_s13 + $0xac] sm:$0xf]  ;;  %v4085_v28 = vor.u32 %v4663_v18, %v4084_v17 }
 0x73d   : > { %2542 = vmatpush.bf16.msra.mxu3 %v4145_v48  ;;  %v4086_v25 = vld [vmem:[%s5438_s13 + $0xb8] sm:$0xf0]  ;;  %v4693_v26 = vld [vmem:[%s5438_s13 + $0x1ac] sm:$0xf]  ;;  %v4213_v29 = vor.u32 %v4695_v23, %v4212_v21  ;;  %v4068_v31 = vld [vmem:[%s5438_s13 + $0x88] sm:$0xf] }
 0x73e   : > { %v4214_v27 = vld [vmem:[%s5438_s13 + $0x1b8] sm:$0xf0]  ;;  %v4089_v30 = vor.u32 %v4661_v24, %v4086_v25  ;;  %v4659_v32 = vld [vmem:[%s5438_s13 + $0x94] sm:$0xf0]  ;;  %v4196_v33 = vld [vmem:[%s5438_s13 + $0x188] sm:$0xf] }
 0x73f   : > { %2504 = vmatpush.bf16.msra.mxu0 %v3997_v55  ;;  %v4217_v34 = vor.u32 %v4693_v26, %v4214_v27  ;;  %v4691_v35 = vld [vmem:[%s5438_s13 + $0x194] sm:$0xf0]  ;;  %v4657_v19 = vld [vmem:[%s5438_s13 + $0x8c] sm:$0xf]  ;;  %v4070_v37 = vld [vmem:[%s5438_s13 + $0x98] sm:$0xf0]  ;;  %v4069_v41 = vor.u32 %v4659_v32, %v4068_v31 }
 0x740   : > { %2517 = vmatpush.bf16.msra.mxu1 %v4125_v36  ;;  %2530 = vmatpush.bf16.msra.mxu2 %v4001_v38  ;;  %v4689_v39 = vld [vmem:[%s5438_s13 + $0x18c] sm:$0xf]  ;;  %v4198_v40 = vld [vmem:[%s5438_s13 + $0x198] sm:$0xf0]  ;;  %v4197_v42 = vor.u32 %v4691_v35, %v4196_v33  ;;  %v4073_v43 = vor.u32 %v4657_v19, %v4070_v37  ;;  %v4052_v44 = vld [vmem:[%s5438_s13 + $0x68] sm:$0xf] }
 0x741   : > { %2543 = vmatpush.bf16.msra.mxu3 %v4129_v62  ;;  %v4655_v45 = vld [vmem:[%s5438_s13 + $0x74] sm:$0xf0]  ;;  %v4180_v20 = vld [vmem:[%s5438_s13 + $0x168] sm:$0xf]  ;;  %v4201_v46 = vor.u32 %v4689_v39, %v4198_v40  ;;  %v4653_v48 = vld [vmem:[%s5438_s13 + $0x6c] sm:$0xf] }
 0x742   : > { %2505 = vmatmul.bf16.vlgmr.msra.gmra.mxu0 %v5636_v6  ;;  %v4687_v47 = vld [vmem:[%s5438_s13 + $0x174] sm:$0xf0]  ;;  %v4054_v49 = vld [vmem:[%s5438_s13 + $0x78] sm:$0xf0]  ;;  %v4685_v50 = vld [vmem:[%s5438_s13 + $0x16c] sm:$0xf]  ;;  %v4053_v52 = vor.u32 %v4655_v45, %v4052_v44 }
 0x743   : > { %2549 = vmatpush.bf16.msrb.mxu0 %v4117_v63  ;;  %2531 = vmatmul.bf16.vlgmr.msra.gmra.mxu2 %v5636_v6  ;;  %v4182_v51 = vld [vmem:[%s5438_s13 + $0x178] sm:$0xf0]  ;;  %v4181_v53 = vor.u32 %v4687_v47, %v4180_v20  ;;  %v4057_v54 = vor.u32 %v4653_v48, %v4054_v49  ;;  %v4036_v55 = vld [vmem:[%s5438_s13 + $0x48] sm:$0xf]  ;;  %v4651_v56 = vld [vmem:[%s5438_s13 + $0x54] sm:$0xf0] }
 0x744   : > { %2562 = vmatpush.bf16.msrb.mxu1 %v4245_v1  ;;  %2575 = vmatpush.bf16.msrb.mxu2 %v4121_v2  ;;  %v4164_v57 = vld [vmem:[%s5438_s13 + $0x148] sm:$0xf]  ;;  %v4185_v58 = vor.u32 %v4685_v50, %v4182_v51  ;;  %v4683_v36 = vld [vmem:[%s5438_s13 + $0x154] sm:$0xf0]  ;;  %v4649_v38 = vld [vmem:[%s5438_s13 + $0x4c] sm:$0xf]  ;;  %v4037_v62 = vor.u32 %v4651_v56, %v4036_v55 }
 0x745   : > { %2588 = vmatpush.bf16.msrb.mxu3 %v4249_v3  ;;  %2518 = vmatmul.bf16.vlgmr.msra.gmra.mxu1 %v5641_v11  ;;  %v4038_v59 = vld [vmem:[%s5438_s13 + $0x58] sm:$0xf0]  ;;  %v4681_v60 = vld [vmem:[%s5438_s13 + $0x14c] sm:$0xf]  ;;  %v4165_v63 = vor.u32 %v4683_v36, %v4164_v57  ;;  %v4020_v1 = vld [vmem:[%s5438_s13 + $0x28] sm:$0xf] }
 0x746   : > { %2544 = vmatmul.bf16.vlgmr.msra.gmra.mxu3 %v5641_v11  ;;  %v4166_v61 = vld [vmem:[%s5438_s13 + $0x158] sm:$0xf0]  ;;  %v4041_v0 = vor.u32 %v4649_v38, %v4038_v59  ;;  %v4647_v2 = vld [vmem:[%s5438_s13 + $0x34] sm:$0xf0]  ;;  %v4148_v7 = vld [vmem:[%s5438_s13 + $0x128] sm:$0xf] }
 0x747   : > { %2550 = vmatpush.bf16.msrb.mxu0 %v4101_v14  ;;  %v4169_v4 = vor.u32 %v4681_v60, %v4166_v61  ;;  %v4679_v5 = vld [vmem:[%s5438_s13 + $0x134] sm:$0xf0]  ;;  %v4645_v3 = vld [vmem:[%s5438_s13 + $0x2c] sm:$0xf]  ;;  %v4022_v8 = vld [vmem:[%s5438_s13 + $0x38] sm:$0xf0]  ;;  %v4021_v12 = vor.u32 %v4647_v2, %v4020_v1 }
 0x748   : > { %2563 = vmatpush.bf16.msrb.mxu1 %v4229_v15  ;;  %2576 = vmatpush.bf16.msrb.mxu2 %v4105_v16  ;;  %v4677_v9 = vld [vmem:[%s5438_s13 + $0x12c] sm:$0xf]  ;;  %v4150_v10 = vld [vmem:[%s5438_s13 + $0x138] sm:$0xf0]  ;;  %v4004_v13 = vld [vmem:[%s5438_s13 + $0x8] sm:$0xf]  ;;  %v4149_v14 = vor.u32 %v4679_v5, %v4148_v7  ;;  %v4025_v15 = vor.u32 %v4645_v3, %v4022_v8 }
 0x749   : > { %2589 = vmatpush.bf16.msrb.mxu3 %v4233_v22  ;;  %v4643_v16 = vld [vmem:[%s5438_s13 + $0x14] sm:$0xf0]  ;;  %v4132_v17 = vld [vmem:[%s5438_s13 + $0x108] sm:$0xf]  ;;  %v4153_v21 = vor.u32 %v4677_v9, %v4150_v10  ;;  %v4641_v22 = vld [vmem:[%s5438_s13 + $0xc] sm:$0xf] }
 0x74a   : > { %v4675_v18 = vld [vmem:[%s5438_s13 + $0x114] sm:$0xf0]  ;;  %v4006_v23 = vld [vmem:[%s5438_s13 + $0x18] sm:$0xf0]  ;;  %v4673_v24 = vld [vmem:[%s5438_s13 + $0x10c] sm:$0xf] }
 0x74b   : > { %2551 = vmatpush.bf16.msrb.mxu0 %v4085_v28  ;;  %v4134_v25 = vld [vmem:[%s5438_s13 + $0x118] sm:$0xf0]  ;;  %v4308_v26 = vld [vmem:[%s5447_s7 + $0x70] sm:$0xf]  ;;  %v4719_v27 = vld [vmem:[%s5447_s7 + $0x74] sm:$0xf0]  ;;  %v4005_v28 = vor.u32 %v4643_v16, %v4004_v13  ;;  %v4133_v31 = vor.u32 %v4675_v18, %v4132_v17  ;;  %v4009_v32 = vor.u32 %v4641_v22, %v4006_v23 }
 0x74c   : > { %2564 = vmatpush.bf16.msrb.mxu1 %v4213_v29  ;;  %2577 = vmatpush.bf16.msrb.mxu2 %v4089_v30  ;;  %v4372_v29 = vld [vmem:[%s5447_s7 + $0xf0] sm:$0xf]  ;;  %v4735_v30 = vld [vmem:[%s5447_s7 + $0xf4] sm:$0xf0]  ;;  %v4137_v33 = vor.u32 %v4673_v24, %v4134_v25  ;;  %v4300_v37 = vld [vmem:[%s5447_s7 + $0x60] sm:$0xf] }
 0x74d   : > { %2590 = vmatpush.bf16.msrb.mxu3 %v4217_v34  ;;  %v4309_v34 = vor.u32 %v4719_v27, %v4308_v26  ;;  %v4436_v35 = vld [vmem:[%s5447_s7 + $0x170] sm:$0xf]  ;;  %v4751_v19 = vld [vmem:[%s5447_s7 + $0x174] sm:$0xf0]  ;;  %v4717_v39 = vld [vmem:[%s5447_s7 + $0x64] sm:$0xf0]  ;;  %v4373_v40 = vor.u32 %v4735_v30, %v4372_v29 }
 0x74e   : > { %v4301_v44 = vor.u32 %v4717_v39, %v4300_v37  ;;  %v4428_v45 = vld [vmem:[%s5447_s7 + $0x160] sm:$0xf]  ;;  %v4749_v20 = vld [vmem:[%s5447_s7 + $0x164] sm:$0xf0]  ;;  %v4715_v47 = vld [vmem:[%s5447_s7 + $0x54] sm:$0xf0] }
 0x74f   : > { %2552 = vmatpush.bf16.msrb.mxu0 %v4069_v41  ;;  %v4364_v41 = vld [vmem:[%s5447_s7 + $0xe0] sm:$0xf]  ;;  %v4356_v49 = vld [vmem:[%s5447_s7 + $0xd0] sm:$0xf]  ;;  %v4731_v50 = vld [vmem:[%s5447_s7 + $0xd4] sm:$0xf0]  ;;  %v4429_v51 = vor.u32 %v4749_v20, %v4428_v45 }
 0x750   : > { %2565 = vmatpush.bf16.msrb.mxu1 %v4197_v42  ;;  %2578 = vmatpush.bf16.msrb.mxu2 %v4073_v43  ;;  %v4733_v42 = vld [vmem:[%s5447_s7 + $0xe4] sm:$0xf0]  ;;  %v4437_v43 = vor.u32 %v4751_v19, %v4436_v35  ;;  %v4357_v55 = vor.u32 %v4731_v50, %v4356_v49  ;;  %v4348_v56 = vld [vmem:[%s5447_s7 + $0xc0] sm:$0xf]  ;;  %v4276_v57 = vld [vmem:[%s5447_s7 + $0x30] sm:$0xf] }
 0x751   : > { %2591 = vmatpush.bf16.msrb.mxu3 %v4201_v46  ;;  %v4292_v46 = vld [vmem:[%s5447_s7 + $0x50] sm:$0xf]  ;;  %v4365_v48 = vor.u32 %v4733_v42, %v4364_v41  ;;  %v4727_v59 = vld [vmem:[%s5447_s7 + $0xb4] sm:$0xf0]  ;;  %v4268_v61 = vld [vmem:[%s5447_s7 + $0x20] sm:$0xf] }
 0x752   : > { %v4340_v38 = vld [vmem:[%s5447_s7 + $0xb0] sm:$0xf]  ;;  %v4725_v1 = vld [vmem:[%s5447_s7 + $0xa4] sm:$0xf0]  ;;  %v4723_v8 = vld [vmem:[%s5447_s7 + $0x94] sm:$0xf0] }
 0x753   : > { %2553 = vmatpush.bf16.msrb.mxu0 %v4053_v52  ;;  %v4293_v52 = vor.u32 %v4715_v47, %v4292_v46  ;;  %v4260_v7 = vld [vmem:[%s5447_s7 + $0x10] sm:$0xf]  ;;  %v4252_v10 = vld [vmem:[%s5447_s7] sm:$0xf]  ;;  %v4718_v13 = vld [vmem:[%s5447_s7 + $0x74] sm:$0xf] }
 0x754   : > { %2566 = vmatpush.bf16.msrb.mxu1 %v4181_v53  ;;  %2579 = vmatpush.bf16.msrb.mxu2 %v4057_v54  ;;  %v4284_v53 = vld [vmem:[%s5447_s7 + $0x40] sm:$0xf]  ;;  %v4713_v54 = vld [vmem:[%s5447_s7 + $0x44] sm:$0xf0]  ;;  %v4324_v3 = vld [vmem:[%s5447_s7 + $0x90] sm:$0xf] }
 0x755   : > { %2592 = vmatpush.bf16.msrb.mxu3 %v4185_v58  ;;  %v4711_v58 = vld [vmem:[%s5447_s7 + $0x34] sm:$0xf0]  ;;  %v4316_v16 = vld [vmem:[%s5447_s7 + $0x80] sm:$0xf]  ;;  %v4721_v17 = vld [vmem:[%s5447_s7 + $0x84] sm:$0xf0] }
 0x756   : > { %v4277_v60 = vor.u32 %v4711_v58, %v4276_v57  ;;  %v4317_v22 = vor.u32 %v4721_v17, %v4316_v16  ;;  %v4716_v23 = vld [vmem:[%s5447_s7 + $0x64] sm:$0xf]  ;;  %v4302_v24 = vld [vmem:[%s5447_s7 + $0x68] sm:$0xf0]  ;;  %v4500_v26 = vld [vmem:[%s5447_s7 + $0x1f0] sm:$0xf] }
 0x757   : > { %2554 = vmatpush.bf16.msrb.mxu0 %v4037_v62  ;;  %v4709_v62 = vld [vmem:[%s5447_s7 + $0x24] sm:$0xf0]  ;;  %v4305_v25 = vor.u32 %v4716_v23, %v4302_v24  ;;  %v4767_v27 = vld [vmem:[%s5447_s7 + $0x1f4] sm:$0xf0]  ;;  %v4374_v30 = vld [vmem:[%s5447_s7 + $0xf8] sm:$0xf0] }
 0x758   : > { %2567 = vmatpush.bf16.msrb.mxu1 %v4165_v63  ;;  %2580 = vmatpush.bf16.msrb.mxu2 %v4041_v0  ;;  %v4341_v63 = vor.u32 %v4727_v59, %v4340_v38  ;;  %v4332_v0 = vld [vmem:[%s5447_s7 + $0xa0] sm:$0xf]  ;;  %v4269_v2 = vor.u32 %v4709_v62, %v4268_v61  ;;  %v4501_v29 = vor.u32 %v4767_v27, %v4500_v26  ;;  %v4294_v19 = vld [vmem:[%s5447_s7 + $0x58] sm:$0xf0]  ;;  %v4732_v41 = vld [vmem:[%s5447_s7 + $0xe4] sm:$0xf] }
 0x759   : > { %2593 = vmatpush.bf16.msrb.mxu3 %v4169_v4  ;;  %v4707_v4 = vld [vmem:[%s5447_s7 + $0x14] sm:$0xf0]  ;;  %v4333_v5 = vor.u32 %v4725_v1, %v4332_v0  ;;  %v4492_v39 = vld [vmem:[%s5447_s7 + $0x1e0] sm:$0xf]  ;;  %v4745_v20 = vld [vmem:[%s5447_s7 + $0x144] sm:$0xf0] }
 0x75a   : > { %v4261_v9 = vor.u32 %v4707_v4, %v4260_v7  ;;  %v4412_v45 = vld [vmem:[%s5447_s7 + $0x140] sm:$0xf]  ;;  %v4712_v46 = vld [vmem:[%s5447_s7 + $0x44] sm:$0xf]  ;;  %v4484_v50 = vld [vmem:[%s5447_s7 + $0x1d0] sm:$0xf] }
 0x75b   : > { %2555 = vmatpush.bf16.msrb.mxu0 %v4021_v12  ;;  %v4705_v12 = vld [vmem:[%s5447_s7 + $0x4] sm:$0xf0]  ;;  %v4413_v47 = vor.u32 %v4745_v20, %v4412_v45  ;;  %v4278_v58 = vld [vmem:[%s5447_s7 + $0x38] sm:$0xf0]  ;;  %v4476_v38 = vld [vmem:[%s5447_s7 + $0x1c0] sm:$0xf] }
 0x75c   : > { %2568 = vmatpush.bf16.msrb.mxu1 %v4149_v14  ;;  %2581 = vmatpush.bf16.msrb.mxu2 %v4025_v15  ;;  %v4325_v14 = vor.u32 %v4723_v8, %v4324_v3  ;;  %v4310_v15 = vld [vmem:[%s5447_s7 + $0x78] sm:$0xf0]  ;;  %v4253_v18 = vor.u32 %v4705_v12, %v4252_v10  ;;  %v4761_v59 = vld [vmem:[%s5447_s7 + $0x1c4] sm:$0xf0]  ;;  %v4350_v62 = vld [vmem:[%s5447_s7 + $0xc8] sm:$0xf0] }
 0x75d   : > { %2594 = vmatpush.bf16.msrb.mxu3 %v4153_v21  ;;  %v4313_v21 = vor.u32 %v4718_v13, %v4310_v15  ;;  %v4477_v61 = vor.u32 %v4761_v59, %v4476_v38  ;;  %v4396_v0 = vld [vmem:[%s5447_s7 + $0x120] sm:$0xf]  ;;  %v4741_v1 = vld [vmem:[%s5447_s7 + $0x124] sm:$0xf0]  ;;  %v4270_v4 = vld [vmem:[%s5447_s7 + $0x28] sm:$0xf0] }
 0x75e   : > { %v4397_v7 = vor.u32 %v4741_v1, %v4396_v0  ;;  %v4468_v3 = vld [vmem:[%s5447_s7 + $0x1b0] sm:$0xf]  ;;  %v4759_v8 = vld [vmem:[%s5447_s7 + $0x1b4] sm:$0xf0]  ;;  %v4342_v12 = vld [vmem:[%s5447_s7 + $0xb8] sm:$0xf0] }
 0x75f   : > { %2556 = vmatpush.bf16.msrb.mxu0 %v4005_v28  ;;  %v4734_v28 = vld [vmem:[%s5447_s7 + $0xf4] sm:$0xf]  ;;  %v4469_v10 = vor.u32 %v4759_v8, %v4468_v3  ;;  %v4388_v13 = vld [vmem:[%s5447_s7 + $0x110] sm:$0xf]  ;;  %v4757_v23 = vld [vmem:[%s5447_s7 + $0x1a4] sm:$0xf0] }
 0x760   : > { %2569 = vmatpush.bf16.msrb.mxu1 %v4133_v31  ;;  %2582 = vmatpush.bf16.msrb.mxu2 %v4009_v32  ;;  %v4377_v31 = vor.u32 %v4734_v28, %v4374_v30  ;;  %v4420_v32 = vld [vmem:[%s5447_s7 + $0x150] sm:$0xf]  ;;  %v4706_v17 = vld [vmem:[%s5447_s7 + $0x14] sm:$0xf]  ;;  %v4724_v24 = vld [vmem:[%s5447_s7 + $0xa4] sm:$0xf] }
 0x761   : > { %2595 = vmatpush.bf16.msrb.mxu3 %v4137_v33  ;;  %v4747_v33 = vld [vmem:[%s5447_s7 + $0x154] sm:$0xf0]  ;;  %v4380_v28 = vld [vmem:[%s5447_s7 + $0x100] sm:$0xf]  ;;  %v4704_v30 = vld [vmem:[%s5447_s7 + $0x4] sm:$0xf] }
 0x762   : > { %2557 = vmatmul.bf16.vlgmr.msrb.gmra.mxu0 %v5636_v6  ;;  %v4421_v35 = vor.u32 %v4747_v33, %v4420_v32  ;;  %v4254_v32 = vld [vmem:[%s5447_s7 + $0x8] sm:$0xf0]  ;;  %v4750_v33 = vld [vmem:[%s5447_s7 + $0x174] sm:$0xf]  ;;  %v4748_v45 = vld [vmem:[%s5447_s7 + $0x164] sm:$0xf] }
 0x763   : > { %2995 = vmatpush.bf16.msra.mxu0 %v4309_v34  ;;  %2570 = vmatmul.bf16.vlgmr.msrb.gmra.mxu1 %v5641_v11  ;;  %v4714_v34 = vld [vmem:[%s5447_s7 + $0x54] sm:$0xf]  ;;  %v4430_v20 = vld [vmem:[%s5447_s7 + $0x168] sm:$0xf0] }
 0x764   : > { %3008 = vmatpush.bf16.msra.mxu1 %v4373_v40  ;;  %2583 = vmatmul.bf16.vlgmr.msrb.gmra.mxu2 %v5636_v6  ;;  %v4729_v6 = vld [vmem:[%s5447_s7 + $0xc4] sm:$0xf0]  ;;  %v4297_v37 = vor.u32 %v4714_v34, %v4294_v19  ;;  %v4438_v34 = vld [vmem:[%s5447_s7 + $0x178] sm:$0xf0]  ;;  %v4494_v38 = vld [vmem:[%s5447_s7 + $0x1e8] sm:$0xf0] }
 0x765   : > { %2596 = vmatmul.bf16.vlgmr.msrb.gmra.mxu3 %v5641_v11  ;;  %3021 = vmatpush.bf16.msra.mxu2 %v4437_v43  ;;  %v4285_v11 = vor.u32 %v4713_v54, %v4284_v53  ;;  %v4349_v36 = vor.u32 %v4729_v6, %v4348_v56  ;;  %v4765_v40 = vld [vmem:[%s5447_s7 + $0x1e4] sm:$0xf0]  ;;  %v4366_v43 = vld [vmem:[%s5447_s7 + $0xe8] sm:$0xf0]  ;;  %v4730_v53 = vld [vmem:[%s5447_s7 + $0xd4] sm:$0xf]  ;;  %v4441_v19 = vor.u32 %v4750_v33, %v4438_v34 }
 0x766   : > { %3034 = vmatpush.bf16.msra.mxu3 %v4501_v29  ;;  %v4493_v42 = vor.u32 %v4765_v40, %v4492_v39  ;;  %v4358_v54 = vld [vmem:[%s5447_s7 + $0xd8] sm:$0xf0]  ;;  %v4404_v56 = vld [vmem:[%s5447_s7 + $0x130] sm:$0xf]  ;;  %v4743_v6 = vld [vmem:[%s5447_s7 + $0x134] sm:$0xf0] }
 0x767   : > { %2996 = vmatpush.bf16.msra.mxu0 %v4301_v44  ;;  %v4369_v44 = vor.u32 %v4732_v41, %v4366_v43  ;;  %v4405_v57 = vor.u32 %v4743_v6, %v4404_v56  ;;  %v4737_v29 = vld [vmem:[%s5447_s7 + $0x104] sm:$0xf0]  ;;  %v4755_v39 = vld [vmem:[%s5447_s7 + $0x194] sm:$0xf0]  ;;  %v4722_v40 = vld [vmem:[%s5447_s7 + $0x94] sm:$0xf] }
 0x768   : > { %3009 = vmatpush.bf16.msra.mxu1 %v4365_v48  ;;  %v4286_v48 = vld [vmem:[%s5447_s7 + $0x48] sm:$0xf0]  ;;  %v4746_v6 = vld [vmem:[%s5447_s7 + $0x154] sm:$0xf]  ;;  %v4756_v33 = vld [vmem:[%s5447_s7 + $0x1a4] sm:$0xf] }
 0x769   : > { %3022 = vmatpush.bf16.msra.mxu2 %v4429_v51  ;;  %v4289_v49 = vor.u32 %v4712_v46, %v4286_v48  ;;  %v4763_v51 = vld [vmem:[%s5447_s7 + $0x1d4] sm:$0xf0]  ;;  %v4444_v46 = vld [vmem:[%s5447_s7 + $0x180] sm:$0xf]  ;;  %v4753_v48 = vld [vmem:[%s5447_s7 + $0x184] sm:$0xf0] }
 0x76a   : > { %3035 = vmatpush.bf16.msra.mxu3 %v4493_v42  ;;  %v4326_v42 = vld [vmem:[%s5447_s7 + $0x98] sm:$0xf0]  ;;  %v4742_v8 = vld [vmem:[%s5447_s7 + $0x134] sm:$0xf] }
 0x76b   : > { %2997 = vmatpush.bf16.msra.mxu0 %v4293_v52  ;;  %v4485_v52 = vor.u32 %v4763_v51, %v4484_v50  ;;  %v4329_v43 = vor.u32 %v4722_v40, %v4326_v42  ;;  %v4318_v50 = vld [vmem:[%s5447_s7 + $0x88] sm:$0xf0]  ;;  %v4445_v51 = vor.u32 %v4753_v48, %v4444_v46 }
 0x76c   : > { %3010 = vmatpush.bf16.msra.mxu1 %v4357_v55  ;;  %v4361_v55 = vor.u32 %v4730_v53, %v4358_v54  ;;  %v4766_v53 = vld [vmem:[%s5447_s7 + $0x1f4] sm:$0xf]  ;;  %v4502_v54 = vld [vmem:[%s5447_s7 + $0x1f8] sm:$0xf0]  ;;  %v4446_v48 = vld [vmem:[%s5447_s7 + $0x188] sm:$0xf0] }
 0x76d   : > { %3023 = vmatpush.bf16.msra.mxu2 %v4421_v35  ;;  %v4257_v35 = vor.u32 %v4704_v30, %v4254_v32  ;;  %v4505_v56 = vor.u32 %v4766_v53, %v4502_v54  ;;  %v4390_v32 = vld [vmem:[%s5447_s7 + $0x118] sm:$0xf0] }
 0x76e   : > { %3036 = vmatpush.bf16.msra.mxu3 %v4485_v52 }
 0x76f   : > { %2998 = vmatpush.bf16.msra.mxu0 %v4285_v11  ;;  %v4710_v11 = vld [vmem:[%s5447_s7 + $0x34] sm:$0xf] }
 0x770   : > { %3011 = vmatpush.bf16.msra.mxu1 %v4349_v36  ;;  %v4281_v36 = vor.u32 %v4710_v11, %v4278_v58  ;;  %v4422_v11 = vld [vmem:[%s5447_s7 + $0x158] sm:$0xf0] }
 0x771   : > { %3024 = vmatpush.bf16.msra.mxu2 %v4413_v47  ;;  %v4433_v47 = vor.u32 %v4748_v45, %v4430_v20  ;;  %v4454_v45 = vld [vmem:[%s5447_s7 + $0x198] sm:$0xf0] }
 0x772   : > { %3037 = vmatpush.bf16.msra.mxu3 %v4477_v61 }
 0x773   : > { %2999 = vmatpush.bf16.msra.mxu0 %v4277_v60  ;;  %v4728_v60 = vld [vmem:[%s5447_s7 + $0xc4] sm:$0xf] }
 0x774   : > { %3012 = vmatpush.bf16.msra.mxu1 %v4341_v63  ;;  %v4353_v63 = vor.u32 %v4728_v60, %v4350_v62  ;;  %v4744_v62 = vld [vmem:[%s5447_s7 + $0x144] sm:$0xf] }
 0x775   : > { %3025 = vmatpush.bf16.msra.mxu2 %v4405_v57  ;;  %v4425_v57 = vor.u32 %v4746_v6, %v4422_v11 }
 0x776   : > { %3038 = vmatpush.bf16.msra.mxu3 %v4469_v10 }
 0x777   : > { %3000 = vmatpush.bf16.msra.mxu0 %v4269_v2  ;;  %v4708_v2 = vld [vmem:[%s5447_s7 + $0x24] sm:$0xf] }
 0x778   : > { %3013 = vmatpush.bf16.msra.mxu1 %v4333_v5  ;;  %v4273_v5 = vor.u32 %v4708_v2, %v4270_v4  ;;  %v4486_v4 = vld [vmem:[%s5447_s7 + $0x1d8] sm:$0xf0] }
 0x779   : > { %3026 = vmatpush.bf16.msra.mxu2 %v4397_v7  ;;  %v4762_v7 = vld [vmem:[%s5447_s7 + $0x1d4] sm:$0xf] }
 0x77a   : > { %v4489_v3 = vor.u32 %v4762_v7, %v4486_v4 }
 0x77b   : > { %3001 = vmatpush.bf16.msra.mxu0 %v4261_v9  ;;  %v4726_v9 = vld [vmem:[%s5447_s7 + $0xb4] sm:$0xf] }
 0x77c   : > { %3014 = vmatpush.bf16.msra.mxu1 %v4325_v14  ;;  %v4739_v14 = vld [vmem:[%s5447_s7 + $0x114] sm:$0xf0]  ;;  %v4345_v15 = vor.u32 %v4726_v9, %v4342_v12  ;;  %v4406_v9 = vld [vmem:[%s5447_s7 + $0x138] sm:$0xf0] }
 0x77d   : > { %v4389_v16 = vor.u32 %v4739_v14, %v4388_v13  ;;  %v4409_v13 = vor.u32 %v4742_v8, %v4406_v9 }
 0x77f   : > { %3002 = vmatpush.bf16.msra.mxu0 %v4253_v18  ;;  %v4262_v18 = vld [vmem:[%s5447_s7 + $0x18] sm:$0xf0]  ;;  %3027 = vmatpush.bf16.msra.mxu2 %v4389_v16 }
 0x780   : > { %3015 = vmatpush.bf16.msra.mxu1 %v4317_v22  ;;  %v4265_v22 = vor.u32 %v4706_v17, %v4262_v18  ;;  %v4760_v17 = vld [vmem:[%s5447_s7 + $0x1c4] sm:$0xf]  ;;  %v4478_v18 = vld [vmem:[%s5447_s7 + $0x1c8] sm:$0xf0] }
 0x783   : > { %3047 = vmatpush.bf16.msrb.mxu0 %v4313_v21  ;;  %v4460_v21 = vld [vmem:[%s5447_s7 + $0x1a0] sm:$0xf] }
 0x784   : > { %3060 = vmatpush.bf16.msrb.mxu1 %v4377_v31  ;;  %v4461_v26 = vor.u32 %v4757_v23, %v4460_v21  ;;  %v4381_v31 = vor.u32 %v4737_v29, %v4380_v28  ;;  %v4758_v28 = vld [vmem:[%s5447_s7 + $0x1b4] sm:$0xf]  ;;  %v4470_v29 = vld [vmem:[%s5447_s7 + $0x1b8] sm:$0xf0] }
 0x785   : > { %v4473_v30 = vor.u32 %v4758_v28, %v4470_v29 }
 0x786   : > { %3039 = vmatpush.bf16.msra.mxu3 %v4461_v26  ;;  %3028 = vmatpush.bf16.msra.mxu2 %v4381_v31  ;;  %v4738_v31 = vld [vmem:[%s5447_s7 + $0x114] sm:$0xf] }
 0x787   : > { %3048 = vmatpush.bf16.msrb.mxu0 %v4305_v25  ;;  %v4334_v25 = vld [vmem:[%s5447_s7 + $0xa8] sm:$0xf0] }
 0x788   : > { %3061 = vmatpush.bf16.msrb.mxu1 %v4369_v44  ;;  %v4337_v27 = vor.u32 %v4724_v24, %v4334_v25  ;;  %v5797_v44 = vld [vmem:[%s377_s14] sm:$0xf]  ;;  %v4740_v24 = vld [vmem:[%s5447_s7 + $0x124] sm:$0xf]  ;;  %v4398_v25 = vld [vmem:[%s5447_s7 + $0x128] sm:$0xf0] }
 0x789   : > { %v2170_v2 = vperm.slane %v5797_v44, 1  ;;  %v4401_v26 = vor.u32 %v4740_v24, %v4398_v25 }
 0x78a   : > { %3073 = vmatpush.bf16.msrb.mxu2 %v4441_v19  ;;  %v4462_v19 = vld [vmem:[%s5447_s7 + $0x1a8] sm:$0xf0] }
 0x78b   : > { %3049 = vmatpush.bf16.msrb.mxu0 %v4297_v37  ;;  %v4452_v37 = vld [vmem:[%s5447_s7 + $0x190] sm:$0xf] }
 0x78c   : > { %3062 = vmatpush.bf16.msrb.mxu1 %v4361_v55  ;;  %v4453_v41 = vor.u32 %v4755_v39, %v4452_v37  ;;  %v2169_v55 = vperm.slane %v5797_v44, 0  ;;  %v4736_v37 = vld [vmem:[%s5447_s7 + $0x104] sm:$0xf]  ;;  %v4382_v39 = vld [vmem:[%s5447_s7 + $0x108] sm:$0xf0] }
 0x78d   : > { %v4385_v20 = vor.u32 %v4736_v37, %v4382_v39 }
 0x78e   : > { %3040 = vmatpush.bf16.msra.mxu3 %v4453_v41  ;;  %3074 = vmatpush.bf16.msrb.mxu2 %v4433_v47  ;;  %v4465_v41 = vor.u32 %v4756_v33, %v4462_v19  ;;  %v4752_v47 = vld [vmem:[%s5447_s7 + $0x184] sm:$0xf] }
 0x78f   : > { %3050 = vmatpush.bf16.msrb.mxu0 %v4289_v49  ;;  %v4720_v49 = vld [vmem:[%s5447_s7 + $0x84] sm:$0xf] }
 0x790   : > { %3063 = vmatpush.bf16.msrb.mxu1 %v4353_v63  ;;  %v4321_v52 = vor.u32 %v4720_v49, %v4318_v50  ;;  %v4414_v63 = vld [vmem:[%s5447_s7 + $0x148] sm:$0xf0]  ;;  %v4449_v49 = vor.u32 %v4752_v47, %v4446_v48  ;;  %v2171_v50 = vperm.slane %v5797_v44, 2 }
 0x791   : > { %v4417_v1 = vor.u32 %v4744_v62, %v4414_v63 }
 0x792   : > { %3041 = vmatpush.bf16.msra.mxu3 %v4445_v51  ;;  %3075 = vmatpush.bf16.msrb.mxu2 %v4425_v57 }
 0x793   : > { %3051 = vmatpush.bf16.msrb.mxu0 %v4281_v36  ;;  %v4764_v36 = vld [vmem:[%s5447_s7 + $0x1e4] sm:$0xf] }
 0x794   : > { %3064 = vmatpush.bf16.msrb.mxu1 %v4345_v15  ;;  %v4497_v61 = vor.u32 %v4764_v36, %v4494_v38 }
 0x796   : > { %3086 = vmatpush.bf16.msrb.mxu3 %v4505_v56  ;;  %3076 = vmatpush.bf16.msrb.mxu2 %v4417_v1 }
 0x797   : > { %3052 = vmatpush.bf16.msrb.mxu0 %v4273_v5 }
 0x798   : > { %3065 = vmatpush.bf16.msrb.mxu1 %v4337_v27 }
 0x79a   : > { %3087 = vmatpush.bf16.msrb.mxu3 %v4497_v61  ;;  %3077 = vmatpush.bf16.msrb.mxu2 %v4409_v13 }
 0x79b   : > { %3053 = vmatpush.bf16.msrb.mxu0 %v4265_v22  ;;  %v4481_v22 = vor.u32 %v4760_v17, %v4478_v18 }
 0x79c   : > { %3066 = vmatpush.bf16.msrb.mxu1 %v4329_v43  ;;  %v4754_v43 = vld [vmem:[%s5447_s7 + $0x194] sm:$0xf] }
 0x79d   : > { %v4457_v46 = vor.u32 %v4754_v43, %v4454_v45 }
 0x79e   : > { %3088 = vmatpush.bf16.msrb.mxu3 %v4489_v3  ;;  %3078 = vmatpush.bf16.msrb.mxu2 %v4401_v26 }
 0x79f   : > { %3054 = vmatpush.bf16.msrb.mxu0 %v4257_v35  ;;  %v4393_v35 = vor.u32 %v4738_v31, %v4390_v32 }
 0x7a0   : > { %3067 = vmatpush.bf16.msrb.mxu1 %v4321_v52 }
 0x7a2   : > { %3089 = vmatpush.bf16.msrb.mxu3 %v4481_v22  ;;  %3079 = vmatpush.bf16.msrb.mxu2 %v4393_v35 }
 0x7a6   : > { %3090 = vmatpush.bf16.msrb.mxu3 %v4473_v30  ;;  %3080 = vmatpush.bf16.msrb.mxu2 %v4385_v20 }
 0x7aa   : > { %3091 = vmatpush.bf16.msrb.mxu3 %v4465_v41 }
 0x7ae   : > { %3092 = vmatpush.bf16.msrb.mxu3 %v4457_v46 }
 0x7b2   : > { %3093 = vmatpush.bf16.msrb.mxu3 %v4449_v49 }
 0x7bf   : > { %v2506_v58 = vpop.f32.mrf.mxu0 }
 0x7c0   : > { %v2507_v59 = vadd.f32 %v2506_v58, %v2169_v55  ;;  %v2172_v55 = vperm.slane %v5797_v44, 3 }
 0x7c2   : > { %v2519_v60 = vpop.f32.mrf.mxu1 }
 0x7c3   : > { %v2520_v0 = vadd.f32 %v2519_v60, %v2507_v59 }
 0x7c5   : > { %v2601_v5 = vmax.f32 %v2520_v0, 0.0 }
 0x7c6   : > { %v2532_v12 = vpop.f32.mrf.mxu2 }
 0x7c7   : > { %v2607_v10 = vpack.c.bf16 %v2601_v5, %v2601_v5  ;;  %v2533_v14 = vadd.f32 %v2532_v12, %v2170_v2  ;;  %v2508_v16 = vpop.f32.mrf.mxu0  ;;  %v2605_v12 = vld [vmem:[#allocation3 + $0x8] sm:$0xff] }
 0x7c9   : > { %v2545_v15 = vpop.f32.mrf.mxu3  ;;  %3003 = vmatmul.bf16.vlgmr.msra.gmra.mxu0 %v2607_v10 }
 0x7ca   : > { %v2521_v21 = vpop.f32.mrf.mxu1  ;;  %v2546_v23 = vadd.f32 %v2545_v15, %v2533_v14 }
 0x7cc   : > { %v2602_v27 = vmax.f32 %v2546_v23, 0.0  ;;  %v2606_v23 = vld [vmem:[#allocation3] sm:$0xff] }
 0x7ce   : > { %v2608_v34 = vpack.c.bf16 %v2602_v27, %v2602_v27  ;;  %v2534_v40 = vpop.f32.mrf.mxu2 }
 0x7d0   : > { %3016 = vmatmul.bf16.vlgmr.msra.gmra.mxu1 %v2608_v34 }
 0x7d1   : > { %v2547_v42 = vpop.f32.mrf.mxu3 }
 0x7d9   : > { %3055 = vmatmul.bf16.vlgmr.msrb.gmra.mxu0 %v2607_v10 }
 0x7df   : > { %v2558_v51 = vpop.f32.mrf.mxu0 }
 0x7e0   : > { %v2559_v52 = vadd.f32 %v2558_v51, %v2171_v50  ;;  %v2571_v53 = vpop.f32.mrf.mxu1  ;;  %3068 = vmatmul.bf16.vlgmr.msrb.gmra.mxu1 %v2608_v34 }
 0x7e2   : > { %v2572_v54 = vadd.f32 %v2571_v53, %v2559_v52 }
 0x7e4   : > { %v2603_v56 = vmax.f32 %v2572_v54, 0.0 }
 0x7e6   : > { %v2609_v6 = vpack.c.bf16 %v2603_v56, %v2603_v56 }
 0x7e7   : > { %v2584_v11 = vpop.f32.mrf.mxu2  ;;  %v2560_v36 = vpop.f32.mrf.mxu0 }
 0x7e8   : > { %v2585_v57 = vadd.f32 %v2584_v11, %v2172_v55  ;;  %v2597_v58 = vpop.f32.mrf.mxu3  ;;  %v2573_v38 = vpop.f32.mrf.mxu1  ;;  %3029 = vmatmul.bf16.vlgmr.msra.gmra.mxu2 %v2609_v6 }
 0x7ea   : > { %v2598_v59 = vadd.f32 %v2597_v58, %v2585_v57 }
 0x7ec   : > { %v2604_v60 = vmax.f32 %v2598_v59, 0.0 }
 0x7ee   : > { %v2610_v61 = vpack.c.bf16 %v2604_v60, %v2604_v60 }
 0x7ef   : > { %v2586_v62 = vpop.f32.mrf.mxu2 }
 0x7f0   : > { %v2599_v63 = vpop.f32.mrf.mxu3  ;;  %3042 = vmatmul.bf16.vlgmr.msra.gmra.mxu3 %v2610_v61 }
 0x7f8   : > { %3081 = vmatmul.bf16.vlgmr.msrb.gmra.mxu2 %v2609_v6 }
 0x800   : > { %3094 = vmatmul.bf16.vlgmr.msrb.gmra.mxu3 %v2610_v61 }
 0x846   : > { %v3004_v0 = vpop.f32.mrf.mxu0 }
 0x84d   : > { %v3017_v1 = vpop.f32.mrf.mxu1 }
 0x84e   : > { %v3006_v2 = vpop.f32.mrf.mxu0  ;;  %v3018_v9 = vadd.f32 %v3017_v1, %v3004_v0 }
 0x855   : > { %v3019_v44 = vpop.f32.mrf.mxu1 }
 0x856   : > { %v3056_v7 = vpop.f32.mrf.mxu0 }
 0x85d   : > { %v3069_v4 = vpop.f32.mrf.mxu1 }
 0x85e   : > { %v3058_v5 = vpop.f32.mrf.mxu0  ;;  %v3070_v21 = vadd.f32 %v3069_v4, %v3056_v7 }
 0x865   : > { %v3071_v3 = vpop.f32.mrf.mxu1 }
 0x86b   : > { %v3030_v8 = vpop.f32.mrf.mxu2 }
 0x86c   : > { %v3031_v10 = vadd.f32 %v3030_v8, %v3018_v9 }
 0x873   : > { %v3043_v13 = vpop.f32.mrf.mxu3  ;;  %v3032_v15 = vpop.f32.mrf.mxu2 }
 0x874   : > { %v3044_v14 = vadd.f32 %v3043_v13, %v3031_v10 }
 0x876   : > { %v3099_v16 = vadd.f32 %v3044_v14, %v2605_v12 }
 0x878   : > { %3101 = vst [vmem:[#allocation3 + $0x8] sm:$0xff] %v3099_v16 }
 0x87b   : > { %v3045_v17 = vpop.f32.mrf.mxu3  ;;  %v3082_v18 = vpop.f32.mrf.mxu2 }
 0x87c   : > { %v3083_v22 = vadd.f32 %v3082_v18, %v3070_v21 }
 0x883   : > { %v3095_v24 = vpop.f32.mrf.mxu3  ;;  %v3084_v26 = vpop.f32.mrf.mxu2 }
 0x884   : > { %v3096_v25 = vadd.f32 %v3095_v24, %v3083_v22 }
 0x886   : > { %v3100_v27 = vadd.f32 %v3096_v25, %v2606_v23 }
 0x887   : > { %3106 = sbr.rel (%p4506_p5) target bundleno = 2911 (0xb5f), region = 84 }
 0x888   : > { %3102 = vst [vmem:[#allocation3] sm:$0xff] %v3100_v27 }
 0x88b   : > { %v3097_v28 = vpop.f32.mrf.mxu3 }
 0x88c   : > { %v3109_v29 = vld [vmem:[#allocation3 + $0x8] sm:$0xff]  ;;  %v3112_v31 = vld [vmem:[#allocation9 + $0x12] ss:$8 sm:$0x3]  ;;  %v5220_v42 = vmov 256.0   ;;  %v5221_v61 = vmov 8.0  }
 0x88d   : > { %v3114_v32 = vperm.slane %v3112_v31, 0  ;;  %v3115_v33 = vperm.slane %v3112_v31, 1  ;;  %v3107_v34 = vld [vmem:[#allocation2] sm:$0xff]  ;;  %v3108_v35 = vld [vmem:[#allocation2 + $0x8] sm:$0xff]  ;;  %4932 = vrcp.f32 %v5220_v42  ;;  %vm3302_vm6 = vcmask 15360  }
 0x88e   : > { %v3253_v56 = vld [vmem:[#allocation9 + $0x10] sm:$0x60]  ;;  %v3254_v6 = vld [vmem:[#allocation9 + $0x18] sm:$0x60] }
 0x88f   : > { %v3110_v30 = vld [vmem:[#allocation3] sm:$0xff]  ;;  %v3118_v19 = vadd.f32 %v3114_v32, %v3109_v29  ;;  %v3258_v11 = vrot.slane %v3253_v56, 5  ;;  %v3259_v57 = vrot.slane %v3254_v6, 5  ;;  %v3123_v0 = vld [vmem:[#allocation9 + $0x10] ss:$8 sm:$0x3] }
 0x890   : > { %v3119_v37 = vadd.f32 %v3115_v33, %v3110_v30  ;;  %v3125_v7 = vld [vmem:[#allocation9 + $0x11] ss:$8 sm:$0x3]  ;;  %v3159_v4 = vperm.slane %v3123_v0, 0  ;;  %v3160_v5 = vperm.slane %v3123_v0, 1 }
 0x891   : > { %v3120_v39 = vadd.f32 %v3118_v19, %v3107_v34  ;;  %3277 = vmatpush.xpose.msra.mxu0 %v3258_v11  ;;  %3297 = vmatpush.xpose.msra.mxu1 %v3259_v57  ;;  %v3166_v12 = vperm.slane %v3125_v7, 0  ;;  %v3167_v13 = vperm.slane %v3125_v7, 1  ;;  %v3236_v0 = vld [vmem:[#allocation9 + $0x13] ss:$8 sm:$0x3] }
 0x892   : > { %v3121_v40 = vadd.f32 %v3119_v37, %v3108_v35  ;;  %v3238_v7 = vperm.slane %v3236_v0, 0 }
 0x893   : > { %v4933_v43 = vpop.eup %4932 }
 0x894   : > { %v3126_v41 = vadd.f32 %v3121_v40, %v3120_v39  ;;  %v3130_v45 = vmul.f32 256.0, %v4933_v43  ;;  %vm3134_vm11 = vweird.f32 %v4933_v43 }
 0x896   : > { %3127 = vadd.xlane.f32.xlu0 %v3126_v41  ;;  %v3131_v20 = vsub.f32 1.0, %v3130_v45 }
 0x898   : > { %v3132_v46 = vmul.f32 %v4933_v43, %v3131_v20 }
 0x89a   : > { %v3133_v47 = vadd.f32 %v4933_v43, %v3132_v46 }
 0x89c   : > { %v3135_v48 = vsel %vm3134_vm11, %v4933_v43, %v3133_v47 }
 0x909   : > { %v3128_v49 = vpop.xlane.xlu0 %3127 }
 0x90a   : > { %v3136_v50 = vmul.f32 %v3135_v48, %v3128_v49 }
 0x90c   : > { %v3137_v51 = vsub.f32 %v3120_v39, %v3136_v50  ;;  %v3138_v52 = vsub.f32 %v3121_v40, %v3136_v50 }
 0x90e   : > { %v3139_v53 = vmul.f32 %v3137_v51, %v3137_v51  ;;  %v3140_v54 = vmul.f32 %v3138_v52, %v3138_v52 }
 0x910   : > { %v3141_v55 = vadd.f32 %v3140_v54, %v3139_v53 }
 0x912   : > { %3142 = vadd.xlane.f32.xlu0 %v3141_v55 }
 0x985   : > { %v3143_v58 = vpop.xlane.xlu0 %3142 }
 0x986   : > { %v3144_v36 = vmul.f32 %v3143_v58, %v3135_v48 }
 0x988   : > { %v3145_v38 = vadd.f32 1e-05, %v3144_v36 }
 0x98a   : > { %4934 = vrsqrt.f32 %v3145_v38  ;;  %vm3152_vm13 = vweird.f32 %v3145_v38 }
 0x98b   : > { %4936 = vrcp.f32 %v5221_v61 }
 0x990   : > { %v4935_v59 = vpop.eup %4934 }
 0x991   : > { %v3147_v60 = vmul.f32 %v4935_v59, %v3145_v38  ;;  %vm3153_vm12 = vweird.f32 %v4935_v59  ;;  %v4937_v2 = vpop.eup %4936 }
 0x992   : > { %vm3154_vm14 = vmor %vm3152_vm13, %vm3153_vm12  ;;  %v3185_v8 = vmul.f32 8.0, %v4937_v2  ;;  %vm3189_vm15 = vweird.f32 %v4937_v2 }
 0x993   : > { %v3148_v62 = vmul.f32 %v4935_v59, %v3147_v60 }
 0x994   : > { %v3186_v16 = vsub.f32 1.0, %v3185_v8 }
 0x995   : > { %v3149_v63 = vmul.f32 0.5, %v3148_v62 }
 0x996   : > { %v3187_v23 = vmul.f32 %v4937_v2, %v3186_v16 }
 0x997   : > { %v3150_v1 = vsub.f32 1.5, %v3149_v63 }
 0x998   : > { %v3188_v28 = vadd.f32 %v4937_v2, %v3187_v23 }
 0x999   : > { %v3151_v44 = vmul.f32 %v4935_v59, %v3150_v1 }
 0x99a   : > { %v3190_v33 = vsel %vm3189_vm15, %v4937_v2, %v3188_v28 }
 0x99b   : > { %v3155_v3 = vsel %vm3154_vm14, %v4935_v59, %v3151_v44  ;;  %v3245_v44 = vld [vmem:[#allocation9 + $0x14] ss:$8 sm:$0x3] }
 0x99c   : > { %v3156_v9 = vmul.f32 %v3155_v3, %v3137_v51  ;;  %v3157_v10 = vmul.f32 %v3155_v3, %v3138_v52  ;;  %v3239_v3 = vperm.slane %v3236_v0, 1 }
 0x99e   : > { %v3163_v14 = vmul.f32 %v3159_v4, %v3156_v9  ;;  %v3164_v15 = vmul.f32 %v3160_v5, %v3157_v10  ;;  %v3247_v9 = vperm.slane %v3245_v44, 0 }
 0x9a0   : > { %v3170_v17 = vadd.f32 %v3166_v12, %v3163_v14  ;;  %v3171_v18 = vadd.f32 %v3167_v13, %v3164_v15  ;;  %v3248_v13 = vperm.slane %v3245_v44, 1 }
 0x9a2   : > { %v3172_v21 = vrot.slane %v3170_v17, 4  ;;  %v3178_v22 = vrot.slane %v3171_v18, 4 }
 0x9a4   : > { %v3173_v24 = vadd.f32 %v3172_v21, %v3170_v17  ;;  %v3179_v25 = vadd.f32 %v3178_v22, %v3171_v18 }
 0x9a6   : > { %v3174_v26 = vrot.slane %v3173_v24, 2  ;;  %v3180_v27 = vrot.slane %v3179_v25, 2 }
 0x9a8   : > { %v3175_v29 = vadd.f32 %v3174_v26, %v3173_v24  ;;  %v3181_v30 = vadd.f32 %v3180_v27, %v3179_v25 }
 0x9aa   : > { %v3176_v31 = vrot.slane %v3175_v29, 1  ;;  %v3182_v32 = vrot.slane %v3181_v30, 1 }
 0x9ac   : > { %v3177_v34 = vadd.f32 %v3176_v31, %v3175_v29  ;;  %v3183_v35 = vadd.f32 %v3182_v32, %v3181_v30 }
 0x9ae   : > { %v3191_v19 = vmul.f32 %v3190_v33, %v3177_v34  ;;  %v3192_v37 = vmul.f32 %v3190_v33, %v3183_v35 }
 0x9b0   : > { %v3193_v39 = vsub.f32 %v3170_v17, %v3191_v19  ;;  %v3194_v40 = vsub.f32 %v3171_v18, %v3192_v37  ;;  %v3255_v18 = vld [vmem:[#allocation9 + $0x17] ss:$0 sm:$0xff] }
 0x9b2   : > { %v3195_v41 = vmul.f32 %v3193_v39, %v3193_v39  ;;  %v3196_v42 = vmul.f32 %v3194_v40, %v3194_v40 }
 0x9b4   : > { %v3197_v43 = vrot.slane %v3195_v41, 4  ;;  %v3203_v45 = vrot.slane %v3196_v42, 4 }
 0x9b6   : > { %v3198_v20 = vadd.f32 %v3197_v43, %v3195_v41  ;;  %v3204_v46 = vadd.f32 %v3203_v45, %v3196_v42 }
 0x9b8   : > { %v3199_v47 = vrot.slane %v3198_v20, 2  ;;  %v3205_v48 = vrot.slane %v3204_v46, 2 }
 0x9ba   : > { %v3200_v49 = vadd.f32 %v3199_v47, %v3198_v20  ;;  %v3206_v50 = vadd.f32 %v3205_v48, %v3204_v46 }
 0x9bc   : > { %v3201_v51 = vrot.slane %v3200_v49, 1  ;;  %v3207_v52 = vrot.slane %v3206_v50, 1 }
 0x9be   : > { %v3202_v53 = vadd.f32 %v3201_v51, %v3200_v49  ;;  %v3208_v54 = vadd.f32 %v3207_v52, %v3206_v50 }
 0x9c0   : > { %v3209_v55 = vmul.f32 %v3202_v53, %v3190_v33  ;;  %v3210_v56 = vmul.f32 %v3208_v54, %v3190_v33 }
 0x9c2   : > { %v3211_v6 = vadd.f32 1e-05, %v3209_v55  ;;  %v3212_v11 = vadd.f32 1e-05, %v3210_v56 }
 0x9c4   : > { %4938 = vrsqrt.f32 %v3211_v6  ;;  %vm3219_vm2 = vweird.f32 %v3211_v6  ;;  %vm3229_vm4 = vweird.f32 %v3212_v11 }
 0x9c5   : > { %4940 = vrsqrt.f32 %v3212_v11 }
 0x9ca   : > { %v4939_v57 = vpop.eup %4938 }
 0x9cb   : > { %v4941_v58 = vpop.eup %4940  ;;  %v3214_v36 = vmul.f32 %v4939_v57, %v3211_v6  ;;  %vm3220_vm0 = vweird.f32 %v4939_v57 }
 0x9cc   : > { %v3224_v38 = vmul.f32 %v4941_v58, %v3212_v11  ;;  %vm3230_vm1 = vweird.f32 %v4941_v58  ;;  %vm3221_vm3 = vmor %vm3219_vm2, %vm3220_vm0 }
 0x9cd   : > { %v3215_v59 = vmul.f32 %v4939_v57, %v3214_v36  ;;  %vm3231_vm5 = vmor %vm3229_vm4, %vm3230_vm1 }
 0x9ce   : > { %v3225_v60 = vmul.f32 %v4941_v58, %v3224_v38 }
 0x9cf   : > { %v3216_v61 = vmul.f32 0.5, %v3215_v59 }
 0x9d0   : > { %v3226_v62 = vmul.f32 0.5, %v3225_v60 }
 0x9d1   : > { %v3217_v63 = vsub.f32 1.5, %v3216_v61 }
 0x9d2   : > { %v3227_v1 = vsub.f32 1.5, %v3226_v62 }
 0x9d3   : > { %v3218_v2 = vmul.f32 %v4939_v57, %v3217_v63 }
 0x9d4   : > { %v3228_v4 = vmul.f32 %v4941_v58, %v3227_v1 }
 0x9d5   : > { %v3222_v5 = vsel %vm3221_vm3, %v4939_v57, %v3218_v2 }
 0x9d6   : > { %v3233_v8 = vmul.f32 %v3222_v5, %v3193_v39  ;;  %v3232_v10 = vsel %vm3231_vm5, %v4941_v58, %v3228_v4 }
 0x9d7   : > { %v3234_v12 = vmul.f32 %v3232_v10, %v3194_v40 }
 0x9d8   : > { %v3242_v14 = vmul.f32 %v3238_v7, %v3233_v8 }
 0x9d9   : > { %v3243_v15 = vmul.f32 %v3239_v3, %v3234_v12 }
 0x9da   : > { %v3251_v16 = vadd.f32 %v3247_v9, %v3242_v14 }
 0x9db   : > { %v3252_v17 = vadd.f32 %v3248_v13, %v3243_v15 }
 0x9dc   : > { %3278 = vmatmul.f32.vlgmr.msra.gmra.mxu0 %v3251_v16 }
 0x9dd   : > { %3298 = vmatmul.f32.vlgmr.msra.gmra.mxu1 %v3252_v17 }
 0xa59   : > { %v3279_v21 = vpop.f32.mrf.mxu0 }
 0xa5a   : > { %v3280_v22 = vadd.f32 %v3279_v21, %v3255_v18  ;;  %v3299_v23 = vpop.f32.mrf.mxu1 }
 0xa5c   : > { %v3300_v24 = vadd.f32 %v3299_v23, %v3280_v22 }
 0xa5e   : > { %v3303_v25 = vsel %vm3302_vm6, %v3300_v24, -inf }
 0xa5f   : > { %3304 = vmax.xlane.f32.xlu1 %v3303_v25 }
 0xad2   : > { %v3305_v26 = vpop.xlane.xlu1 %3304 }
 0xad3   : > { %v3306_v27 = vsub.f32 %v3300_v24, %v3305_v26 }
 0xad5   : > { %v3307_v28 = vmul.f32 1.442695, %v3306_v27 }
 0xad7   : > { %4942 = vpow2.f32 %v3307_v28 }
 0xadd   : > { %v4943_v29 = vpop.eup %4942 }
 0xade   : > { %v3309_v30 = vsel %vm3302_vm6, %v4943_v29, 0.0 }
 0xadf   : > { %3310 = vadd.xlane.f32.xlu1 %v3309_v30 }
 0xb52   : > { %v3311_v31 = vpop.xlane.xlu1 %3310 }
 0xb53   : > { %4944 = vlog2.f32 %v3311_v31 }
 0xb59   : > { %v4945_v32 = vpop.eup %4944 }
 0xb5a   : > { %v3313_v33 = vmul.f32 0.6931472, %v4945_v32 }
 0xb5c   : > { %v3314_v34 = vsub.f32 %v3306_v27, %v3313_v33 }
 0xb5e   : > { %3315 = vst.msk [vmem:[%s5890_s24] sm:$0xff] %vm3302_vm6, %v3314_v34 }
 0xb5f PF: > { %s5891_s27 = sld [smem:[#allocation19_spill]]  ;;  %s5894_s25 = smov %s5198_s26 }
 0xb60   : > { %s5892_s24 = sld [smem:[#allocation18_spill]] }
 0xb61   : > { %s5893_s1 = sld [smem:[#allocation20_spill]] }
 0xb65   : > { %p17_p8 = scmp.ge.s32.totalorder %s5891_s27, 6  }
 0xb67   : > { %s5895_s26 = smov %s5893_s1  ;;  %19 = sbr.rel (!%p17_p8) target bundleno = 9 (0x9), region = 141 }
 0xb6c   :  { %3327 = vsyncpa [#allocation5], 1 }
 0xb6d   :  { %3329 = vsyncpa [#allocation5 + $0x1], 1 }
 0xb6e   :  { %3330 = vsyncpa [#allocation7], 1 }
 0xb6f   :  { %3331 = vsyncpa [#allocation10], 1 }

</bundles_post_ra>
